<compile_context>
chip_gen: v7x
topology: tpu7x:2x2x1
jax: 0.10.0
libtpu: 0.0.40
codegen_flags: <defaults>
</compile_context>

<pallas_src>
import jax
import jax.numpy as jnp
from jax.experimental import pallas as pl
from jax.experimental.pallas import tpu as pltpu


# ----------------------------------------------------------------------------
# Pallas kernels: K-tiled matmul + BN affine + (residual) + masked ReLU
# ----------------------------------------------------------------------------
def _matmul_bn_kernel(x_ref, w_ref, s_ref, b_ref, m_ref, o_ref, acc_ref):
    kk = pl.program_id(1)

    @pl.when(kk == 0)
    def _():
        acc_ref[...] = jnp.zeros_like(acc_ref)

    acc_ref[...] += jnp.dot(x_ref[...], w_ref[...],
                            preferred_element_type=jnp.float32)

    @pl.when(kk == pl.num_programs(1) - 1)
    def _():
        y = acc_ref[...] * s_ref[...] + b_ref[...]
        y = jnp.where(m_ref[...] != 0.0, jnp.maximum(y, 0.0), y)
        o_ref[...] = y.astype(o_ref.dtype)


def _matmul_bn_res_kernel(x_ref, w_ref, s_ref, b_ref, m_ref, r_ref,
                          o_ref, acc_ref):
    kk = pl.program_id(1)

    @pl.when(kk == 0)
    def _():
        acc_ref[...] = jnp.zeros_like(acc_ref)

    acc_ref[...] += jnp.dot(x_ref[...], w_ref[...],
                            preferred_element_type=jnp.float32)

    @pl.when(kk == pl.num_programs(1) - 1)
    def _():
        y = acc_ref[...] * s_ref[...] + b_ref[...]
        y = y + r_ref[...].astype(jnp.float32)
        y = jnp.where(m_ref[...] != 0.0, jnp.maximum(y, 0.0), y)
        o_ref[...] = y.astype(o_ref.dtype)


# ----------------------------------------------------------------------------
# Helpers
# ----------------------------------------------------------------------------
def _round_up(x, m):
    return ((x + m - 1) // m) * m


def _choose_tm(M):
    # Largest tile that still yields >= 2 parallel grid steps (megacore);
    # grows to 256/512 for realistic spatial sizes.
    for tm in (512, 256, 128, 64):
        if M >= 2 * tm:
            return tm
    return 64


def _k_tiling(K):
    # Small K: keep the whole (padded) K resident (single reduction step).
    # Large K: tile by 512 with an f32 accumulator (keeps weight blocks small
    # for v7x's 64 MiB VMEM).
    Kp = _round_up(K, 128)
    if Kp <= 1024:
        return Kp, Kp
    TK = 512
    return _round_up(K, TK), TK


def fused_matmul_bn(patches, prep, residual=None):
    """patches: (M, K) bf16 im2col rows; prep: init-time packed weights."""
    M, K = patches.shape
    assert K == prep["K"], (K, prep["K"])
    Kp, TK, Np = prep["Kp"], prep["TK"], prep["Np"]
    TM = _choose_tm(M)
    Mp = _round_up(M, TM)

    xp = jnp.pad(patches.astype(jnp.bfloat16), ((0, Mp - M), (0, Kp - K)))
    args = [xp, prep["wp"], prep["sp"], prep["bp"], prep["mp"]]
    in_specs = [
        pl.BlockSpec((TM, TK), lambda i, kk: (i, kk)),
        pl.BlockSpec((TK, Np), lambda i, kk: (kk, 0)),
        pl.BlockSpec((1, Np), lambda i, kk: (0, 0)),
        pl.BlockSpec((1, Np), lambda i, kk: (0, 0)),
        pl.BlockSpec((1, Np), lambda i, kk: (0, 0)),
    ]
    if residual is not None:
        rp = jnp.pad(residual.astype(jnp.bfloat16),
                     ((0, Mp - M), (0, Np - residual.shape[1])))
        args.append(rp)
        in_specs.append(pl.BlockSpec((TM, Np), lambda i, kk: (i, 0)))
        kernel = _matmul_bn_res_kernel
    else:
        kernel = _matmul_bn_kernel

    out = pl.pallas_call(
        kernel,
        out_shape=jax.ShapeDtypeStruct((Mp, Np), jnp.bfloat16),
        grid=(Mp // TM, Kp // TK),
        in_specs=in_specs,
        out_specs=pl.BlockSpec((TM, Np), lambda i, kk: (i, 0)),
        scratch_shapes=[pltpu.VMEM((TM, Np), jnp.float32)],
        compiler_params=pltpu.CompilerParams(
            dimension_semantics=("parallel", "arbitrary")),
    )(*args)
    if Mp != M:
        out = out[:M]
    return out


# ----------------------------------------------------------------------------
# Conv3d as im2col (bf16) + fused Pallas matmul
# ----------------------------------------------------------------------------
def _extract_patches_3d(x, k, stride, pad):
    """x: (N, D, H, W, C) -> (N*Do*Ho*Wo, k^3*C) bf16 patches + out dims."""
    if pad > 0:
        x = jnp.pad(x, ((0, 0), (pad, pad), (pad, pad), (pad, pad), (0, 0)))
    n, dp, hp, wp, c = x.shape
    do = (dp - k) // stride + 1
    ho = (hp - k) // stride + 1
    wo = (wp - k) // stride + 1
    cols = []
    for kd in range(k):
        for kh in range(k):
            for kw in range(k):
                sl = x[
                    :,
                    kd: kd + stride * (do - 1) + 1: stride,
                    kh: kh + stride * (ho - 1) + 1: stride,
                    kw: kw + stride * (wo - 1) + 1: stride,
                    :,
                ]
                cols.append(sl)
    patches = jnp.concatenate(cols, axis=-1)  # (N, Do, Ho, Wo, k^3*C)
    return patches.reshape(n * do * ho * wo, k * k * k * c), (n, do, ho, wo)


def fused_conv_bn(x, prep, *, residual=None):
    """x: (N, D, H, W, Cin) bf16. Returns a list of NDHWC outputs, one per
    fused column group (1 for plain convs, 2 for conv1+downsample fusion)."""
    k, stride, pad = prep["ksize"], prep["stride"], prep["pad"]
    patches, (n, do, ho, wo) = _extract_patches_3d(x, k, stride, pad)
    M = patches.shape[0]
    res2 = None
    if residual is not None:
        res2 = residual.reshape(M, residual.shape[-1])
    out = fused_matmul_bn(patches, prep, res2)
    outs, off = [], 0
    for c in prep["col_splits"]:
        outs.append(out[:, off:off + c].reshape(n, do, ho, wo, c))
        off += c
    return outs


# ----------------------------------------------------------------------------
# Init-time parameter packing (weights pre-transposed / pre-padded, bf16;
# BN folded to scale/shift; per-column ReLU mask)
# ----------------------------------------------------------------------------
def _conv_w(key, cout, cin, k):
    fan_in = cin * k * k * k
    return jax.random.normal(key, (cout, cin, k, k, k), jnp.float32) * jnp.sqrt(
        2.0 / fan_in)


def _bn(key, c, eps=1e-5):
    k1, k2, k3 = jax.random.split(key, 3)
    gamma = 1.0 + 0.1 * jax.random.normal(k1, (c,), jnp.float32)
    beta = 0.1 * jax.random.normal(k2, (c,), jnp.float32)
    running_mean = 0.1 * jax.random.normal(k3, (c,), jnp.float32)
    running_var = jnp.ones((c,), jnp.float32)
    scale = gamma / jnp.sqrt(running_var + eps)
    shift = beta - running_mean * scale
    return scale, shift


def _conv_to_mat(w):
    """torch layout (Cout, Cin, k, k, k) -> (k^3*Cin, Cout), (kd,kh,kw,cin)."""
    cout, cin, k = w.shape[0], w.shape[1], w.shape[2]
    return jnp.transpose(w, (2, 3, 4, 1, 0)).reshape(k * k * k * cin, cout)


def _embed_1x1_center(ds_w, k):
    """Embed a 1x1x1 conv at the centre tap of a k^3 im2col K axis."""
    cout, cin = ds_w.shape[0], ds_w.shape[1]
    mat = jnp.zeros((k * k * k * cin, cout), jnp.float32)
    center = (k * k * k) // 2          # tap (1,1,1) for k == 3
    return mat.at[center * cin:(center + 1) * cin, :].set(
        ds_w.reshape(cout, cin).T)


def _prep_conv_params(w_groups, bn_groups, relu_flags, *, ksize, stride, pad):
    """Pack N-concatenated column groups sharing one K into padded bf16/f32
    operands ready for the fused kernel."""
    K = int(w_groups[0].shape[0])
    widths = [int(m.shape[1]) for m in w_groups]
    N = sum(widths)
    Kp, TK = _k_tiling(K)
    Np = _round_up(N, 128)

    w = jnp.concatenate(w_groups, axis=1)
    wp = jnp.pad(w, ((0, Kp - K), (0, Np - N))).astype(jnp.bfloat16)
    scale = jnp.concatenate([s for (s, _) in bn_groups])
    shift = jnp.concatenate([b for (_, b) in bn_groups])
    mask = jnp.concatenate(
        [jnp.full((c,), 1.0 if r else 0.0, jnp.float32)
         for c, r in zip(widths, relu_flags)])
    # Padded columns get scale=shift=mask=0 -> exact zeros in padded lanes.
    sp = jnp.pad(scale, (0, Np - N)).reshape(1, Np).astype(jnp.float32)
    bp = jnp.pad(shift, (0, Np - N)).reshape(1, Np).astype(jnp.float32)
    mp = jnp.pad(mask, (0, Np - N)).reshape(1, Np).astype(jnp.float32)
    return dict(wp=wp, sp=sp, bp=bp, mp=mp, K=K, Kp=Kp, TK=TK, Np=Np,
                col_splits=widths, ksize=ksize, stride=stride, pad=pad)


def init_resnet_params(key, in_channels, channels, layers,
                       *, initial_kernel_size=7, initial_stride=2):
    keys = iter(jax.random.split(key, 256))
    stem_pad = (initial_kernel_size - initial_stride + 1) // 2
    stem_w = _conv_w(next(keys), 64, in_channels, initial_kernel_size)
    params = {
        "stem": _prep_conv_params(
            [_conv_to_mat(stem_w)], [_bn(next(keys), 64)], [True],
            ksize=initial_kernel_size, stride=initial_stride, pad=stem_pad),
        "layers": [],
    }
    inplanes = 64
    strides = [1, 2, 2, 2]
    for planes, nblocks, stride in zip(channels, layers, strides):
        blocks = []
        for b in range(nblocks):
            s = stride if b == 0 else 1
            conv1 = _conv_w(next(keys), planes, inplanes, 3)
            bn1 = _bn(next(keys), planes)
            conv2 = _conv_w(next(keys), planes, planes, 3)
            bn2 = _bn(next(keys), planes)
            has_ds = (s != 1 or inplanes != planes)  # BasicBlock.expansion==1
            if has_ds:
                ds_w = _conv_w(next(keys), planes, inplanes, 1)
                ds_bn = _bn(next(keys), planes)
                # Fuse downsample 1x1 into conv1 along N (ReLU only on conv1).
                c1 = _prep_conv_params(
                    [_conv_to_mat(conv1), _embed_1x1_center(ds_w, 3)],
                    [bn1, ds_bn], [True, False], ksize=3, stride=s, pad=1)
            else:
                c1 = _prep_conv_params([_conv_to_mat(conv1)], [bn1], [True],
                                       ksize=3, stride=s, pad=1)
            c2 = _prep_conv_params([_conv_to_mat(conv2)], [bn2], [True],
                                   ksize=3, stride=1, pad=1)
            blocks.append({"fused_ds": has_ds, "c1": c1, "c2": c2})
            inplanes = planes
        params["layers"].append(blocks)
    return params


# ----------------------------------------------------------------------------
# Forward pass (BasicBlock ResNet, matching the PyTorch module's forward)
# ----------------------------------------------------------------------------
def basic_block_forward(x, blk):
    if blk["fused_ds"]:
        out, identity = fused_conv_bn(x, blk["c1"])
    else:
        (out,) = fused_conv_bn(x, blk["c1"])
        identity = x
    (out,) = fused_conv_bn(out, blk["c2"], residual=identity)
    return out


def resnet_forward(x_ncdhw, params):
    # NCDHW -> NDHWC (lane friendly); carry activations in bf16.
    x = jnp.transpose(x_ncdhw, (0, 2, 3, 4, 1)).astype(jnp.bfloat16)
    (x,) = fused_conv_bn(x, params["stem"])
    for blocks in params["layers"]:
        for blk in blocks:
            x = basic_block_forward(x, blk)
    # torch.flatten(x4, 1) on NCDHW -> move channels back before flattening.
    x = jnp.transpose(x, (0, 4, 1, 2, 3)).astype(jnp.float32)
    return x.reshape(x.shape[0], -1)


# ----------------------------------------------------------------------------
if __name__ == "__main__":
    key = jax.random.PRNGKey(0)
    k_par, k_in = jax.random.split(key)

    batch, in_channels, spatial = 2, 3, 8
    channels = [8, 16, 32, 64]
    layers = [1, 1, 1, 1]

    params = init_resnet_params(k_par, in_channels, channels, layers)
    x = jax.random.normal(
        k_in, (batch, in_channels, spatial, spatial, spatial), jnp.float32)

    fwd = jax.jit(lambda inp: resnet_forward(inp, params))
    out = jax.block_until_ready(fwd(x))

    assert out.shape == (batch, channels[-1]), out.shape
    assert bool(jnp.all(jnp.isfinite(out)))
    print("KERNEL_OK")
</pallas_src>

<mosaic_0001>
module attributes {stable_mosaic.version = 11 : i64} {
  func.func @_matmul_bn_kernel(%arg0: i32, %arg1: i32, %arg2: memref<64x512xbf16, #tpu.memory_space<vmem>>, %arg3: memref<512x128xbf16, #tpu.memory_space<vmem>>, %arg4: memref<1x128xf32, #tpu.memory_space<vmem>>, %arg5: memref<1x128xf32, #tpu.memory_space<vmem>>, %arg6: memref<1x128xf32, #tpu.memory_space<vmem>>, %arg7: memref<64x128xbf16, #tpu.memory_space<vmem>>, %arg8: memref<64x128xf32, #tpu.memory_space<vmem>>) attributes {dimension_semantics = [#tpu.dimension_semantics<parallel>, #tpu.dimension_semantics<arbitrary>], iteration_bounds = array<i64: 2, 3>, scalar_prefetch = 0 : i64, scratch_operands = 1 : i64, tpu.core_type = #tpu.core_type<tc>, window_params = [{transform_indices = @transform_0, window_bounds = array<i64: 64, 512>}, {transform_indices = @transform_1, window_bounds = array<i64: 512, 128>}, {pipeline_mode = #tpu.pipeline_mode<synchronous>, transform_indices = @transform_2, window_bounds = array<i64: 1, 128>}, {pipeline_mode = #tpu.pipeline_mode<synchronous>, transform_indices = @transform_3, window_bounds = array<i64: 1, 128>}, {pipeline_mode = #tpu.pipeline_mode<synchronous>, transform_indices = @transform_4, window_bounds = array<i64: 1, 128>}, {transform_indices = @transform_5, window_bounds = array<i64: 64, 128>}]} {
    %c0_i32 = arith.constant 0 : i32
    %0 = arith.cmpi eq, %arg1, %c0_i32 : i32
    %1 = arith.extui %0 : i1 to i32
    %c0_i32_0 = arith.constant 0 : i32
    %2 = arith.cmpi ne, %1, %c0_i32_0 : i32
    scf.if %2 {
      %cst_9 = arith.constant 0.000000e+00 : f32
      %12 = vector.broadcast %cst_9 : f32 to vector<64x128xf32>
      %c0_10 = arith.constant 0 : index
      %c0_11 = arith.constant 0 : index
      %13 = vector.load %arg8[%c0_10, %c0_11] : memref<64x128xf32, #tpu.memory_space<vmem>>, vector<64x128xf32>
      tpu.vector_store %arg8[%c0_10, %c0_11], %12 {strides = array<i32>} : memref<64x128xf32, #tpu.memory_space<vmem>>, vector<64x128xf32>,
    } else {
    }
    %c0 = arith.constant 0 : index
    %c0_1 = arith.constant 0 : index
    %3 = vector.load %arg8[%c0, %c0_1] : memref<64x128xf32, #tpu.memory_space<vmem>>, vector<64x128xf32>
    %c0_2 = arith.constant 0 : index
    %c0_3 = arith.constant 0 : index
    %4 = vector.load %arg2[%c0_2, %c0_3] : memref<64x512xbf16, #tpu.memory_space<vmem>>, vector<64x512xbf16>
    %c0_4 = arith.constant 0 : index
    %c0_5 = arith.constant 0 : index
    %5 = vector.load %arg3[%c0_4, %c0_5] : memref<512x128xbf16, #tpu.memory_space<vmem>>, vector<512x128xbf16>
    %cst = arith.constant dense<0.000000e+00> : vector<64x128xf32>
    %6 = tpu.matmul %4, %5, %cst {dimension_numbers = #tpu.dot_dimension_numbers<[1], [0], [0], [1], [0, 0, 1, 1], [], []>} : vector<64x512xbf16>, vector<512x128xbf16>, vector<64x128xf32> -> vector<64x128xf32>
    %7 = arith.addf %3, %6 : vector<64x128xf32>
    %c0_6 = arith.constant 0 : index
    %c0_7 = arith.constant 0 : index
    %8 = vector.load %arg8[%c0_6, %c0_7] : memref<64x128xf32, #tpu.memory_space<vmem>>, vector<64x128xf32>
    tpu.vector_store %arg8[%c0_6, %c0_7], %7 {strides = array<i32>} : memref<64x128xf32, #tpu.memory_space<vmem>>, vector<64x128xf32>,
    %c2_i32 = arith.constant 2 : i32
    %9 = arith.cmpi eq, %arg1, %c2_i32 : i32
    %10 = arith.extui %9 : i1 to i32
    %c0_i32_8 = arith.constant 0 : i32
    %11 = arith.cmpi ne, %10, %c0_i32_8 : i32
    scf.if %11 {
      %c0_9 = arith.constant 0 : index
      %c0_10 = arith.constant 0 : index
      %12 = vector.load %arg8[%c0_9, %c0_10] : memref<64x128xf32, #tpu.memory_space<vmem>>, vector<64x128xf32>
      %c0_11 = arith.constant 0 : index
      %c0_12 = arith.constant 0 : index
      %13 = vector.load %arg4[%c0_11, %c0_12] : memref<1x128xf32, #tpu.memory_space<vmem>>, vector<1x128xf32>
      %14 = vector.broadcast %13 : vector<1x128xf32> to vector<64x128xf32>
      %15 = arith.mulf %12, %14 : vector<64x128xf32>
      %c0_13 = arith.constant 0 : index
      %c0_14 = arith.constant 0 : index
      %16 = vector.load %arg5[%c0_13, %c0_14] : memref<1x128xf32, #tpu.memory_space<vmem>>, vector<1x128xf32>
      %17 = vector.broadcast %16 : vector<1x128xf32> to vector<64x128xf32>
      %18 = arith.addf %15, %17 : vector<64x128xf32>
      %c0_15 = arith.constant 0 : index
      %c0_16 = arith.constant 0 : index
      %19 = vector.load %arg6[%c0_15, %c0_16] : memref<1x128xf32, #tpu.memory_space<vmem>>, vector<1x128xf32>
      %cst_17 = arith.constant 0.000000e+00 : f32
      %20 = vector.broadcast %cst_17 : f32 to vector<1x128xf32>
      %21 = arith.cmpf one, %19, %20 : vector<1x128xf32>
      %cst_18 = arith.constant 0.000000e+00 : f32
      %22 = vector.broadcast %cst_18 : f32 to vector<64x128xf32>
      %23 = arith.maximumf %18, %22 : vector<64x128xf32>
      %24 = vector.shape_cast %21 : vector<1x128xi1> to vector<1x128xi1>
      %25 = vector.broadcast %24 : vector<1x128xi1> to vector<64x128xi1>
      %26 = arith.select %25, %23, %18 : vector<64x128xi1>, vector<64x128xf32>
      %27 = arith.truncf %26 : vector<64x128xf32> to vector<64x128xbf16>
      %c0_19 = arith.constant 0 : index
      %c0_20 = arith.constant 0 : index
      %28 = vector.load %arg7[%c0_19, %c0_20] : memref<64x128xbf16, #tpu.memory_space<vmem>>, vector<64x128xbf16>
      tpu.vector_store %arg7[%c0_19, %c0_20], %27 {strides = array<i32>} : memref<64x128xbf16, #tpu.memory_space<vmem>>, vector<64x128xbf16>,
    } else {
    }
    return
  }
  func.func @transform_0(%arg0: i32, %arg1: i32) -> (i32, i32) {
    %c0_i32 = arith.constant 0 : i32
    return %arg0, %arg1 : i32, i32
  }
  func.func @transform_1(%arg0: i32, %arg1: i32) -> (i32, i32) {
    %c0_i32 = arith.constant 0 : i32
    %c0_i32_0 = arith.constant 0 : i32
    return %arg1, %c0_i32 : i32, i32
  }
  func.func @transform_2(%arg0: i32, %arg1: i32) -> (i32, i32) {
    %c0_i32 = arith.constant 0 : i32
    %c0_i32_0 = arith.constant 0 : i32
    %c0_i32_1 = arith.constant 0 : i32
    return %c0_i32, %c0_i32_0 : i32, i32
  }
  func.func @transform_3(%arg0: i32, %arg1: i32) -> (i32, i32) {
    %c0_i32 = arith.constant 0 : i32
    %c0_i32_0 = arith.constant 0 : i32
    %c0_i32_1 = arith.constant 0 : i32
    return %c0_i32, %c0_i32_0 : i32, i32
  }
  func.func @transform_4(%arg0: i32, %arg1: i32) -> (i32, i32) {
    %c0_i32 = arith.constant 0 : i32
    %c0_i32_0 = arith.constant 0 : i32
    %c0_i32_1 = arith.constant 0 : i32
    return %c0_i32, %c0_i32_0 : i32, i32
  }
  func.func @transform_5(%arg0: i32, %arg1: i32) -> (i32, i32) {
    %c0_i32 = arith.constant 0 : i32
    %c0_i32_0 = arith.constant 0 : i32
    return %arg0, %c0_i32 : i32, i32
  }
}

module attributes {stable_mosaic.version = 11 : i64} {
  func.func @_matmul_bn_kernel(%arg0: i32, %arg1: i32, %arg2: memref<64x512xbf16, #tpu.memory_space<vmem>>, %arg3: memref<512x128xbf16, #tpu.memory_space<vmem>>, %arg4: memref<1x128xf32, #tpu.memory_space<vmem>>, %arg5: memref<1x128xf32, #tpu.memory_space<vmem>>, %arg6: memref<1x128xf32, #tpu.memory_space<vmem>>, %arg7: memref<64x128xbf16, #tpu.memory_space<vmem>>, %arg8: memref<64x128xf32, #tpu.memory_space<vmem>>) attributes {dimension_semantics = [#tpu.dimension_semantics<parallel>, #tpu.dimension_semantics<arbitrary>], iteration_bounds = array<i64: 2, 4>, scalar_prefetch = 0 : i64, scratch_operands = 1 : i64, tpu.core_type = #tpu.core_type<tc>, window_params = [{transform_indices = @transform_0, window_bounds = array<i64: 64, 512>}, {transform_indices = @transform_1, window_bounds = array<i64: 512, 128>}, {pipeline_mode = #tpu.pipeline_mode<synchronous>, transform_indices = @transform_2, window_bounds = array<i64: 1, 128>}, {pipeline_mode = #tpu.pipeline_mode<synchronous>, transform_indices = @transform_3, window_bounds = array<i64: 1, 128>}, {pipeline_mode = #tpu.pipeline_mode<synchronous>, transform_indices = @transform_4, window_bounds = array<i64: 1, 128>}, {transform_indices = @transform_5, window_bounds = array<i64: 64, 128>}]} {
    %c0_i32 = arith.constant 0 : i32
    %0 = arith.cmpi eq, %arg1, %c0_i32 : i32
    %1 = arith.extui %0 : i1 to i32
    %c0_i32_0 = arith.constant 0 : i32
    %2 = arith.cmpi ne, %1, %c0_i32_0 : i32
    scf.if %2 {
      %cst_9 = arith.constant 0.000000e+00 : f32
      %12 = vector.broadcast %cst_9 : f32 to vector<64x128xf32>
      %c0_10 = arith.constant 0 : index
      %c0_11 = arith.constant 0 : index
      %13 = vector.load %arg8[%c0_10, %c0_11] : memref<64x128xf32, #tpu.memory_space<vmem>>, vector<64x128xf32>
      tpu.vector_store %arg8[%c0_10, %c0_11], %12 {strides = array<i32>} : memref<64x128xf32, #tpu.memory_space<vmem>>, vector<64x128xf32>,
    } else {
    }
    %c0 = arith.constant 0 : index
    %c0_1 = arith.constant 0 : index
    %3 = vector.load %arg8[%c0, %c0_1] : memref<64x128xf32, #tpu.memory_space<vmem>>, vector<64x128xf32>
    %c0_2 = arith.constant 0 : index
    %c0_3 = arith.constant 0 : index
    %4 = vector.load %arg2[%c0_2, %c0_3] : memref<64x512xbf16, #tpu.memory_space<vmem>>, vector<64x512xbf16>
    %c0_4 = arith.constant 0 : index
    %c0_5 = arith.constant 0 : index
    %5 = vector.load %arg3[%c0_4, %c0_5] : memref<512x128xbf16, #tpu.memory_space<vmem>>, vector<512x128xbf16>
    %cst = arith.constant dense<0.000000e+00> : vector<64x128xf32>
    %6 = tpu.matmul %4, %5, %cst {dimension_numbers = #tpu.dot_dimension_numbers<[1], [0], [0], [1], [0, 0, 1, 1], [], []>} : vector<64x512xbf16>, vector<512x128xbf16>, vector<64x128xf32> -> vector<64x128xf32>
    %7 = arith.addf %3, %6 : vector<64x128xf32>
    %c0_6 = arith.constant 0 : index
    %c0_7 = arith.constant 0 : index
    %8 = vector.load %arg8[%c0_6, %c0_7] : memref<64x128xf32, #tpu.memory_space<vmem>>, vector<64x128xf32>
    tpu.vector_store %arg8[%c0_6, %c0_7], %7 {strides = array<i32>} : memref<64x128xf32, #tpu.memory_space<vmem>>, vector<64x128xf32>,
    %c3_i32 = arith.constant 3 : i32
    %9 = arith.cmpi eq, %arg1, %c3_i32 : i32
    %10 = arith.extui %9 : i1 to i32
    %c0_i32_8 = arith.constant 0 : i32
    %11 = arith.cmpi ne, %10, %c0_i32_8 : i32
    scf.if %11 {
      %c0_9 = arith.constant 0 : index
      %c0_10 = arith.constant 0 : index
      %12 = vector.load %arg8[%c0_9, %c0_10] : memref<64x128xf32, #tpu.memory_space<vmem>>, vector<64x128xf32>
      %c0_11 = arith.constant 0 : index
      %c0_12 = arith.constant 0 : index
      %13 = vector.load %arg4[%c0_11, %c0_12] : memref<1x128xf32, #tpu.memory_space<vmem>>, vector<1x128xf32>
      %14 = vector.broadcast %13 : vector<1x128xf32> to vector<64x128xf32>
      %15 = arith.mulf %12, %14 : vector<64x128xf32>
      %c0_13 = arith.constant 0 : index
      %c0_14 = arith.constant 0 : index
      %16 = vector.load %arg5[%c0_13, %c0_14] : memref<1x128xf32, #tpu.memory_space<vmem>>, vector<1x128xf32>
      %17 = vector.broadcast %16 : vector<1x128xf32> to vector<64x128xf32>
      %18 = arith.addf %15, %17 : vector<64x128xf32>
      %c0_15 = arith.constant 0 : index
      %c0_16 = arith.constant 0 : index
      %19 = vector.load %arg6[%c0_15, %c0_16] : memref<1x128xf32, #tpu.memory_space<vmem>>, vector<1x128xf32>
      %cst_17 = arith.constant 0.000000e+00 : f32
      %20 = vector.broadcast %cst_17 : f32 to vector<1x128xf32>
      %21 = arith.cmpf one, %19, %20 : vector<1x128xf32>
      %cst_18 = arith.constant 0.000000e+00 : f32
      %22 = vector.broadcast %cst_18 : f32 to vector<64x128xf32>
      %23 = arith.maximumf %18, %22 : vector<64x128xf32>
      %24 = vector.shape_cast %21 : vector<1x128xi1> to vector<1x128xi1>
      %25 = vector.broadcast %24 : vector<1x128xi1> to vector<64x128xi1>
      %26 = arith.select %25, %23, %18 : vector<64x128xi1>, vector<64x128xf32>
      %27 = arith.truncf %26 : vector<64x128xf32> to vector<64x128xbf16>
      %c0_19 = arith.constant 0 : index
      %c0_20 = arith.constant 0 : index
      %28 = vector.load %arg7[%c0_19, %c0_20] : memref<64x128xbf16, #tpu.memory_space<vmem>>, vector<64x128xbf16>
      tpu.vector_store %arg7[%c0_19, %c0_20], %27 {strides = array<i32>} : memref<64x128xbf16, #tpu.memory_space<vmem>>, vector<64x128xbf16>,
    } else {
    }
    return
  }
  func.func @transform_0(%arg0: i32, %arg1: i32) -> (i32, i32) {
    %c0_i32 = arith.constant 0 : i32
    return %arg0, %arg1 : i32, i32
  }
  func.func @transform_1(%arg0: i32, %arg1: i32) -> (i32, i32) {
    %c0_i32 = arith.constant 0 : i32
    %c0_i32_0 = arith.constant 0 : i32
    return %arg1, %c0_i32 : i32, i32
  }
  func.func @transform_2(%arg0: i32, %arg1: i32) -> (i32, i32) {
    %c0_i32 = arith.constant 0 : i32
    %c0_i32_0 = arith.constant 0 : i32
    %c0_i32_1 = arith.constant 0 : i32
    return %c0_i32, %c0_i32_0 : i32, i32
  }
  func.func @transform_3(%arg0: i32, %arg1: i32) -> (i32, i32) {
    %c0_i32 = arith.constant 0 : i32
    %c0_i32_0 = arith.constant 0 : i32
    %c0_i32_1 = arith.constant 0 : i32
    return %c0_i32, %c0_i32_0 : i32, i32
  }
  func.func @transform_4(%arg0: i32, %arg1: i32) -> (i32, i32) {
    %c0_i32 = arith.constant 0 : i32
    %c0_i32_0 = arith.constant 0 : i32
    %c0_i32_1 = arith.constant 0 : i32
    return %c0_i32, %c0_i32_0 : i32, i32
  }
  func.func @transform_5(%arg0: i32, %arg1: i32) -> (i32, i32) {
    %c0_i32 = arith.constant 0 : i32
    %c0_i32_0 = arith.constant 0 : i32
    return %arg0, %c0_i32 : i32, i32
  }
}

module attributes {stable_mosaic.version = 11 : i64} {
  func.func @_matmul_bn_res_kernel(%arg0: i32, %arg1: i32, %arg2: memref<64x256xbf16, #tpu.memory_space<vmem>>, %arg3: memref<256x128xbf16, #tpu.memory_space<vmem>>, %arg4: memref<1x128xf32, #tpu.memory_space<vmem>>, %arg5: memref<1x128xf32, #tpu.memory_space<vmem>>, %arg6: memref<1x128xf32, #tpu.memory_space<vmem>>, %arg7: memref<64x128xbf16, #tpu.memory_space<vmem>>, %arg8: memref<64x128xbf16, #tpu.memory_space<vmem>>, %arg9: memref<64x128xf32, #tpu.memory_space<vmem>>) attributes {dimension_semantics = [#tpu.dimension_semantics<parallel>, #tpu.dimension_semantics<arbitrary>], iteration_bounds = array<i64: 2, 1>, scalar_prefetch = 0 : i64, scratch_operands = 1 : i64, tpu.core_type = #tpu.core_type<tc>, window_params = [{transform_indices = @transform_0, window_bounds = array<i64: 64, 256>}, {transform_indices = @transform_1, window_bounds = array<i64: 256, 128>}, {pipeline_mode = #tpu.pipeline_mode<synchronous>, transform_indices = @transform_2, window_bounds = array<i64: 1, 128>}, {pipeline_mode = #tpu.pipeline_mode<synchronous>, transform_indices = @transform_3, window_bounds = array<i64: 1, 128>}, {pipeline_mode = #tpu.pipeline_mode<synchronous>, transform_indices = @transform_4, window_bounds = array<i64: 1, 128>}, {transform_indices = @transform_5, window_bounds = array<i64: 64, 128>}, {transform_indices = @transform_6, window_bounds = array<i64: 64, 128>}]} {
    %c0_i32 = arith.constant 0 : i32
    %0 = arith.cmpi eq, %arg1, %c0_i32 : i32
    %1 = arith.extui %0 : i1 to i32
    %c0_i32_0 = arith.constant 0 : i32
    %2 = arith.cmpi ne, %1, %c0_i32_0 : i32
    scf.if %2 {
      %cst_10 = arith.constant 0.000000e+00 : f32
      %12 = vector.broadcast %cst_10 : f32 to vector<64x128xf32>
      %c0_11 = arith.constant 0 : index
      %c0_12 = arith.constant 0 : index
      %13 = vector.load %arg9[%c0_11, %c0_12] : memref<64x128xf32, #tpu.memory_space<vmem>>, vector<64x128xf32>
      tpu.vector_store %arg9[%c0_11, %c0_12], %12 {strides = array<i32>} : memref<64x128xf32, #tpu.memory_space<vmem>>, vector<64x128xf32>,
    } else {
    }
    %c0 = arith.constant 0 : index
    %c0_1 = arith.constant 0 : index
    %3 = vector.load %arg9[%c0, %c0_1] : memref<64x128xf32, #tpu.memory_space<vmem>>, vector<64x128xf32>
    %c0_2 = arith.constant 0 : index
    %c0_3 = arith.constant 0 : index
    %4 = vector.load %arg2[%c0_2, %c0_3] : memref<64x256xbf16, #tpu.memory_space<vmem>>, vector<64x256xbf16>
    %c0_4 = arith.constant 0 : index
    %c0_5 = arith.constant 0 : index
    %5 = vector.load %arg3[%c0_4, %c0_5] : memref<256x128xbf16, #tpu.memory_space<vmem>>, vector<256x128xbf16>
    %cst = arith.constant dense<0.000000e+00> : vector<64x128xf32>
    %6 = tpu.matmul %4, %5, %cst {dimension_numbers = #tpu.dot_dimension_numbers<[1], [0], [0], [1], [0, 0, 1, 1], [], []>} : vector<64x256xbf16>, vector<256x128xbf16>, vector<64x128xf32> -> vector<64x128xf32>
    %7 = arith.addf %3, %6 : vector<64x128xf32>
    %c0_6 = arith.constant 0 : index
    %c0_7 = arith.constant 0 : index
    %8 = vector.load %arg9[%c0_6, %c0_7] : memref<64x128xf32, #tpu.memory_space<vmem>>, vector<64x128xf32>
    tpu.vector_store %arg9[%c0_6, %c0_7], %7 {strides = array<i32>} : memref<64x128xf32, #tpu.memory_space<vmem>>, vector<64x128xf32>,
    %c0_i32_8 = arith.constant 0 : i32
    %9 = arith.cmpi eq, %arg1, %c0_i32_8 : i32
    %10 = arith.extui %9 : i1 to i32
    %c0_i32_9 = arith.constant 0 : i32
    %11 = arith.cmpi ne, %10, %c0_i32_9 : i32
    scf.if %11 {
      %c0_10 = arith.constant 0 : index
      %c0_11 = arith.constant 0 : index
      %12 = vector.load %arg9[%c0_10, %c0_11] : memref<64x128xf32, #tpu.memory_space<vmem>>, vector<64x128xf32>
      %c0_12 = arith.constant 0 : index
      %c0_13 = arith.constant 0 : index
      %13 = vector.load %arg4[%c0_12, %c0_13] : memref<1x128xf32, #tpu.memory_space<vmem>>, vector<1x128xf32>
      %14 = vector.broadcast %13 : vector<1x128xf32> to vector<64x128xf32>
      %15 = arith.mulf %12, %14 : vector<64x128xf32>
      %c0_14 = arith.constant 0 : index
      %c0_15 = arith.constant 0 : index
      %16 = vector.load %arg5[%c0_14, %c0_15] : memref<1x128xf32, #tpu.memory_space<vmem>>, vector<1x128xf32>
      %17 = vector.broadcast %16 : vector<1x128xf32> to vector<64x128xf32>
      %18 = arith.addf %15, %17 : vector<64x128xf32>
      %c0_16 = arith.constant 0 : index
      %c0_17 = arith.constant 0 : index
      %19 = vector.load %arg7[%c0_16, %c0_17] : memref<64x128xbf16, #tpu.memory_space<vmem>>, vector<64x128xbf16>
      %20 = arith.extf %19 : vector<64x128xbf16> to vector<64x128xf32>
      %21 = arith.addf %18, %20 : vector<64x128xf32>
      %c0_18 = arith.constant 0 : index
      %c0_19 = arith.constant 0 : index
      %22 = vector.load %arg6[%c0_18, %c0_19] : memref<1x128xf32, #tpu.memory_space<vmem>>, vector<1x128xf32>
      %cst_20 = arith.constant 0.000000e+00 : f32
      %23 = vector.broadcast %cst_20 : f32 to vector<1x128xf32>
      %24 = arith.cmpf one, %22, %23 : vector<1x128xf32>
      %cst_21 = arith.constant 0.000000e+00 : f32
      %25 = vector.broadcast %cst_21 : f32 to vector<64x128xf32>
      %26 = arith.maximumf %21, %25 : vector<64x128xf32>
      %27 = vector.shape_cast %24 : vector<1x128xi1> to vector<1x128xi1>
      %28 = vector.broadcast %27 : vector<1x128xi1> to vector<64x128xi1>
      %29 = arith.select %28, %26, %21 : vector<64x128xi1>, vector<64x128xf32>
      %30 = arith.truncf %29 : vector<64x128xf32> to vector<64x128xbf16>
      %c0_22 = arith.constant 0 : index
      %c0_23 = arith.constant 0 : index
      %31 = vector.load %arg8[%c0_22, %c0_23] : memref<64x128xbf16, #tpu.memory_space<vmem>>, vector<64x128xbf16>
      tpu.vector_store %arg8[%c0_22, %c0_23], %30 {strides = array<i32>} : memref<64x128xbf16, #tpu.memory_space<vmem>>, vector<64x128xbf16>,
    } else {
    }
    return
  }
  func.func @transform_0(%arg0: i32, %arg1: i32) -> (i32, i32) {
    %c0_i32 = arith.constant 0 : i32
    return %arg0, %arg1 : i32, i32
  }
  func.func @transform_1(%arg0: i32, %arg1: i32) -> (i32, i32) {
    %c0_i32 = arith.constant 0 : i32
    %c0_i32_0 = arith.constant 0 : i32
    return %arg1, %c0_i32 : i32, i32
  }
  func.func @transform_2(%arg0: i32, %arg1: i32) -> (i32, i32) {
    %c0_i32 = arith.constant 0 : i32
    %c0_i32_0 = arith.constant 0 : i32
    %c0_i32_1 = arith.constant 0 : i32
    return %c0_i32, %c0_i32_0 : i32, i32
  }
  func.func @transform_3(%arg0: i32, %arg1: i32) -> (i32, i32) {
    %c0_i32 = arith.constant 0 : i32
    %c0_i32_0 = arith.constant 0 : i32
    %c0_i32_1 = arith.constant 0 : i32
    return %c0_i32, %c0_i32_0 : i32, i32
  }
  func.func @transform_4(%arg0: i32, %arg1: i32) -> (i32, i32) {
    %c0_i32 = arith.constant 0 : i32
    %c0_i32_0 = arith.constant 0 : i32
    %c0_i32_1 = arith.constant 0 : i32
    return %c0_i32, %c0_i32_0 : i32, i32
  }
  func.func @transform_5(%arg0: i32, %arg1: i32) -> (i32, i32) {
    %c0_i32 = arith.constant 0 : i32
    %c0_i32_0 = arith.constant 0 : i32
    return %arg0, %c0_i32 : i32, i32
  }
  func.func @transform_6(%arg0: i32, %arg1: i32) -> (i32, i32) {
    %c0_i32 = arith.constant 0 : i32
    %c0_i32_0 = arith.constant 0 : i32
    return %arg0, %c0_i32 : i32, i32
  }
}

module attributes {stable_mosaic.version = 11 : i64} {
  func.func @_matmul_bn_kernel(%arg0: i32, %arg1: i32, %arg2: memref<64x256xbf16, #tpu.memory_space<vmem>>, %arg3: memref<256x128xbf16, #tpu.memory_space<vmem>>, %arg4: memref<1x128xf32, #tpu.memory_space<vmem>>, %arg5: memref<1x128xf32, #tpu.memory_space<vmem>>, %arg6: memref<1x128xf32, #tpu.memory_space<vmem>>, %arg7: memref<64x128xbf16, #tpu.memory_space<vmem>>, %arg8: memref<64x128xf32, #tpu.memory_space<vmem>>) attributes {dimension_semantics = [#tpu.dimension_semantics<parallel>, #tpu.dimension_semantics<arbitrary>], iteration_bounds = array<i64: 1, 1>, scalar_prefetch = 0 : i64, scratch_operands = 1 : i64, tpu.core_type = #tpu.core_type<tc>, window_params = [{transform_indices = @transform_0, window_bounds = array<i64: 64, 256>}, {transform_indices = @transform_1, window_bounds = array<i64: 256, 128>}, {pipeline_mode = #tpu.pipeline_mode<synchronous>, transform_indices = @transform_2, window_bounds = array<i64: 1, 128>}, {pipeline_mode = #tpu.pipeline_mode<synchronous>, transform_indices = @transform_3, window_bounds = array<i64: 1, 128>}, {pipeline_mode = #tpu.pipeline_mode<synchronous>, transform_indices = @transform_4, window_bounds = array<i64: 1, 128>}, {transform_indices = @transform_5, window_bounds = array<i64: 64, 128>}]} {
    %c0_i32 = arith.constant 0 : i32
    %0 = arith.cmpi eq, %arg1, %c0_i32 : i32
    %1 = arith.extui %0 : i1 to i32
    %c0_i32_0 = arith.constant 0 : i32
    %2 = arith.cmpi ne, %1, %c0_i32_0 : i32
    scf.if %2 {
      %cst_10 = arith.constant 0.000000e+00 : f32
      %12 = vector.broadcast %cst_10 : f32 to vector<64x128xf32>
      %c0_11 = arith.constant 0 : index
      %c0_12 = arith.constant 0 : index
      %13 = vector.load %arg8[%c0_11, %c0_12] : memref<64x128xf32, #tpu.memory_space<vmem>>, vector<64x128xf32>
      tpu.vector_store %arg8[%c0_11, %c0_12], %12 {strides = array<i32>} : memref<64x128xf32, #tpu.memory_space<vmem>>, vector<64x128xf32>,
    } else {
    }
    %c0 = arith.constant 0 : index
    %c0_1 = arith.constant 0 : index
    %3 = vector.load %arg8[%c0, %c0_1] : memref<64x128xf32, #tpu.memory_space<vmem>>, vector<64x128xf32>
    %c0_2 = arith.constant 0 : index
    %c0_3 = arith.constant 0 : index
    %4 = vector.load %arg2[%c0_2, %c0_3] : memref<64x256xbf16, #tpu.memory_space<vmem>>, vector<64x256xbf16>
    %c0_4 = arith.constant 0 : index
    %c0_5 = arith.constant 0 : index
    %5 = vector.load %arg3[%c0_4, %c0_5] : memref<256x128xbf16, #tpu.memory_space<vmem>>, vector<256x128xbf16>
    %cst = arith.constant dense<0.000000e+00> : vector<64x128xf32>
    %6 = tpu.matmul %4, %5, %cst {dimension_numbers = #tpu.dot_dimension_numbers<[1], [0], [0], [1], [0, 0, 1, 1], [], []>} : vector<64x256xbf16>, vector<256x128xbf16>, vector<64x128xf32> -> vector<64x128xf32>
    %7 = arith.addf %3, %6 : vector<64x128xf32>
    %c0_6 = arith.constant 0 : index
    %c0_7 = arith.constant 0 : index
    %8 = vector.load %arg8[%c0_6, %c0_7] : memref<64x128xf32, #tpu.memory_space<vmem>>, vector<64x128xf32>
    tpu.vector_store %arg8[%c0_6, %c0_7], %7 {strides = array<i32>} : memref<64x128xf32, #tpu.memory_space<vmem>>, vector<64x128xf32>,
    %c0_i32_8 = arith.constant 0 : i32
    %9 = arith.cmpi eq, %arg1, %c0_i32_8 : i32
    %10 = arith.extui %9 : i1 to i32
    %c0_i32_9 = arith.constant 0 : i32
    %11 = arith.cmpi ne, %10, %c0_i32_9 : i32
    scf.if %11 {
      %c0_10 = arith.constant 0 : index
      %c0_11 = arith.constant 0 : index
      %12 = vector.load %arg8[%c0_10, %c0_11] : memref<64x128xf32, #tpu.memory_space<vmem>>, vector<64x128xf32>
      %c0_12 = arith.constant 0 : index
      %c0_13 = arith.constant 0 : index
      %13 = vector.load %arg4[%c0_12, %c0_13] : memref<1x128xf32, #tpu.memory_space<vmem>>, vector<1x128xf32>
      %14 = vector.broadcast %13 : vector<1x128xf32> to vector<64x128xf32>
      %15 = arith.mulf %12, %14 : vector<64x128xf32>
      %c0_14 = arith.constant 0 : index
      %c0_15 = arith.constant 0 : index
      %16 = vector.load %arg5[%c0_14, %c0_15] : memref<1x128xf32, #tpu.memory_space<vmem>>, vector<1x128xf32>
      %17 = vector.broadcast %16 : vector<1x128xf32> to vector<64x128xf32>
      %18 = arith.addf %15, %17 : vector<64x128xf32>
      %c0_16 = arith.constant 0 : index
      %c0_17 = arith.constant 0 : index
      %19 = vector.load %arg6[%c0_16, %c0_17] : memref<1x128xf32, #tpu.memory_space<vmem>>, vector<1x128xf32>
      %cst_18 = arith.constant 0.000000e+00 : f32
      %20 = vector.broadcast %cst_18 : f32 to vector<1x128xf32>
      %21 = arith.cmpf one, %19, %20 : vector<1x128xf32>
      %cst_19 = arith.constant 0.000000e+00 : f32
      %22 = vector.broadcast %cst_19 : f32 to vector<64x128xf32>
      %23 = arith.maximumf %18, %22 : vector<64x128xf32>
      %24 = vector.shape_cast %21 : vector<1x128xi1> to vector<1x128xi1>
      %25 = vector.broadcast %24 : vector<1x128xi1> to vector<64x128xi1>
      %26 = arith.select %25, %23, %18 : vector<64x128xi1>, vector<64x128xf32>
      %27 = arith.truncf %26 : vector<64x128xf32> to vector<64x128xbf16>
      %c0_20 = arith.constant 0 : index
      %c0_21 = arith.constant 0 : index
      %28 = vector.load %arg7[%c0_20, %c0_21] : memref<64x128xbf16, #tpu.memory_space<vmem>>, vector<64x128xbf16>
      tpu.vector_store %arg7[%c0_20, %c0_21], %27 {strides = array<i32>} : memref<64x128xbf16, #tpu.memory_space<vmem>>, vector<64x128xbf16>,
    } else {
    }
    return
  }
  func.func @transform_0(%arg0: i32, %arg1: i32) -> (i32, i32) {
    %c0_i32 = arith.constant 0 : i32
    return %arg0, %arg1 : i32, i32
  }
  func.func @transform_1(%arg0: i32, %arg1: i32) -> (i32, i32) {
    %c0_i32 = arith.constant 0 : i32
    %c0_i32_0 = arith.constant 0 : i32
    return %arg1, %c0_i32 : i32, i32
  }
  func.func @transform_2(%arg0: i32, %arg1: i32) -> (i32, i32) {
    %c0_i32 = arith.constant 0 : i32
    %c0_i32_0 = arith.constant 0 : i32
    %c0_i32_1 = arith.constant 0 : i32
    return %c0_i32, %c0_i32_0 : i32, i32
  }
  func.func @transform_3(%arg0: i32, %arg1: i32) -> (i32, i32) {
    %c0_i32 = arith.constant 0 : i32
    %c0_i32_0 = arith.constant 0 : i32
    %c0_i32_1 = arith.constant 0 : i32
    return %c0_i32, %c0_i32_0 : i32, i32
  }
  func.func @transform_4(%arg0: i32, %arg1: i32) -> (i32, i32) {
    %c0_i32 = arith.constant 0 : i32
    %c0_i32_0 = arith.constant 0 : i32
    %c0_i32_1 = arith.constant 0 : i32
    return %c0_i32, %c0_i32_0 : i32, i32
  }
  func.func @transform_5(%arg0: i32, %arg1: i32) -> (i32, i32) {
    %c0_i32 = arith.constant 0 : i32
    %c0_i32_0 = arith.constant 0 : i32
    return %arg0, %c0_i32 : i32, i32
  }
}

module attributes {stable_mosaic.version = 11 : i64} {
  func.func @_matmul_bn_res_kernel(%arg0: i32, %arg1: i32, %arg2: memref<64x512xbf16, #tpu.memory_space<vmem>>, %arg3: memref<512x128xbf16, #tpu.memory_space<vmem>>, %arg4: memref<1x128xf32, #tpu.memory_space<vmem>>, %arg5: memref<1x128xf32, #tpu.memory_space<vmem>>, %arg6: memref<1x128xf32, #tpu.memory_space<vmem>>, %arg7: memref<64x128xbf16, #tpu.memory_space<vmem>>, %arg8: memref<64x128xbf16, #tpu.memory_space<vmem>>, %arg9: memref<64x128xf32, #tpu.memory_space<vmem>>) attributes {dimension_semantics = [#tpu.dimension_semantics<parallel>, #tpu.dimension_semantics<arbitrary>], iteration_bounds = array<i64: 1, 1>, scalar_prefetch = 0 : i64, scratch_operands = 1 : i64, tpu.core_type = #tpu.core_type<tc>, window_params = [{transform_indices = @transform_0, window_bounds = array<i64: 64, 512>}, {transform_indices = @transform_1, window_bounds = array<i64: 512, 128>}, {pipeline_mode = #tpu.pipeline_mode<synchronous>, transform_indices = @transform_2, window_bounds = array<i64: 1, 128>}, {pipeline_mode = #tpu.pipeline_mode<synchronous>, transform_indices = @transform_3, window_bounds = array<i64: 1, 128>}, {pipeline_mode = #tpu.pipeline_mode<synchronous>, transform_indices = @transform_4, window_bounds = array<i64: 1, 128>}, {transform_indices = @transform_5, window_bounds = array<i64: 64, 128>}, {transform_indices = @transform_6, window_bounds = array<i64: 64, 128>}]} {
    %c0_i32 = arith.constant 0 : i32
    %0 = arith.cmpi eq, %arg1, %c0_i32 : i32
    %1 = arith.extui %0 : i1 to i32
    %c0_i32_0 = arith.constant 0 : i32
    %2 = arith.cmpi ne, %1, %c0_i32_0 : i32
    scf.if %2 {
      %cst_10 = arith.constant 0.000000e+00 : f32
      %12 = vector.broadcast %cst_10 : f32 to vector<64x128xf32>
      %c0_11 = arith.constant 0 : index
      %c0_12 = arith.constant 0 : index
      %13 = vector.load %arg9[%c0_11, %c0_12] : memref<64x128xf32, #tpu.memory_space<vmem>>, vector<64x128xf32>
      tpu.vector_store %arg9[%c0_11, %c0_12], %12 {strides = array<i32>} : memref<64x128xf32, #tpu.memory_space<vmem>>, vector<64x128xf32>,
    } else {
    }
    %c0 = arith.constant 0 : index
    %c0_1 = arith.constant 0 : index
    %3 = vector.load %arg9[%c0, %c0_1] : memref<64x128xf32, #tpu.memory_space<vmem>>, vector<64x128xf32>
    %c0_2 = arith.constant 0 : index
    %c0_3 = arith.constant 0 : index
    %4 = vector.load %arg2[%c0_2, %c0_3] : memref<64x512xbf16, #tpu.memory_space<vmem>>, vector<64x512xbf16>
    %c0_4 = arith.constant 0 : index
    %c0_5 = arith.constant 0 : index
    %5 = vector.load %arg3[%c0_4, %c0_5] : memref<512x128xbf16, #tpu.memory_space<vmem>>, vector<512x128xbf16>
    %cst = arith.constant dense<0.000000e+00> : vector<64x128xf32>
    %6 = tpu.matmul %4, %5, %cst {dimension_numbers = #tpu.dot_dimension_numbers<[1], [0], [0], [1], [0, 0, 1, 1], [], []>} : vector<64x512xbf16>, vector<512x128xbf16>, vector<64x128xf32> -> vector<64x128xf32>
    %7 = arith.addf %3, %6 : vector<64x128xf32>
    %c0_6 = arith.constant 0 : index
    %c0_7 = arith.constant 0 : index
    %8 = vector.load %arg9[%c0_6, %c0_7] : memref<64x128xf32, #tpu.memory_space<vmem>>, vector<64x128xf32>
    tpu.vector_store %arg9[%c0_6, %c0_7], %7 {strides = array<i32>} : memref<64x128xf32, #tpu.memory_space<vmem>>, vector<64x128xf32>,
    %c0_i32_8 = arith.constant 0 : i32
    %9 = arith.cmpi eq, %arg1, %c0_i32_8 : i32
    %10 = arith.extui %9 : i1 to i32
    %c0_i32_9 = arith.constant 0 : i32
    %11 = arith.cmpi ne, %10, %c0_i32_9 : i32
    scf.if %11 {
      %c0_10 = arith.constant 0 : index
      %c0_11 = arith.constant 0 : index
      %12 = vector.load %arg9[%c0_10, %c0_11] : memref<64x128xf32, #tpu.memory_space<vmem>>, vector<64x128xf32>
      %c0_12 = arith.constant 0 : index
      %c0_13 = arith.constant 0 : index
      %13 = vector.load %arg4[%c0_12, %c0_13] : memref<1x128xf32, #tpu.memory_space<vmem>>, vector<1x128xf32>
      %14 = vector.broadcast %13 : vector<1x128xf32> to vector<64x128xf32>
      %15 = arith.mulf %12, %14 : vector<64x128xf32>
      %c0_14 = arith.constant 0 : index
      %c0_15 = arith.constant 0 : index
      %16 = vector.load %arg5[%c0_14, %c0_15] : memref<1x128xf32, #tpu.memory_space<vmem>>, vector<1x128xf32>
      %17 = vector.broadcast %16 : vector<1x128xf32> to vector<64x128xf32>
      %18 = arith.addf %15, %17 : vector<64x128xf32>
      %c0_16 = arith.constant 0 : index
      %c0_17 = arith.constant 0 : index
      %19 = vector.load %arg7[%c0_16, %c0_17] : memref<64x128xbf16, #tpu.memory_space<vmem>>, vector<64x128xbf16>
      %20 = arith.extf %19 : vector<64x128xbf16> to vector<64x128xf32>
      %21 = arith.addf %18, %20 : vector<64x128xf32>
      %c0_18 = arith.constant 0 : index
      %c0_19 = arith.constant 0 : index
      %22 = vector.load %arg6[%c0_18, %c0_19] : memref<1x128xf32, #tpu.memory_space<vmem>>, vector<1x128xf32>
      %cst_20 = arith.constant 0.000000e+00 : f32
      %23 = vector.broadcast %cst_20 : f32 to vector<1x128xf32>
      %24 = arith.cmpf one, %22, %23 : vector<1x128xf32>
      %cst_21 = arith.constant 0.000000e+00 : f32
      %25 = vector.broadcast %cst_21 : f32 to vector<64x128xf32>
      %26 = arith.maximumf %21, %25 : vector<64x128xf32>
      %27 = vector.shape_cast %24 : vector<1x128xi1> to vector<1x128xi1>
      %28 = vector.broadcast %27 : vector<1x128xi1> to vector<64x128xi1>
      %29 = arith.select %28, %26, %21 : vector<64x128xi1>, vector<64x128xf32>
      %30 = arith.truncf %29 : vector<64x128xf32> to vector<64x128xbf16>
      %c0_22 = arith.constant 0 : index
      %c0_23 = arith.constant 0 : index
      %31 = vector.load %arg8[%c0_22, %c0_23] : memref<64x128xbf16, #tpu.memory_space<vmem>>, vector<64x128xbf16>
      tpu.vector_store %arg8[%c0_22, %c0_23], %30 {strides = array<i32>} : memref<64x128xbf16, #tpu.memory_space<vmem>>, vector<64x128xbf16>,
    } else {
    }
    return
  }
  func.func @transform_0(%arg0: i32, %arg1: i32) -> (i32, i32) {
    %c0_i32 = arith.constant 0 : i32
    return %arg0, %arg1 : i32, i32
  }
  func.func @transform_1(%arg0: i32, %arg1: i32) -> (i32, i32) {
    %c0_i32 = arith.constant 0 : i32
    %c0_i32_0 = arith.constant 0 : i32
    return %arg1, %c0_i32 : i32, i32
  }
  func.func @transform_2(%arg0: i32, %arg1: i32) -> (i32, i32) {
    %c0_i32 = arith.constant 0 : i32
    %c0_i32_0 = arith.constant 0 : i32
    %c0_i32_1 = arith.constant 0 : i32
    return %c0_i32, %c0_i32_0 : i32, i32
  }
  func.func @transform_3(%arg0: i32, %arg1: i32) -> (i32, i32) {
    %c0_i32 = arith.constant 0 : i32
    %c0_i32_0 = arith.constant 0 : i32
    %c0_i32_1 = arith.constant 0 : i32
    return %c0_i32, %c0_i32_0 : i32, i32
  }
  func.func @transform_4(%arg0: i32, %arg1: i32) -> (i32, i32) {
    %c0_i32 = arith.constant 0 : i32
    %c0_i32_0 = arith.constant 0 : i32
    %c0_i32_1 = arith.constant 0 : i32
    return %c0_i32, %c0_i32_0 : i32, i32
  }
  func.func @transform_5(%arg0: i32, %arg1: i32) -> (i32, i32) {
    %c0_i32 = arith.constant 0 : i32
    %c0_i32_0 = arith.constant 0 : i32
    return %arg0, %c0_i32 : i32, i32
  }
  func.func @transform_6(%arg0: i32, %arg1: i32) -> (i32, i32) {
    %c0_i32 = arith.constant 0 : i32
    %c0_i32_0 = arith.constant 0 : i32
    return %arg0, %c0_i32 : i32, i32
  }
}

module attributes {stable_mosaic.version = 11 : i64} {
  func.func @_matmul_bn_kernel(%arg0: i32, %arg1: i32, %arg2: memref<64x512xbf16, #tpu.memory_space<vmem>>, %arg3: memref<512x128xbf16, #tpu.memory_space<vmem>>, %arg4: memref<1x128xf32, #tpu.memory_space<vmem>>, %arg5: memref<1x128xf32, #tpu.memory_space<vmem>>, %arg6: memref<1x128xf32, #tpu.memory_space<vmem>>, %arg7: memref<64x128xbf16, #tpu.memory_space<vmem>>, %arg8: memref<64x128xf32, #tpu.memory_space<vmem>>) attributes {dimension_semantics = [#tpu.dimension_semantics<parallel>, #tpu.dimension_semantics<arbitrary>], iteration_bounds = array<i64: 1, 1>, scalar_prefetch = 0 : i64, scratch_operands = 1 : i64, tpu.core_type = #tpu.core_type<tc>, window_params = [{transform_indices = @transform_0, window_bounds = array<i64: 64, 512>}, {transform_indices = @transform_1, window_bounds = array<i64: 512, 128>}, {pipeline_mode = #tpu.pipeline_mode<synchronous>, transform_indices = @transform_2, window_bounds = array<i64: 1, 128>}, {pipeline_mode = #tpu.pipeline_mode<synchronous>, transform_indices = @transform_3, window_bounds = array<i64: 1, 128>}, {pipeline_mode = #tpu.pipeline_mode<synchronous>, transform_indices = @transform_4, window_bounds = array<i64: 1, 128>}, {transform_indices = @transform_5, window_bounds = array<i64: 64, 128>}]} {
    %c0_i32 = arith.constant 0 : i32
    %0 = arith.cmpi eq, %arg1, %c0_i32 : i32
    %1 = arith.extui %0 : i1 to i32
    %c0_i32_0 = arith.constant 0 : i32
    %2 = arith.cmpi ne, %1, %c0_i32_0 : i32
    scf.if %2 {
      %cst_10 = arith.constant 0.000000e+00 : f32
      %12 = vector.broadcast %cst_10 : f32 to vector<64x128xf32>
      %c0_11 = arith.constant 0 : index
      %c0_12 = arith.constant 0 : index
      %13 = vector.load %arg8[%c0_11, %c0_12] : memref<64x128xf32, #tpu.memory_space<vmem>>, vector<64x128xf32>
      tpu.vector_store %arg8[%c0_11, %c0_12], %12 {strides = array<i32>} : memref<64x128xf32, #tpu.memory_space<vmem>>, vector<64x128xf32>,
    } else {
    }
    %c0 = arith.constant 0 : index
    %c0_1 = arith.constant 0 : index
    %3 = vector.load %arg8[%c0, %c0_1] : memref<64x128xf32, #tpu.memory_space<vmem>>, vector<64x128xf32>
    %c0_2 = arith.constant 0 : index
    %c0_3 = arith.constant 0 : index
    %4 = vector.load %arg2[%c0_2, %c0_3] : memref<64x512xbf16, #tpu.memory_space<vmem>>, vector<64x512xbf16>
    %c0_4 = arith.constant 0 : index
    %c0_5 = arith.constant 0 : index
    %5 = vector.load %arg3[%c0_4, %c0_5] : memref<512x128xbf16, #tpu.memory_space<vmem>>, vector<512x128xbf16>
    %cst = arith.constant dense<0.000000e+00> : vector<64x128xf32>
    %6 = tpu.matmul %4, %5, %cst {dimension_numbers = #tpu.dot_dimension_numbers<[1], [0], [0], [1], [0, 0, 1, 1], [], []>} : vector<64x512xbf16>, vector<512x128xbf16>, vector<64x128xf32> -> vector<64x128xf32>
    %7 = arith.addf %3, %6 : vector<64x128xf32>
    %c0_6 = arith.constant 0 : index
    %c0_7 = arith.constant 0 : index
    %8 = vector.load %arg8[%c0_6, %c0_7] : memref<64x128xf32, #tpu.memory_space<vmem>>, vector<64x128xf32>
    tpu.vector_store %arg8[%c0_6, %c0_7], %7 {strides = array<i32>} : memref<64x128xf32, #tpu.memory_space<vmem>>, vector<64x128xf32>,
    %c0_i32_8 = arith.constant 0 : i32
    %9 = arith.cmpi eq, %arg1, %c0_i32_8 : i32
    %10 = arith.extui %9 : i1 to i32
    %c0_i32_9 = arith.constant 0 : i32
    %11 = arith.cmpi ne, %10, %c0_i32_9 : i32
    scf.if %11 {
      %c0_10 = arith.constant 0 : index
      %c0_11 = arith.constant 0 : index
      %12 = vector.load %arg8[%c0_10, %c0_11] : memref<64x128xf32, #tpu.memory_space<vmem>>, vector<64x128xf32>
      %c0_12 = arith.constant 0 : index
      %c0_13 = arith.constant 0 : index
      %13 = vector.load %arg4[%c0_12, %c0_13] : memref<1x128xf32, #tpu.memory_space<vmem>>, vector<1x128xf32>
      %14 = vector.broadcast %13 : vector<1x128xf32> to vector<64x128xf32>
      %15 = arith.mulf %12, %14 : vector<64x128xf32>
      %c0_14 = arith.constant 0 : index
      %c0_15 = arith.constant 0 : index
      %16 = vector.load %arg5[%c0_14, %c0_15] : memref<1x128xf32, #tpu.memory_space<vmem>>, vector<1x128xf32>
      %17 = vector.broadcast %16 : vector<1x128xf32> to vector<64x128xf32>
      %18 = arith.addf %15, %17 : vector<64x128xf32>
      %c0_16 = arith.constant 0 : index
      %c0_17 = arith.constant 0 : index
      %19 = vector.load %arg6[%c0_16, %c0_17] : memref<1x128xf32, #tpu.memory_space<vmem>>, vector<1x128xf32>
      %cst_18 = arith.constant 0.000000e+00 : f32
      %20 = vector.broadcast %cst_18 : f32 to vector<1x128xf32>
      %21 = arith.cmpf one, %19, %20 : vector<1x128xf32>
      %cst_19 = arith.constant 0.000000e+00 : f32
      %22 = vector.broadcast %cst_19 : f32 to vector<64x128xf32>
      %23 = arith.maximumf %18, %22 : vector<64x128xf32>
      %24 = vector.shape_cast %21 : vector<1x128xi1> to vector<1x128xi1>
      %25 = vector.broadcast %24 : vector<1x128xi1> to vector<64x128xi1>
      %26 = arith.select %25, %23, %18 : vector<64x128xi1>, vector<64x128xf32>
      %27 = arith.truncf %26 : vector<64x128xf32> to vector<64x128xbf16>
      %c0_20 = arith.constant 0 : index
      %c0_21 = arith.constant 0 : index
      %28 = vector.load %arg7[%c0_20, %c0_21] : memref<64x128xbf16, #tpu.memory_space<vmem>>, vector<64x128xbf16>
      tpu.vector_store %arg7[%c0_20, %c0_21], %27 {strides = array<i32>} : memref<64x128xbf16, #tpu.memory_space<vmem>>, vector<64x128xbf16>,
    } else {
    }
    return
  }
  func.func @transform_0(%arg0: i32, %arg1: i32) -> (i32, i32) {
    %c0_i32 = arith.constant 0 : i32
    return %arg0, %arg1 : i32, i32
  }
  func.func @transform_1(%arg0: i32, %arg1: i32) -> (i32, i32) {
    %c0_i32 = arith.constant 0 : i32
    %c0_i32_0 = arith.constant 0 : i32
    return %arg1, %c0_i32 : i32, i32
  }
  func.func @transform_2(%arg0: i32, %arg1: i32) -> (i32, i32) {
    %c0_i32 = arith.constant 0 : i32
    %c0_i32_0 = arith.constant 0 : i32
    %c0_i32_1 = arith.constant 0 : i32
    return %c0_i32, %c0_i32_0 : i32, i32
  }
  func.func @transform_3(%arg0: i32, %arg1: i32) -> (i32, i32) {
    %c0_i32 = arith.constant 0 : i32
    %c0_i32_0 = arith.constant 0 : i32
    %c0_i32_1 = arith.constant 0 : i32
    return %c0_i32, %c0_i32_0 : i32, i32
  }
  func.func @transform_4(%arg0: i32, %arg1: i32) -> (i32, i32) {
    %c0_i32 = arith.constant 0 : i32
    %c0_i32_0 = arith.constant 0 : i32
    %c0_i32_1 = arith.constant 0 : i32
    return %c0_i32, %c0_i32_0 : i32, i32
  }
  func.func @transform_5(%arg0: i32, %arg1: i32) -> (i32, i32) {
    %c0_i32 = arith.constant 0 : i32
    %c0_i32_0 = arith.constant 0 : i32
    return %arg0, %c0_i32 : i32, i32
  }
}

module attributes {stable_mosaic.version = 11 : i64} {
  func.func @_matmul_bn_res_kernel(%arg0: i32, %arg1: i32, %arg2: memref<64x896xbf16, #tpu.memory_space<vmem>>, %arg3: memref<896x128xbf16, #tpu.memory_space<vmem>>, %arg4: memref<1x128xf32, #tpu.memory_space<vmem>>, %arg5: memref<1x128xf32, #tpu.memory_space<vmem>>, %arg6: memref<1x128xf32, #tpu.memory_space<vmem>>, %arg7: memref<64x128xbf16, #tpu.memory_space<vmem>>, %arg8: memref<64x128xbf16, #tpu.memory_space<vmem>>, %arg9: memref<64x128xf32, #tpu.memory_space<vmem>>) attributes {dimension_semantics = [#tpu.dimension_semantics<parallel>, #tpu.dimension_semantics<arbitrary>], iteration_bounds = array<i64: 1, 1>, scalar_prefetch = 0 : i64, scratch_operands = 1 : i64, tpu.core_type = #tpu.core_type<tc>, window_params = [{transform_indices = @transform_0, window_bounds = array<i64: 64, 896>}, {transform_indices = @transform_1, window_bounds = array<i64: 896, 128>}, {pipeline_mode = #tpu.pipeline_mode<synchronous>, transform_indices = @transform_2, window_bounds = array<i64: 1, 128>}, {pipeline_mode = #tpu.pipeline_mode<synchronous>, transform_indices = @transform_3, window_bounds = array<i64: 1, 128>}, {pipeline_mode = #tpu.pipeline_mode<synchronous>, transform_indices = @transform_4, window_bounds = array<i64: 1, 128>}, {transform_indices = @transform_5, window_bounds = array<i64: 64, 128>}, {transform_indices = @transform_6, window_bounds = array<i64: 64, 128>}]} {
    %c0_i32 = arith.constant 0 : i32
    %0 = arith.cmpi eq, %arg1, %c0_i32 : i32
    %1 = arith.extui %0 : i1 to i32
    %c0_i32_0 = arith.constant 0 : i32
    %2 = arith.cmpi ne, %1, %c0_i32_0 : i32
    scf.if %2 {
      %cst_10 = arith.constant 0.000000e+00 : f32
      %12 = vector.broadcast %cst_10 : f32 to vector<64x128xf32>
      %c0_11 = arith.constant 0 : index
      %c0_12 = arith.constant 0 : index
      %13 = vector.load %arg9[%c0_11, %c0_12] : memref<64x128xf32, #tpu.memory_space<vmem>>, vector<64x128xf32>
      tpu.vector_store %arg9[%c0_11, %c0_12], %12 {strides = array<i32>} : memref<64x128xf32, #tpu.memory_space<vmem>>, vector<64x128xf32>,
    } else {
    }
    %c0 = arith.constant 0 : index
    %c0_1 = arith.constant 0 : index
    %3 = vector.load %arg9[%c0, %c0_1] : memref<64x128xf32, #tpu.memory_space<vmem>>, vector<64x128xf32>
    %c0_2 = arith.constant 0 : index
    %c0_3 = arith.constant 0 : index
    %4 = vector.load %arg2[%c0_2, %c0_3] : memref<64x896xbf16, #tpu.memory_space<vmem>>, vector<64x896xbf16>
    %c0_4 = arith.constant 0 : index
    %c0_5 = arith.constant 0 : index
    %5 = vector.load %arg3[%c0_4, %c0_5] : memref<896x128xbf16, #tpu.memory_space<vmem>>, vector<896x128xbf16>
    %cst = arith.constant dense<0.000000e+00> : vector<64x128xf32>
    %6 = tpu.matmul %4, %5, %cst {dimension_numbers = #tpu.dot_dimension_numbers<[1], [0], [0], [1], [0, 0, 1, 1], [], []>} : vector<64x896xbf16>, vector<896x128xbf16>, vector<64x128xf32> -> vector<64x128xf32>
    %7 = arith.addf %3, %6 : vector<64x128xf32>
    %c0_6 = arith.constant 0 : index
    %c0_7 = arith.constant 0 : index
    %8 = vector.load %arg9[%c0_6, %c0_7] : memref<64x128xf32, #tpu.memory_space<vmem>>, vector<64x128xf32>
    tpu.vector_store %arg9[%c0_6, %c0_7], %7 {strides = array<i32>} : memref<64x128xf32, #tpu.memory_space<vmem>>, vector<64x128xf32>,
    %c0_i32_8 = arith.constant 0 : i32
    %9 = arith.cmpi eq, %arg1, %c0_i32_8 : i32
    %10 = arith.extui %9 : i1 to i32
    %c0_i32_9 = arith.constant 0 : i32
    %11 = arith.cmpi ne, %10, %c0_i32_9 : i32
    scf.if %11 {
      %c0_10 = arith.constant 0 : index
      %c0_11 = arith.constant 0 : index
      %12 = vector.load %arg9[%c0_10, %c0_11] : memref<64x128xf32, #tpu.memory_space<vmem>>, vector<64x128xf32>
      %c0_12 = arith.constant 0 : index
      %c0_13 = arith.constant 0 : index
      %13 = vector.load %arg4[%c0_12, %c0_13] : memref<1x128xf32, #tpu.memory_space<vmem>>, vector<1x128xf32>
      %14 = vector.broadcast %13 : vector<1x128xf32> to vector<64x128xf32>
      %15 = arith.mulf %12, %14 : vector<64x128xf32>
      %c0_14 = arith.constant 0 : index
      %c0_15 = arith.constant 0 : index
      %16 = vector.load %arg5[%c0_14, %c0_15] : memref<1x128xf32, #tpu.memory_space<vmem>>, vector<1x128xf32>
      %17 = vector.broadcast %16 : vector<1x128xf32> to vector<64x128xf32>
      %18 = arith.addf %15, %17 : vector<64x128xf32>
      %c0_16 = arith.constant 0 : index
      %c0_17 = arith.constant 0 : index
      %19 = vector.load %arg7[%c0_16, %c0_17] : memref<64x128xbf16, #tpu.memory_space<vmem>>, vector<64x128xbf16>
      %20 = arith.extf %19 : vector<64x128xbf16> to vector<64x128xf32>
      %21 = arith.addf %18, %20 : vector<64x128xf32>
      %c0_18 = arith.constant 0 : index
      %c0_19 = arith.constant 0 : index
      %22 = vector.load %arg6[%c0_18, %c0_19] : memref<1x128xf32, #tpu.memory_space<vmem>>, vector<1x128xf32>
      %cst_20 = arith.constant 0.000000e+00 : f32
      %23 = vector.broadcast %cst_20 : f32 to vector<1x128xf32>
      %24 = arith.cmpf one, %22, %23 : vector<1x128xf32>
      %cst_21 = arith.constant 0.000000e+00 : f32
      %25 = vector.broadcast %cst_21 : f32 to vector<64x128xf32>
      %26 = arith.maximumf %21, %25 : vector<64x128xf32>
      %27 = vector.shape_cast %24 : vector<1x128xi1> to vector<1x128xi1>
      %28 = vector.broadcast %27 : vector<1x128xi1> to vector<64x128xi1>
      %29 = arith.select %28, %26, %21 : vector<64x128xi1>, vector<64x128xf32>
      %30 = arith.truncf %29 : vector<64x128xf32> to vector<64x128xbf16>
      %c0_22 = arith.constant 0 : index
      %c0_23 = arith.constant 0 : index
      %31 = vector.load %arg8[%c0_22, %c0_23] : memref<64x128xbf16, #tpu.memory_space<vmem>>, vector<64x128xbf16>
      tpu.vector_store %arg8[%c0_22, %c0_23], %30 {strides = array<i32>} : memref<64x128xbf16, #tpu.memory_space<vmem>>, vector<64x128xbf16>,
    } else {
    }
    return
  }
  func.func @transform_0(%arg0: i32, %arg1: i32) -> (i32, i32) {
    %c0_i32 = arith.constant 0 : i32
    return %arg0, %arg1 : i32, i32
  }
  func.func @transform_1(%arg0: i32, %arg1: i32) -> (i32, i32) {
    %c0_i32 = arith.constant 0 : i32
    %c0_i32_0 = arith.constant 0 : i32
    return %arg1, %c0_i32 : i32, i32
  }
  func.func @transform_2(%arg0: i32, %arg1: i32) -> (i32, i32) {
    %c0_i32 = arith.constant 0 : i32
    %c0_i32_0 = arith.constant 0 : i32
    %c0_i32_1 = arith.constant 0 : i32
    return %c0_i32, %c0_i32_0 : i32, i32
  }
  func.func @transform_3(%arg0: i32, %arg1: i32) -> (i32, i32) {
    %c0_i32 = arith.constant 0 : i32
    %c0_i32_0 = arith.constant 0 : i32
    %c0_i32_1 = arith.constant 0 : i32
    return %c0_i32, %c0_i32_0 : i32, i32
  }
  func.func @transform_4(%arg0: i32, %arg1: i32) -> (i32, i32) {
    %c0_i32 = arith.constant 0 : i32
    %c0_i32_0 = arith.constant 0 : i32
    %c0_i32_1 = arith.constant 0 : i32
    return %c0_i32, %c0_i32_0 : i32, i32
  }
  func.func @transform_5(%arg0: i32, %arg1: i32) -> (i32, i32) {
    %c0_i32 = arith.constant 0 : i32
    %c0_i32_0 = arith.constant 0 : i32
    return %arg0, %c0_i32 : i32, i32
  }
  func.func @transform_6(%arg0: i32, %arg1: i32) -> (i32, i32) {
    %c0_i32 = arith.constant 0 : i32
    %c0_i32_0 = arith.constant 0 : i32
    return %arg0, %c0_i32 : i32, i32
  }
}

module attributes {stable_mosaic.version = 11 : i64} {
  func.func @_matmul_bn_kernel(%arg0: i32, %arg1: i32, %arg2: memref<64x896xbf16, #tpu.memory_space<vmem>>, %arg3: memref<896x128xbf16, #tpu.memory_space<vmem>>, %arg4: memref<1x128xf32, #tpu.memory_space<vmem>>, %arg5: memref<1x128xf32, #tpu.memory_space<vmem>>, %arg6: memref<1x128xf32, #tpu.memory_space<vmem>>, %arg7: memref<64x128xbf16, #tpu.memory_space<vmem>>, %arg8: memref<64x128xf32, #tpu.memory_space<vmem>>) attributes {dimension_semantics = [#tpu.dimension_semantics<parallel>, #tpu.dimension_semantics<arbitrary>], iteration_bounds = array<i64: 1, 1>, scalar_prefetch = 0 : i64, scratch_operands = 1 : i64, tpu.core_type = #tpu.core_type<tc>, window_params = [{transform_indices = @transform_0, window_bounds = array<i64: 64, 896>}, {transform_indices = @transform_1, window_bounds = array<i64: 896, 128>}, {pipeline_mode = #tpu.pipeline_mode<synchronous>, transform_indices = @transform_2, window_bounds = array<i64: 1, 128>}, {pipeline_mode = #tpu.pipeline_mode<synchronous>, transform_indices = @transform_3, window_bounds = array<i64: 1, 128>}, {pipeline_mode = #tpu.pipeline_mode<synchronous>, transform_indices = @transform_4, window_bounds = array<i64: 1, 128>}, {transform_indices = @transform_5, window_bounds = array<i64: 64, 128>}]} {
    %c0_i32 = arith.constant 0 : i32
    %0 = arith.cmpi eq, %arg1, %c0_i32 : i32
    %1 = arith.extui %0 : i1 to i32
    %c0_i32_0 = arith.constant 0 : i32
    %2 = arith.cmpi ne, %1, %c0_i32_0 : i32
    scf.if %2 {
      %cst_10 = arith.constant 0.000000e+00 : f32
      %12 = vector.broadcast %cst_10 : f32 to vector<64x128xf32>
      %c0_11 = arith.constant 0 : index
      %c0_12 = arith.constant 0 : index
      %13 = vector.load %arg8[%c0_11, %c0_12] : memref<64x128xf32, #tpu.memory_space<vmem>>, vector<64x128xf32>
      tpu.vector_store %arg8[%c0_11, %c0_12], %12 {strides = array<i32>} : memref<64x128xf32, #tpu.memory_space<vmem>>, vector<64x128xf32>,
    } else {
    }
    %c0 = arith.constant 0 : index
    %c0_1 = arith.constant 0 : index
    %3 = vector.load %arg8[%c0, %c0_1] : memref<64x128xf32, #tpu.memory_space<vmem>>, vector<64x128xf32>
    %c0_2 = arith.constant 0 : index
    %c0_3 = arith.constant 0 : index
    %4 = vector.load %arg2[%c0_2, %c0_3] : memref<64x896xbf16, #tpu.memory_space<vmem>>, vector<64x896xbf16>
    %c0_4 = arith.constant 0 : index
    %c0_5 = arith.constant 0 : index
    %5 = vector.load %arg3[%c0_4, %c0_5] : memref<896x128xbf16, #tpu.memory_space<vmem>>, vector<896x128xbf16>
    %cst = arith.constant dense<0.000000e+00> : vector<64x128xf32>
    %6 = tpu.matmul %4, %5, %cst {dimension_numbers = #tpu.dot_dimension_numbers<[1], [0], [0], [1], [0, 0, 1, 1], [], []>} : vector<64x896xbf16>, vector<896x128xbf16>, vector<64x128xf32> -> vector<64x128xf32>
    %7 = arith.addf %3, %6 : vector<64x128xf32>
    %c0_6 = arith.constant 0 : index
    %c0_7 = arith.constant 0 : index
    %8 = vector.load %arg8[%c0_6, %c0_7] : memref<64x128xf32, #tpu.memory_space<vmem>>, vector<64x128xf32>
    tpu.vector_store %arg8[%c0_6, %c0_7], %7 {strides = array<i32>} : memref<64x128xf32, #tpu.memory_space<vmem>>, vector<64x128xf32>,
    %c0_i32_8 = arith.constant 0 : i32
    %9 = arith.cmpi eq, %arg1, %c0_i32_8 : i32
    %10 = arith.extui %9 : i1 to i32
    %c0_i32_9 = arith.constant 0 : i32
    %11 = arith.cmpi ne, %10, %c0_i32_9 : i32
    scf.if %11 {
      %c0_10 = arith.constant 0 : index
      %c0_11 = arith.constant 0 : index
      %12 = vector.load %arg8[%c0_10, %c0_11] : memref<64x128xf32, #tpu.memory_space<vmem>>, vector<64x128xf32>
      %c0_12 = arith.constant 0 : index
      %c0_13 = arith.constant 0 : index
      %13 = vector.load %arg4[%c0_12, %c0_13] : memref<1x128xf32, #tpu.memory_space<vmem>>, vector<1x128xf32>
      %14 = vector.broadcast %13 : vector<1x128xf32> to vector<64x128xf32>
      %15 = arith.mulf %12, %14 : vector<64x128xf32>
      %c0_14 = arith.constant 0 : index
      %c0_15 = arith.constant 0 : index
      %16 = vector.load %arg5[%c0_14, %c0_15] : memref<1x128xf32, #tpu.memory_space<vmem>>, vector<1x128xf32>
      %17 = vector.broadcast %16 : vector<1x128xf32> to vector<64x128xf32>
      %18 = arith.addf %15, %17 : vector<64x128xf32>
      %c0_16 = arith.constant 0 : index
      %c0_17 = arith.constant 0 : index
      %19 = vector.load %arg6[%c0_16, %c0_17] : memref<1x128xf32, #tpu.memory_space<vmem>>, vector<1x128xf32>
      %cst_18 = arith.constant 0.000000e+00 : f32
      %20 = vector.broadcast %cst_18 : f32 to vector<1x128xf32>
      %21 = arith.cmpf one, %19, %20 : vector<1x128xf32>
      %cst_19 = arith.constant 0.000000e+00 : f32
      %22 = vector.broadcast %cst_19 : f32 to vector<64x128xf32>
      %23 = arith.maximumf %18, %22 : vector<64x128xf32>
      %24 = vector.shape_cast %21 : vector<1x128xi1> to vector<1x128xi1>
      %25 = vector.broadcast %24 : vector<1x128xi1> to vector<64x128xi1>
      %26 = arith.select %25, %23, %18 : vector<64x128xi1>, vector<64x128xf32>
      %27 = arith.truncf %26 : vector<64x128xf32> to vector<64x128xbf16>
      %c0_20 = arith.constant 0 : index
      %c0_21 = arith.constant 0 : index
      %28 = vector.load %arg7[%c0_20, %c0_21] : memref<64x128xbf16, #tpu.memory_space<vmem>>, vector<64x128xbf16>
      tpu.vector_store %arg7[%c0_20, %c0_21], %27 {strides = array<i32>} : memref<64x128xbf16, #tpu.memory_space<vmem>>, vector<64x128xbf16>,
    } else {
    }
    return
  }
  func.func @transform_0(%arg0: i32, %arg1: i32) -> (i32, i32) {
    %c0_i32 = arith.constant 0 : i32
    return %arg0, %arg1 : i32, i32
  }
  func.func @transform_1(%arg0: i32, %arg1: i32) -> (i32, i32) {
    %c0_i32 = arith.constant 0 : i32
    %c0_i32_0 = arith.constant 0 : i32
    return %arg1, %c0_i32 : i32, i32
  }
  func.func @transform_2(%arg0: i32, %arg1: i32) -> (i32, i32) {
    %c0_i32 = arith.constant 0 : i32
    %c0_i32_0 = arith.constant 0 : i32
    %c0_i32_1 = arith.constant 0 : i32
    return %c0_i32, %c0_i32_0 : i32, i32
  }
  func.func @transform_3(%arg0: i32, %arg1: i32) -> (i32, i32) {
    %c0_i32 = arith.constant 0 : i32
    %c0_i32_0 = arith.constant 0 : i32
    %c0_i32_1 = arith.constant 0 : i32
    return %c0_i32, %c0_i32_0 : i32, i32
  }
  func.func @transform_4(%arg0: i32, %arg1: i32) -> (i32, i32) {
    %c0_i32 = arith.constant 0 : i32
    %c0_i32_0 = arith.constant 0 : i32
    %c0_i32_1 = arith.constant 0 : i32
    return %c0_i32, %c0_i32_0 : i32, i32
  }
  func.func @transform_5(%arg0: i32, %arg1: i32) -> (i32, i32) {
    %c0_i32 = arith.constant 0 : i32
    %c0_i32_0 = arith.constant 0 : i32
    return %arg0, %c0_i32 : i32, i32
  }
}

module attributes {stable_mosaic.version = 11 : i64} {
  func.func @_matmul_bn_res_kernel(%arg0: i32, %arg1: i32, %arg2: memref<64x512xbf16, #tpu.memory_space<vmem>>, %arg3: memref<512x128xbf16, #tpu.memory_space<vmem>>, %arg4: memref<1x128xf32, #tpu.memory_space<vmem>>, %arg5: memref<1x128xf32, #tpu.memory_space<vmem>>, %arg6: memref<1x128xf32, #tpu.memory_space<vmem>>, %arg7: memref<64x128xbf16, #tpu.memory_space<vmem>>, %arg8: memref<64x128xbf16, #tpu.memory_space<vmem>>, %arg9: memref<64x128xf32, #tpu.memory_space<vmem>>) attributes {dimension_semantics = [#tpu.dimension_semantics<parallel>, #tpu.dimension_semantics<arbitrary>], iteration_bounds = array<i64: 1, 4>, scalar_prefetch = 0 : i64, scratch_operands = 1 : i64, tpu.core_type = #tpu.core_type<tc>, window_params = [{transform_indices = @transform_0, window_bounds = array<i64: 64, 512>}, {transform_indices = @transform_1, window_bounds = array<i64: 512, 128>}, {pipeline_mode = #tpu.pipeline_mode<synchronous>, transform_indices = @transform_2, window_bounds = array<i64: 1, 128>}, {pipeline_mode = #tpu.pipeline_mode<synchronous>, transform_indices = @transform_3, window_bounds = array<i64: 1, 128>}, {pipeline_mode = #tpu.pipeline_mode<synchronous>, transform_indices = @transform_4, window_bounds = array<i64: 1, 128>}, {transform_indices = @transform_5, window_bounds = array<i64: 64, 128>}, {transform_indices = @transform_6, window_bounds = array<i64: 64, 128>}]} {
    %c0_i32 = arith.constant 0 : i32
    %0 = arith.cmpi eq, %arg1, %c0_i32 : i32
    %1 = arith.extui %0 : i1 to i32
    %c0_i32_0 = arith.constant 0 : i32
    %2 = arith.cmpi ne, %1, %c0_i32_0 : i32
    scf.if %2 {
      %cst_9 = arith.constant 0.000000e+00 : f32
      %12 = vector.broadcast %cst_9 : f32 to vector<64x128xf32>
      %c0_10 = arith.constant 0 : index
      %c0_11 = arith.constant 0 : index
      %13 = vector.load %arg9[%c0_10, %c0_11] : memref<64x128xf32, #tpu.memory_space<vmem>>, vector<64x128xf32>
      tpu.vector_store %arg9[%c0_10, %c0_11], %12 {strides = array<i32>} : memref<64x128xf32, #tpu.memory_space<vmem>>, vector<64x128xf32>,
    } else {
    }
    %c0 = arith.constant 0 : index
    %c0_1 = arith.constant 0 : index
    %3 = vector.load %arg9[%c0, %c0_1] : memref<64x128xf32, #tpu.memory_space<vmem>>, vector<64x128xf32>
    %c0_2 = arith.constant 0 : index
    %c0_3 = arith.constant 0 : index
    %4 = vector.load %arg2[%c0_2, %c0_3] : memref<64x512xbf16, #tpu.memory_space<vmem>>, vector<64x512xbf16>
    %c0_4 = arith.constant 0 : index
    %c0_5 = arith.constant 0 : index
    %5 = vector.load %arg3[%c0_4, %c0_5] : memref<512x128xbf16, #tpu.memory_space<vmem>>, vector<512x128xbf16>
    %cst = arith.constant dense<0.000000e+00> : vector<64x128xf32>
    %6 = tpu.matmul %4, %5, %cst {dimension_numbers = #tpu.dot_dimension_numbers<[1], [0], [0], [1], [0, 0, 1, 1], [], []>} : vector<64x512xbf16>, vector<512x128xbf16>, vector<64x128xf32> -> vector<64x128xf32>
    %7 = arith.addf %3, %6 : vector<64x128xf32>
    %c0_6 = arith.constant 0 : index
    %c0_7 = arith.constant 0 : index
    %8 = vector.load %arg9[%c0_6, %c0_7] : memref<64x128xf32, #tpu.memory_space<vmem>>, vector<64x128xf32>
    tpu.vector_store %arg9[%c0_6, %c0_7], %7 {strides = array<i32>} : memref<64x128xf32, #tpu.memory_space<vmem>>, vector<64x128xf32>,
    %c3_i32 = arith.constant 3 : i32
    %9 = arith.cmpi eq, %arg1, %c3_i32 : i32
    %10 = arith.extui %9 : i1 to i32
    %c0_i32_8 = arith.constant 0 : i32
    %11 = arith.cmpi ne, %10, %c0_i32_8 : i32
    scf.if %11 {
      %c0_9 = arith.constant 0 : index
      %c0_10 = arith.constant 0 : index
      %12 = vector.load %arg9[%c0_9, %c0_10] : memref<64x128xf32, #tpu.memory_space<vmem>>, vector<64x128xf32>
      %c0_11 = arith.constant 0 : index
      %c0_12 = arith.constant 0 : index
      %13 = vector.load %arg4[%c0_11, %c0_12] : memref<1x128xf32, #tpu.memory_space<vmem>>, vector<1x128xf32>
      %14 = vector.broadcast %13 : vector<1x128xf32> to vector<64x128xf32>
      %15 = arith.mulf %12, %14 : vector<64x128xf32>
      %c0_13 = arith.constant 0 : index
      %c0_14 = arith.constant 0 : index
      %16 = vector.load %arg5[%c0_13, %c0_14] : memref<1x128xf32, #tpu.memory_space<vmem>>, vector<1x128xf32>
      %17 = vector.broadcast %16 : vector<1x128xf32> to vector<64x128xf32>
      %18 = arith.addf %15, %17 : vector<64x128xf32>
      %c0_15 = arith.constant 0 : index
      %c0_16 = arith.constant 0 : index
      %19 = vector.load %arg7[%c0_15, %c0_16] : memref<64x128xbf16, #tpu.memory_space<vmem>>, vector<64x128xbf16>
      %20 = arith.extf %19 : vector<64x128xbf16> to vector<64x128xf32>
      %21 = arith.addf %18, %20 : vector<64x128xf32>
      %c0_17 = arith.constant 0 : index
      %c0_18 = arith.constant 0 : index
      %22 = vector.load %arg6[%c0_17, %c0_18] : memref<1x128xf32, #tpu.memory_space<vmem>>, vector<1x128xf32>
      %cst_19 = arith.constant 0.000000e+00 : f32
      %23 = vector.broadcast %cst_19 : f32 to vector<1x128xf32>
      %24 = arith.cmpf one, %22, %23 : vector<1x128xf32>
      %cst_20 = arith.constant 0.000000e+00 : f32
      %25 = vector.broadcast %cst_20 : f32 to vector<64x128xf32>
      %26 = arith.maximumf %21, %25 : vector<64x128xf32>
      %27 = vector.shape_cast %24 : vector<1x128xi1> to vector<1x128xi1>
      %28 = vector.broadcast %27 : vector<1x128xi1> to vector<64x128xi1>
      %29 = arith.select %28, %26, %21 : vector<64x128xi1>, vector<64x128xf32>
      %30 = arith.truncf %29 : vector<64x128xf32> to vector<64x128xbf16>
      %c0_21 = arith.constant 0 : index
      %c0_22 = arith.constant 0 : index
      %31 = vector.load %arg8[%c0_21, %c0_22] : memref<64x128xbf16, #tpu.memory_space<vmem>>, vector<64x128xbf16>
      tpu.vector_store %arg8[%c0_21, %c0_22], %30 {strides = array<i32>} : memref<64x128xbf16, #tpu.memory_space<vmem>>, vector<64x128xbf16>,
    } else {
    }
    return
  }
  func.func @transform_0(%arg0: i32, %arg1: i32) -> (i32, i32) {
    %c0_i32 = arith.constant 0 : i32
    return %arg0, %arg1 : i32, i32
  }
  func.func @transform_1(%arg0: i32, %arg1: i32) -> (i32, i32) {
    %c0_i32 = arith.constant 0 : i32
    %c0_i32_0 = arith.constant 0 : i32
    return %arg1, %c0_i32 : i32, i32
  }
  func.func @transform_2(%arg0: i32, %arg1: i32) -> (i32, i32) {
    %c0_i32 = arith.constant 0 : i32
    %c0_i32_0 = arith.constant 0 : i32
    %c0_i32_1 = arith.constant 0 : i32
    return %c0_i32, %c0_i32_0 : i32, i32
  }
  func.func @transform_3(%arg0: i32, %arg1: i32) -> (i32, i32) {
    %c0_i32 = arith.constant 0 : i32
    %c0_i32_0 = arith.constant 0 : i32
    %c0_i32_1 = arith.constant 0 : i32
    return %c0_i32, %c0_i32_0 : i32, i32
  }
  func.func @transform_4(%arg0: i32, %arg1: i32) -> (i32, i32) {
    %c0_i32 = arith.constant 0 : i32
    %c0_i32_0 = arith.constant 0 : i32
    %c0_i32_1 = arith.constant 0 : i32
    return %c0_i32, %c0_i32_0 : i32, i32
  }
  func.func @transform_5(%arg0: i32, %arg1: i32) -> (i32, i32) {
    %c0_i32 = arith.constant 0 : i32
    %c0_i32_0 = arith.constant 0 : i32
    return %arg0, %c0_i32 : i32, i32
  }
  func.func @transform_6(%arg0: i32, %arg1: i32) -> (i32, i32) {
    %c0_i32 = arith.constant 0 : i32
    %c0_i32_0 = arith.constant 0 : i32
    return %arg0, %c0_i32 : i32, i32
  }
}

</mosaic_0001>

<bundles_post_ra>
// kernel: _lambda_.9
= control target key start
LH: loop header
LB: loop body
LE: loop exit
PB: predicated region body
PF: predicated region fallthrough
CT: control target
= control target key end

     0   :  { %s1422_s18 = smov 0   ;;  %s1424_s19 = smov 0   ;;  %s1609_s0 = inlined_call_operand.vmem [shape: bf16[128,1536], index: 0, kind: input, shape index: {}]   ;;  %s1610_s1 = inlined_call_operand.vmem [shape: bf16[1536,128], index: 1, kind: input, shape index: {}]   ;;  %s1611_s2 = inlined_call_operand.vmem [shape: f32[1,128], index: 2, kind: input, shape index: {}]   ;;  %s1612_s3 = inlined_call_operand.vmem [shape: f32[1,128], index: 3, kind: input, shape index: {}]   ;;  %s1613_s4 = inlined_call_operand.vmem [shape: f32[1,128], index: 4, kind: input, shape index: {}]   ;;  %s1614_s5 = inlined_call_operand.vmem [shape: bf16[128,128], index: 5, kind: output, shape index: {}]  }
   0x1   :  { %s1426_s20 = smov 0   ;;  %s1428_s21 = smov 0  }
   0x2   :  { %s1430_s22 = smov 0   ;;  %s1432_s23 = smov 0  }
   0x3   :  { %s1434_s24 = smov 0  }
   0x4 LB: > { %s24_s25 = sadd.s32 1, %s1380_s22  ;;  %s27_s26 = sadd.s32 1, %s1384_s23  ;;  %s1388_s24 = sphi %s1434_s24, %s15_s24   ;;  %s1384_s23 = sphi %s1432_s23, %s1620_s23   ;;  %s1380_s22 = sphi %s1430_s22, %s1619_s22   ;;  %s1376_s21 = sphi %s1428_s21, %s1618_s21   ;;  %s1372_s20 = sphi %s1426_s20, %s1617_s20   ;;  %s1368_s19 = sphi %s1424_s19, %s1616_s19   ;;  %s1364_s18 = sphi %s1422_s18, %s1615_s18  }
   0x5   : > { %p25_p0 = scmp.ge.s32.totalorder %s24_s25, 3  ;;  %p43_p1 = scmp.ne.s32.totalorder %s1368_s19, %s1364_s18 }
   0x6   : > { %p44_p2 = scmp.eq.s32.totalorder %s1388_s24, 0  ;;  %s36_s30 = sadd.s32 1, %s1368_s19 }
   0x7   : > { %s1622_s25 = smov (%p25_p0, %s24_s25), 0  ;;  %s1624_s26 = smov (!%p25_p0, %s27_s26), %s1384_s23 }
   0x8   : > { %p45_p3 = por %p44_p2, %p43_p1  ;;  %p29_p4 = scmp.ge.s32.totalorder %s1624_s26, 2 }
   0x9   : > { %s32_s27 = ssub.s32 %s1380_s22, %s1622_s25  ;;  %p1034_p6 = scmp.ge.s32.totalorder %s1388_s24, 6 }
   0xa   : > { %s1626_s26 = smov (%p29_p4, %s1624_s26), 0 }
   0xb   : > { %s31_s28 = ssub.s32 %s1384_s23, %s1626_s26  ;;  %193 = sbr.rel (%p1034_p6) target bundleno = 34 (0x22), region = 28 }
   0xc   : > { %s33_s29 = sor.u32 %s32_s27, %s31_s28 }
   0xd   : > { %p34_p5 = scmp.eq.s32.totalorder %s33_s29, 0 }
   0xf   : > { %s1473_s6 = scalar_select %p34_p5, %s1368_s19, %s36_s30  }
  0x12   : > { %196 = sbr.rel (!%p45_p3) target bundleno = 34 (0x22), region = 32  ;;  %s198_s7 = sand.u32 (%p45_p3), 1, %s1368_s19  }
  0x13   : > { %s1037_s8 = sshll.u32 (%p45_p3), %s1380_s22, 2  ;;  %s1035_s9 = sshll.u32 (%p45_p3), %s198_s7, 7 }
  0x14   : > { %s1219_s10 = smul.u32 (%p45_p3), 96, %s1384_s23  ;;  %s200_s16 = scalar_lea.vmem (%p45_p3), [#allocation3], %s1035_s9 }
  0x16   : > { %s204_s11 = sadd.s32 (%p45_p3), %s1219_s10, %s1037_s8 }
  0x17   : > { %s1039_s12 = sshll.u32 (%p45_p3), %s204_s11, 2 }
  0x18   : > { %s1482_s15 = scalar_lea.vmem (%p45_p3), %s1609_s0, %s1039_s12 }
  0x19   : > { %v219_v0 = vld [vmem:[%s1482_s15] sm:$0xff]  ;;  %v221_v1 = vld [vmem:[%s1482_s15 + $0x8] sm:$0xff]  ;;  %v223_v2 = vld [vmem:[%s1482_s15 + $0x30] sm:$0xff] }
  0x1a   : > { %220 = vst [vmem:[%s200_s16] sm:$0xff] %v219_v0  ;;  %222 = vst [vmem:[%s200_s16 + $0x8] sm:$0xff] %v221_v1  ;;  %v225_v3 = vld [vmem:[%s1482_s15 + $0x38] sm:$0xff]  ;;  %v227_v4 = vld [vmem:[%s1482_s15 + $0x60] sm:$0xff] }
  0x1b   : > { %224 = vst [vmem:[%s200_s16 + $0x10] sm:$0xff] %v223_v2  ;;  %v229_v5 = vld [vmem:[%s1482_s15 + $0x68] sm:$0xff]  ;;  %226 = vst [vmem:[%s200_s16 + $0x18] sm:$0xff] %v225_v3  ;;  %v231_v6 = vld [vmem:[%s1482_s15 + $0x90] sm:$0xff] }
  0x1c   : > { %228 = vst [vmem:[%s200_s16 + $0x20] sm:$0xff] %v227_v4  ;;  %230 = vst [vmem:[%s200_s16 + $0x28] sm:$0xff] %v229_v5  ;;  %v233_v7 = vld [vmem:[%s1482_s15 + $0x98] sm:$0xff]  ;;  %v235_v8 = vld [vmem:[%s1482_s15 + $0xc0] sm:$0xff] }
  0x1d   : > { %232 = vst [vmem:[%s200_s16 + $0x30] sm:$0xff] %v231_v6  ;;  %234 = vst [vmem:[%s200_s16 + $0x38] sm:$0xff] %v233_v7  ;;  %v237_v9 = vld [vmem:[%s1482_s15 + $0xc8] sm:$0xff]  ;;  %v239_v10 = vld [vmem:[%s1482_s15 + $0xf0] sm:$0xff] }
  0x1e   : > { %236 = vst [vmem:[%s200_s16 + $0x40] sm:$0xff] %v235_v8  ;;  %v241_v11 = vld [vmem:[%s1482_s15 + $0xf8] sm:$0xff]  ;;  %238 = vst [vmem:[%s200_s16 + $0x48] sm:$0xff] %v237_v9  ;;  %v243_v12 = vld [vmem:[%s1482_s15 + $0x120] sm:$0xff] }
  0x1f   : > { %240 = vst [vmem:[%s200_s16 + $0x50] sm:$0xff] %v239_v10  ;;  %242 = vst [vmem:[%s200_s16 + $0x58] sm:$0xff] %v241_v11  ;;  %v245_v13 = vld [vmem:[%s1482_s15 + $0x128] sm:$0xff]  ;;  %v247_v14 = vld [vmem:[%s1482_s15 + $0x150] sm:$0xff] }
  0x20   : > { %244 = vst [vmem:[%s200_s16 + $0x60] sm:$0xff] %v243_v12  ;;  %246 = vst [vmem:[%s200_s16 + $0x68] sm:$0xff] %v245_v13  ;;  %v249_v15 = vld [vmem:[%s1482_s15 + $0x158] sm:$0xff] }
  0x21   : > { %248 = vst [vmem:[%s200_s16 + $0x70] sm:$0xff] %v247_v14  ;;  %250 = vst [vmem:[%s200_s16 + $0x78] sm:$0xff] %v249_v15 }
  0x22 PF: > { %p1040_p7 = scmp.ge.s32.totalorder %s1388_s24, 1  ;;  %p264_p8 = scmp.lt.s32.totalorder %s1388_s24, 7 }
  0x24   : > { %p265_p9 = pnand %p1040_p7, %p264_p8 }
  0x25   : > { %s271_s17 = sand.u32 (!%p265_p9), 1, %s1364_s18   ;;  %s1042_s27 = sshll.u32 (!%p265_p9), %s1372_s20, 6 }
  0x26   : > { %268 = sbr.rel (%p265_p9) target bundleno = 353 (0x161), region = 59  ;;  %s1041_s28 = sshll.u32 (!%p265_p9), %s271_s17, 7 }
  0x27   : > { %p306_p10 = scmp.lt.s32.totalorder (!%p265_p9), %s1042_s27, 191  ;;  %s1044_s29 = sshll.u32 (!%p265_p9), %s1376_s21, 3 }
  0x28   : > { %p312_p11 = scmp.lt.s32.totalorder (!%p265_p9), %s1044_s29, 15  ;;  %s1515_s18 = scalar_lea.vmem (!%p265_p9), [#allocation3], %s1041_s28 }
  0x29   : > { %p1046_p12 = scmp.ne.s32.totalorder (!%p265_p9), %s1372_s20, 0 }
  0x2d   : > { %s1628_s27 = smov (!%p306_p10, %s1042_s27), 191  ;;  %s1630_s29 = smov (!%p312_p11, %s1044_s29), 15 }
  0x2e   : > { %s1043_s30 = sshll.u32 %s1628_s27, 2  ;;  %s1045_s10 = sshll.u32 %s1630_s29, 2  ;;  %v1390_v16 = vmov (!%p1046_p12), 0.0  }
  0x2f   : > { %s1508_s9 = scalar_lea.vmem %s1610_s1, %s1043_s30  ;;  %s1513_s13 = scalar_lea.vmem %s1614_s5, %s1045_s10  ;;  %322 = vst [vmem:[#allocation2] sm:$0xff] (!%p1046_p12), %v1390_v16  ;;  %323 = vst [vmem:[#allocation2 + $0x8] sm:$0xff] (!%p1046_p12), %v1390_v16 }
  0x30   : > { %321 = sbr.rel (%p1046_p12) target bundleno = 55 (0x37), region = 67  ;;  %324 = vst [vmem:[#allocation2 + $0x10] sm:$0xff] (!%p1046_p12), %v1390_v16  ;;  %325 = vst [vmem:[#allocation2 + $0x18] sm:$0xff] (!%p1046_p12), %v1390_v16 }
  0x31   : > { %326 = vst [vmem:[#allocation2 + $0x20] sm:$0xff] (!%p1046_p12), %v1390_v16  ;;  %327 = vst [vmem:[#allocation2 + $0x28] sm:$0xff] (!%p1046_p12), %v1390_v16 }
  0x32   : > { %328 = vst [vmem:[#allocation2 + $0x30] sm:$0xff] (!%p1046_p12), %v1390_v16  ;;  %329 = vst [vmem:[#allocation2 + $0x38] sm:$0xff] (!%p1046_p12), %v1390_v16 }
  0x37 PF: > { %v1278_v17 = vld [vmem:[%s1508_s9 + $0x40] sm:$0xff]   ;;  %v1282_v21 = vld [vmem:[%s1508_s9 + $0x48] sm:$0xff]   ;;  %v1286_v25 = vld [vmem:[%s1508_s9 + $0x50] sm:$0xff]   ;;  %p1095_p13 = scmp.ne.s32.totalorder %s1372_s20, 2 }
  0x38   : > { %v1279_v18 = vld [vmem:[%s1508_s9 + $0xc0] sm:$0xff]   ;;  %1139 = vmatprep.subr.bf16.mxu0 %v1278_v17  ;;  %v1283_v22 = vld [vmem:[%s1508_s9 + $0xc8] sm:$0xff]   ;;  %v1287_v26 = vld [vmem:[%s1508_s9 + $0xd0] sm:$0xff]  }
  0x39   : > { %v1280_v19 = vld [vmem:[%s1508_s9] sm:$0xff]   ;;  %1179 = vmatprep.subr.bf16.mxu1 %v1279_v18  ;;  %v1284_v23 = vld [vmem:[%s1508_s9 + $0x8] sm:$0xff]   ;;  %v1288_v27 = vld [vmem:[%s1508_s9 + $0x10] sm:$0xff]  }
  0x3a   : > { %v1281_v20 = vld [vmem:[%s1508_s9 + $0x80] sm:$0xff]   ;;  %1140 = vmatpush3.bf16.msra.mxu0 %v1280_v19  ;;  %v1285_v24 = vld [vmem:[%s1508_s9 + $0x88] sm:$0xff]   ;;  %v1289_v28 = vld [vmem:[%s1508_s9 + $0x90] sm:$0xff]  }
  0x3b   : > { %1180 = vmatpush3.bf16.msra.mxu1 %v1281_v20  ;;  %1141 = vmatprep.subr.bf16.mxu0 %v1282_v21  ;;  %v1290_v29 = vld [vmem:[%s1508_s9 + $0x58] sm:$0xff]   ;;  %v1294_v33 = vld [vmem:[%s1508_s9 + $0x60] sm:$0xff]   ;;  %v1298_v37 = vld [vmem:[%s1508_s9 + $0x68] sm:$0xff]  }
  0x3c   : > { %1181 = vmatprep.subr.bf16.mxu1 %v1283_v22  ;;  %v1291_v30 = vld [vmem:[%s1508_s9 + $0xd8] sm:$0xff]   ;;  %v1295_v34 = vld [vmem:[%s1508_s9 + $0xe0] sm:$0xff]   ;;  %v1299_v38 = vld [vmem:[%s1508_s9 + $0xe8] sm:$0xff]  }
  0x3d   : > { %v1292_v31 = vld [vmem:[%s1508_s9 + $0x18] sm:$0xff]   ;;  %v1296_v35 = vld [vmem:[%s1508_s9 + $0x20] sm:$0xff]   ;;  %v1300_v39 = vld [vmem:[%s1508_s9 + $0x28] sm:$0xff]  }
  0x3e   : > { %1142 = vmatpush3.bf16.msra.mxu0 %v1284_v23  ;;  %v1293_v32 = vld [vmem:[%s1508_s9 + $0x98] sm:$0xff]   ;;  %v1297_v36 = vld [vmem:[%s1508_s9 + $0xa0] sm:$0xff]   ;;  %v1301_v40 = vld [vmem:[%s1508_s9 + $0xa8] sm:$0xff]  }
  0x3f   : > { %1182 = vmatpush3.bf16.msra.mxu1 %v1285_v24  ;;  %1143 = vmatprep.subr.bf16.mxu0 %v1286_v25  ;;  %v1302_v41 = vld [vmem:[%s1508_s9 + $0x70] sm:$0xff]   ;;  %v1306_v45 = vld [vmem:[%s1508_s9 + $0x78] sm:$0xff]   ;;  %v330_v10 = vld [vmem:[#allocation2] sm:$0xff] }
  0x40   : > { %1183 = vmatprep.subr.bf16.mxu1 %v1287_v26  ;;  %v1303_v42 = vld [vmem:[%s1508_s9 + $0xf0] sm:$0xff]   ;;  %v1307_v46 = vld [vmem:[%s1508_s9 + $0xf8] sm:$0xff]   ;;  %v331_v15 = vld [vmem:[#allocation2 + $0x8] sm:$0xff] }
  0x41   : > { %v1304_v43 = vld [vmem:[%s1508_s9 + $0x30] sm:$0xff]   ;;  %v1308_v47 = vld [vmem:[%s1508_s9 + $0x38] sm:$0xff]  }
  0x42   : > { %1144 = vmatpush3.bf16.msra.mxu0 %v1288_v27  ;;  %v1305_v44 = vld [vmem:[%s1508_s9 + $0xb0] sm:$0xff]   ;;  %v1309_v48 = vld [vmem:[%s1508_s9 + $0xb8] sm:$0xff]  }
  0x43   : > { %1184 = vmatpush3.bf16.msra.mxu1 %v1289_v28  ;;  %1145 = vmatprep.subr.bf16.mxu0 %v1290_v29  ;;  %v1310_v49 = vld [vmem:[%s1515_s18] ss:$16 sps:$4 sm:$0xff]   ;;  %v1312_v50 = vld [vmem:[%s1515_s18 + $0x4] ss:$16 sps:$4 sm:$0xff]   ;;  %v1313_v51 = vld [vmem:[%s1515_s18 + $0x8] ss:$16 sps:$4 sm:$0xff]  }
  0x44   : > { %1185 = vmatprep.subr.bf16.mxu1 %v1291_v30  ;;  %v1315_v52 = vld [vmem:[%s1515_s18 + $0xc] ss:$16 sps:$4 sm:$0xff]   ;;  %722 = vmatprep.mubr.bf16.mxu0 %v1312_v50  ;;  %v1316_v53 = vld [vmem:[%s1515_s18 + $0x24] ss:$16 sps:$4 sm:$0xff]   ;;  %v1320_v55 = vld [vmem:[%s1515_s18 + $0x20] ss:$16 sps:$4 sm:$0xff]  }
  0x45   : > { %787 = vmatprep.mubr.bf16.mxu1 %v1315_v52  ;;  %v1318_v54 = vld [vmem:[%s1515_s18 + $0x2c] ss:$16 sps:$4 sm:$0xff]   ;;  %v1321_v56 = vld [vmem:[%s1515_s18 + $0x28] ss:$16 sps:$4 sm:$0xff]   ;;  %v1322_v57 = vld [vmem:[%s1515_s18 + $0x44] ss:$16 sps:$4 sm:$0xff]  }
  0x46   : > { %1146 = vmatpush3.bf16.msra.mxu0 %v1292_v31  ;;  %v1324_v58 = vld [vmem:[%s1515_s18 + $0x4c] ss:$16 sps:$4 sm:$0xff]   ;;  %v1326_v59 = vld [vmem:[%s1515_s18 + $0x40] ss:$16 sps:$4 sm:$0xff]   ;;  %v1327_v60 = vld [vmem:[%s1515_s18 + $0x48] ss:$16 sps:$4 sm:$0xff]  }
  0x47   : > { %1186 = vmatpush3.bf16.msra.mxu1 %v1293_v32  ;;  %1147 = vmatprep.subr.bf16.mxu0 %v1294_v33  ;;  %v1328_v61 = vld [vmem:[%s1515_s18 + $0x64] ss:$16 sps:$4 sm:$0xff]   ;;  %v1330_v62 = vld [vmem:[%s1515_s18 + $0x6c] ss:$16 sps:$4 sm:$0xff]   ;;  %v1332_v63 = vld [vmem:[%s1515_s18 + $0x60] ss:$16 sps:$4 sm:$0xff]  }
  0x48   : > { %1187 = vmatprep.subr.bf16.mxu1 %v1295_v34  ;;  %v1333_v0 = vld [vmem:[%s1515_s18 + $0x68] ss:$16 sps:$4 sm:$0xff]   ;;  %v332_v28 = vld [vmem:[#allocation2 + $0x10] sm:$0xff] }
  0x49   : > { %v333_v33 = vld [vmem:[#allocation2 + $0x18] sm:$0xff] }
  0x4a   : > { %1148 = vmatpush3.bf16.msra.mxu0 %v1296_v35 }
  0x4b   : > { %1188 = vmatpush3.bf16.msra.mxu1 %v1297_v36  ;;  %1149 = vmatprep.subr.bf16.mxu0 %v1298_v37 }
  0x4c   : > { %1189 = vmatprep.subr.bf16.mxu1 %v1299_v38 }
  0x4e   : > { %1150 = vmatpush3.bf16.msra.mxu0 %v1300_v39 }
  0x4f   : > { %1190 = vmatpush3.bf16.msra.mxu1 %v1301_v40  ;;  %1151 = vmatprep.subr.bf16.mxu0 %v1302_v41 }
  0x50   : > { %1191 = vmatprep.subr.bf16.mxu1 %v1303_v42 }
  0x52   : > { %1152 = vmatpush3.bf16.msra.mxu0 %v1304_v43 }
  0x53   : > { %1192 = vmatpush3.bf16.msra.mxu1 %v1305_v44  ;;  %1153 = vmatprep.subr.bf16.mxu0 %v1306_v45 }
  0x54   : > { %1193 = vmatprep.subr.bf16.mxu1 %v1307_v46  ;;  %v334_v46 = vld [vmem:[#allocation2 + $0x20] sm:$0xff] }
  0x56   : > { %1154 = vmatpush3.bf16.msra.mxu0 %v1308_v47 }
  0x57   : > { %1194 = vmatpush3.bf16.msra.mxu1 %v1309_v48 }
  0x59   : > { %723 = vmatmul.mubr.bf16.vlgmr.msra.gmra.mrb[0].mxu0 %v1310_v49 }
  0x5a   : > { %788 = vmatmul.mubr.bf16.vlgmr.msra.gmra.mrb[0].mxu1 %v1313_v51  ;;  %730 = vmatprep.mubr.bf16.mxu0 %v1316_v53  ;;  %v335_v51 = vld [vmem:[#allocation2 + $0x28] sm:$0xff] }
  0x5b   : > { %795 = vmatprep.mubr.bf16.mxu1 %v1318_v54 }
  0x61   : > { %731 = vmatmul.mubr.bf16.gmra.mrb[4].mxu0 %v1320_v55 }
  0x62   : > { %796 = vmatmul.mubr.bf16.gmra.mrb[4].mxu1 %v1321_v56  ;;  %738 = vmatprep.mubr.bf16.mxu0 %v1322_v57 }
  0x63   : > { %803 = vmatprep.mubr.bf16.mxu1 %v1324_v58 }
  0x69   : > { %739 = vmatmul.mubr.bf16.gmra.mrb[8].mxu0 %v1326_v59 }
  0x6a   : > { %804 = vmatmul.mubr.bf16.gmra.mrb[8].mxu1 %v1327_v60  ;;  %746 = vmatprep.mubr.bf16.mxu0 %v1328_v61 }
  0x6b   : > { %811 = vmatprep.mubr.bf16.mxu1 %v1330_v62 }
  0x71   : > { %747 = vmatmul.mubr.bf16.gmra.mrb[12].mxu0 %v1332_v63 }
  0x72   : > { %812 = vmatmul.mubr.bf16.gmra.mrb[12].mxu1 %v1333_v0  ;;  %v336_v0 = vld [vmem:[#allocation2 + $0x30] sm:$0xff] }
 0x12c   : > { %v1155_v1 = vpop.f32.mrb[0].mxu0 }
 0x12d   : > { %v1195_v2 = vpop.f32.mrb[0].mxu1  ;;  %v1156_v3 = vpop.f32.mrb[1].mxu0 }
 0x12e   : > { %v1157_v4 = vadd.f32 %v1156_v3, %v1155_v1  ;;  %v1196_v5 = vpop.f32.mrb[1].mxu1  ;;  %v1158_v6 = vpop.f32.mrb[2].mxu0 }
 0x12f   : > { %v1197_v7 = vadd.f32 %v1196_v5, %v1195_v2  ;;  %v1198_v8 = vpop.f32.mrb[2].mxu1  ;;  %v1159_v9 = vpop.f32.mrb[3].mxu0  ;;  %v337_v5 = vld [vmem:[#allocation2 + $0x38] sm:$0xff] }
 0x130   : > { %v1160_v11 = vadd.f32 %v1159_v9, %v1158_v6  ;;  %v1199_v12 = vpop.f32.mrb[3].mxu1 }
 0x131   : > { %v790_v13 = vadd.f32 %v1197_v7, %v1157_v4  ;;  %v1200_v14 = vadd.f32 %v1199_v12, %v1198_v8  ;;  %v889_v12 = vlaneseq (!%p1095_p13) }
 0x133   : > { %v820_v16 = vadd.f32 %v790_v13, %v330_v10  ;;  %v793_v17 = vadd.f32 %v1200_v14, %v1160_v11  ;;  %v1096_v11 = vld [vmem:[%s1611_s2] ss:$0 sm:$0xff] (!%p1095_p13) }
 0x134   : > { %v1161_v18 = vpop.f32.mrb[4].mxu0 }
 0x135   : > { %828 = vst [vmem:[#allocation2] sm:$0xff] %v820_v16  ;;  %v821_v19 = vadd.f32 %v793_v17, %v331_v15  ;;  %v1201_v20 = vpop.f32.mrb[4].mxu1  ;;  %v1162_v21 = vpop.f32.mrb[5].mxu0  ;;  %v1097_v15 = vld [vmem:[%s1612_s3] ss:$0 sm:$0xff] (!%p1095_p13) }
 0x136   : > { %v1163_v22 = vadd.f32 %v1162_v21, %v1161_v18  ;;  %v1202_v23 = vpop.f32.mrb[5].mxu1  ;;  %v1164_v24 = vpop.f32.mrb[6].mxu0  ;;  %v878_v16 = vld [vmem:[%s1613_s4] sm:$0x1] (!%p1095_p13)  ;;  %v890_v18 = vshrl.u32 (!%p1095_p13), %v889_v12, 7 }
 0x137   : > { %829 = vst [vmem:[#allocation2 + $0x8] sm:$0xff] %v821_v19  ;;  %v1203_v25 = vadd.f32 %v1202_v23, %v1201_v20  ;;  %v1204_v26 = vpop.f32.mrb[6].mxu1  ;;  %v1165_v27 = vpop.f32.mrb[7].mxu0  ;;  %vm879_vm0 = vcmp.ne.f32.partialorder (!%p1095_p13), %v878_v16, 0.0 }
 0x138   : > { %v1166_v29 = vadd.f32 %v1165_v27, %v1164_v24  ;;  %v1205_v30 = vpop.f32.mrb[7].mxu1 }
 0x139   : > { %v798_v31 = vadd.f32 %v1203_v25, %v1163_v22  ;;  %v1206_v32 = vadd.f32 %v1205_v30, %v1204_v26  ;;  %v1391_v25 = vmov (!%p1095_p13), 0  }
 0x13a   : > { %v888_v26 = vsel (!%p1095_p13), %vm879_vm0, 1, %v1391_v25 }
 0x13b   : > { %v822_v34 = vadd.f32 %v798_v31, %v332_v28  ;;  %v801_v35 = vadd.f32 %v1206_v32, %v1166_v29  ;;  %v891_v29 = vsub.s32 (!%p1095_p13), 0, %v890_v18 }
 0x13c   : > { %v1167_v36 = vpop.f32.mrb[8].mxu0  ;;  %v840_v9 = vld [vmem:[#allocation2] sm:$0xff] (!%p1095_p13) }
 0x13d   : > { %830 = vst [vmem:[#allocation2 + $0x10] sm:$0xff] %v822_v34  ;;  %v823_v37 = vadd.f32 %v801_v35, %v333_v33  ;;  %v1207_v38 = vpop.f32.mrb[8].mxu1  ;;  %v1168_v39 = vpop.f32.mrb[9].mxu0  ;;  %v855_v13 = vmul.f32 (!%p1095_p13), %v1096_v11, %v840_v9 }
 0x13e   : > { %v1169_v40 = vadd.f32 %v1168_v39, %v1167_v36  ;;  %v1208_v41 = vpop.f32.mrb[9].mxu1  ;;  %v1170_v42 = vpop.f32.mrb[10].mxu0  ;;  %v841_v10 = vld [vmem:[#allocation2 + $0x8] sm:$0xff] (!%p1095_p13) }
 0x13f   : > { %831 = vst [vmem:[#allocation2 + $0x18] sm:$0xff] %v823_v37  ;;  %v1209_v43 = vadd.f32 %v1208_v41, %v1207_v38  ;;  %v1210_v44 = vpop.f32.mrb[10].mxu1  ;;  %v1171_v45 = vpop.f32.mrb[11].mxu0  ;;  %v856_v14 = vmul.f32 (!%p1095_p13), %v1096_v11, %v841_v10  ;;  %v870_v23 = vadd.f32 (!%p1095_p13), %v1097_v15, %v855_v13  ;;  %v892_v38 = vrot.slane (!%p1095_p13), %v888_v26, %v891_v29 }
 0x140   : > { %v1172_v47 = vadd.f32 %v1171_v45, %v1170_v42  ;;  %v1211_v48 = vpop.f32.mrb[11].mxu1 }
 0x141   : > { %v806_v49 = vadd.f32 %v1209_v43, %v1169_v40  ;;  %v1212_v50 = vadd.f32 %v1211_v48, %v1210_v44  ;;  %v871_v24 = vadd.f32 (!%p1095_p13), %v1097_v15, %v856_v14  ;;  %v880_v34 = vmax.f32 (!%p1095_p13), %v870_v23, 0.0 }
 0x142   : > { %vm893_vm1 = vcmp.eq.s32.totalorder (!%p1095_p13), %v892_v38, 1 }
 0x143   : > { %v824_v52 = vadd.f32 %v806_v49, %v334_v46  ;;  %v809_v53 = vadd.f32 %v1212_v50, %v1172_v47  ;;  %v881_v35 = vmax.f32 (!%p1095_p13), %v871_v24, 0.0  ;;  %v894_v47 = vsel (!%p1095_p13), %vm893_vm1, %v880_v34, %v870_v23 }
 0x144   : > { %v1173_v54 = vpop.f32.mrb[12].mxu0  ;;  %v842_v17 = vld [vmem:[#allocation2 + $0x10] sm:$0xff] (!%p1095_p13) }
 0x145   : > { %832 = vst [vmem:[#allocation2 + $0x20] sm:$0xff] %v824_v52  ;;  %v825_v55 = vadd.f32 %v809_v53, %v335_v51  ;;  %v1213_v56 = vpop.f32.mrb[12].mxu1  ;;  %v1174_v57 = vpop.f32.mrb[13].mxu0  ;;  %v857_v20 = vmul.f32 (!%p1095_p13), %v1096_v11, %v842_v17  ;;  %v895_v48 = vsel (!%p1095_p13), %vm893_vm1, %v881_v35, %v871_v24 }
 0x146   : > { %v1175_v58 = vadd.f32 %v1174_v57, %v1173_v54  ;;  %v1214_v59 = vpop.f32.mrb[13].mxu1  ;;  %v1176_v60 = vpop.f32.mrb[14].mxu0  ;;  %v843_v19 = vld [vmem:[#allocation2 + $0x18] sm:$0xff] (!%p1095_p13)  ;;  %v1119_v51 = vpack.c.bf16 (!%p1095_p13), %v895_v48, %v894_v47 }
 0x147   : > { %833 = vst [vmem:[#allocation2 + $0x28] sm:$0xff] %v825_v55  ;;  %v1215_v61 = vadd.f32 %v1214_v59, %v1213_v56  ;;  %v1216_v62 = vpop.f32.mrb[14].mxu1  ;;  %v1177_v63 = vpop.f32.mrb[15].mxu0  ;;  %v858_v27 = vmul.f32 (!%p1095_p13), %v1096_v11, %v843_v19  ;;  %v872_v30 = vadd.f32 (!%p1095_p13), %v1097_v15, %v857_v20 }
 0x148   : > { %v1178_v1 = vadd.f32 %v1177_v63, %v1176_v60  ;;  %v1217_v2 = vpop.f32.mrb[15].mxu1  ;;  %1120 = vst [vmem:[%s1513_s13] sm:$0xff] (!%p1095_p13), %v1119_v51  }
 0x149   : > { %v814_v3 = vadd.f32 %v1215_v61, %v1175_v58  ;;  %v1218_v4 = vadd.f32 %v1217_v2, %v1216_v62  ;;  %839 = sbr.rel (%p1095_p13) target bundleno = 353 (0x161), region = 71  ;;  %v873_v36 = vadd.f32 (!%p1095_p13), %v1097_v15, %v858_v27  ;;  %v882_v39 = vmax.f32 (!%p1095_p13), %v872_v30, 0.0 }
 0x14b   : > { %v826_v6 = vadd.f32 %v814_v3, %v336_v0  ;;  %v817_v7 = vadd.f32 %v1218_v4, %v1178_v1  ;;  %v883_v42 = vmax.f32 (!%p1095_p13), %v873_v36, 0.0  ;;  %v896_v49 = vsel (!%p1095_p13), %vm893_vm1, %v882_v39, %v872_v30 }
 0x14c   : > { %v844_v21 = vld [vmem:[#allocation2 + $0x20] sm:$0xff] (!%p1095_p13) }
 0x14d   : > { %834 = vst [vmem:[#allocation2 + $0x30] sm:$0xff] %v826_v6  ;;  %v827_v8 = vadd.f32 %v817_v7, %v337_v5  ;;  %v859_v31 = vmul.f32 (!%p1095_p13), %v1096_v11, %v844_v21  ;;  %v897_v50 = vsel (!%p1095_p13), %vm893_vm1, %v883_v42, %v873_v36 }
 0x14e   : > { %v845_v22 = vld [vmem:[#allocation2 + $0x28] sm:$0xff] (!%p1095_p13)  ;;  %v1124_v52 = vpack.c.bf16 (!%p1095_p13), %v897_v50, %v896_v49 }
 0x14f   : > { %835 = vst [vmem:[#allocation2 + $0x38] sm:$0xff] %v827_v8  ;;  %v860_v32 = vmul.f32 (!%p1095_p13), %v1096_v11, %v845_v22  ;;  %v874_v40 = vadd.f32 (!%p1095_p13), %v1097_v15, %v859_v31 }
 0x150   : > { %1136 = vst [vmem:[%s1513_s13 + $0x8] sm:$0xff] %v1124_v52  }
 0x151   : > { %v875_v41 = vadd.f32 %v1097_v15, %v860_v32  ;;  %v884_v45 = vmax.f32 %v874_v40, 0.0 }
 0x153   : > { %v885_v46 = vmax.f32 %v875_v41, 0.0  ;;  %v898_v53 = vsel %vm893_vm1, %v884_v45, %v874_v40 }
 0x154   : > { %v846_v28 = vld [vmem:[#allocation2 + $0x30] sm:$0xff] }
 0x155   : > { %v861_v37 = vmul.f32 %v1096_v11, %v846_v28  ;;  %v899_v54 = vsel %vm893_vm1, %v885_v46, %v875_v41 }
 0x156   : > { %v847_v33 = vld [vmem:[#allocation2 + $0x38] sm:$0xff]  ;;  %v1129_v55 = vpack.c.bf16 %v899_v54, %v898_v53 }
 0x157   : > { %v862_v43 = vmul.f32 %v1096_v11, %v847_v33  ;;  %v876_v44 = vadd.f32 %v1097_v15, %v861_v37 }
 0x158   : > { %1137 = vst [vmem:[%s1513_s13 + $0x10] sm:$0xff] %v1129_v55  }
 0x159   : > { %v877_v56 = vadd.f32 %v1097_v15, %v862_v43  ;;  %v886_v57 = vmax.f32 %v876_v44, 0.0 }
 0x15b   : > { %v887_v58 = vmax.f32 %v877_v56, 0.0  ;;  %v900_v59 = vsel %vm893_vm1, %v886_v57, %v876_v44 }
 0x15d   : > { %v901_v60 = vsel %vm893_vm1, %v887_v58, %v877_v56 }
 0x15e   : > { %v1134_v61 = vpack.c.bf16 %v901_v60, %v900_v59 }
 0x160   : > { %1138 = vst [vmem:[%s1513_s13 + $0x18] sm:$0xff] %v1134_v61  }
 0x161 PF: > { %s15_s24 = sadd.s32 1, %s1388_s24   ;;  %s1615_s18 = smov %s1368_s19 }
 0x162   : > { %p12_p0 = scmp.ge.s32.totalorder %s15_s24, 8   ;;  %s1616_s19 = smov %s1473_s6 }
 0x163   : > { %s1617_s20 = smov %s1380_s22  ;;  %s1618_s21 = smov %s1384_s23 }
 0x164   : > { %s1619_s22 = smov %s1622_s25  ;;  %s1620_s23 = smov %s1626_s26 }
 0x165   :  { %14 = sbr.rel (!%p12_p0) target bundleno = 4 (0x4), region = 109 }

// kernel: _lambda_.10
= control target key start
LH: loop header
LB: loop body
LE: loop exit
PB: predicated region body
PF: predicated region fallthrough
CT: control target
= control target key end

     0   :  { %s1422_s18 = smov 0   ;;  %s1424_s19 = smov 0   ;;  %s1609_s0 = inlined_call_operand.vmem [shape: bf16[128,2048], index: 0, kind: input, shape index: {}]   ;;  %s1610_s1 = inlined_call_operand.vmem [shape: bf16[2048,128], index: 1, kind: input, shape index: {}]   ;;  %s1611_s2 = inlined_call_operand.vmem [shape: f32[1,128], index: 2, kind: input, shape index: {}]   ;;  %s1612_s3 = inlined_call_operand.vmem [shape: f32[1,128], index: 3, kind: input, shape index: {}]   ;;  %s1613_s4 = inlined_call_operand.vmem [shape: f32[1,128], index: 4, kind: input, shape index: {}]   ;;  %s1614_s5 = inlined_call_operand.vmem [shape: bf16[128,128], index: 5, kind: output, shape index: {}]  }
   0x1   :  { %s1426_s20 = smov 0   ;;  %s1428_s21 = smov 0  }
   0x2   :  { %s1430_s22 = smov 0   ;;  %s1432_s23 = smov 0  }
   0x3   :  { %s1434_s24 = smov 0  }
   0x4 LB: > { %s24_s25 = sadd.s32 1, %s1380_s22  ;;  %s27_s26 = sadd.s32 1, %s1384_s23  ;;  %s1388_s24 = sphi %s1434_s24, %s15_s24   ;;  %s1384_s23 = sphi %s1432_s23, %s1620_s23   ;;  %s1380_s22 = sphi %s1430_s22, %s1619_s22   ;;  %s1376_s21 = sphi %s1428_s21, %s1618_s21   ;;  %s1372_s20 = sphi %s1426_s20, %s1617_s20   ;;  %s1368_s19 = sphi %s1424_s19, %s1616_s19   ;;  %s1364_s18 = sphi %s1422_s18, %s1615_s18  }
   0x5   : > { %p25_p0 = scmp.ge.s32.totalorder %s24_s25, 4  ;;  %p43_p1 = scmp.ne.s32.totalorder %s1368_s19, %s1364_s18 }
   0x6   : > { %p44_p2 = scmp.eq.s32.totalorder %s1388_s24, 0  ;;  %s36_s30 = sadd.s32 1, %s1368_s19 }
   0x7   : > { %s1622_s25 = smov (%p25_p0, %s24_s25), 0  ;;  %s1624_s26 = smov (!%p25_p0, %s27_s26), %s1384_s23 }
   0x8   : > { %p45_p3 = por %p44_p2, %p43_p1  ;;  %p29_p4 = scmp.ge.s32.totalorder %s1624_s26, 2 }
   0x9   : > { %s32_s27 = ssub.s32 %s1380_s22, %s1622_s25  ;;  %p1034_p6 = scmp.ge.s32.totalorder %s1388_s24, 8 }
   0xa   : > { %s1626_s26 = smov (%p29_p4, %s1624_s26), 0 }
   0xb   : > { %s31_s28 = ssub.s32 %s1384_s23, %s1626_s26  ;;  %193 = sbr.rel (%p1034_p6) target bundleno = 33 (0x21), region = 28 }
   0xc   : > { %s33_s29 = sor.u32 %s32_s27, %s31_s28 }
   0xd   : > { %p34_p5 = scmp.eq.s32.totalorder %s33_s29, 0 }
   0xf   : > { %s1473_s6 = scalar_select %p34_p5, %s1368_s19, %s36_s30  }
  0x12   : > { %196 = sbr.rel (!%p45_p3) target bundleno = 33 (0x21), region = 32  ;;  %s198_s7 = sand.u32 (%p45_p3), 1, %s1368_s19  }
  0x13   : > { %s1037_s8 = sshll.u32 (%p45_p3), %s1380_s22, 2  ;;  %s1035_s9 = sshll.u32 (%p45_p3), %s198_s7, 7 }
  0x14   : > { %s1108_s10 = sshll.u32 (%p45_p3), %s1384_s23, 7  ;;  %s200_s16 = scalar_lea.vmem (%p45_p3), [#allocation3], %s1035_s9 }
  0x15   : > { %s204_s11 = sadd.s32 (%p45_p3), %s1108_s10, %s1037_s8 }
  0x16   : > { %s1039_s12 = sshll.u32 (%p45_p3), %s204_s11, 2 }
  0x17   : > { %s1482_s15 = scalar_lea.vmem (%p45_p3), %s1609_s0, %s1039_s12 }
  0x18   : > { %v219_v0 = vld [vmem:[%s1482_s15] sm:$0xff] (%p45_p3)  ;;  %v221_v1 = vld [vmem:[%s1482_s15 + $0x8] sm:$0xff] (%p45_p3) }
  0x19   : > { %v223_v2 = vld [vmem:[%s1482_s15 + $0x40] sm:$0xff]  ;;  %220 = vst [vmem:[%s200_s16] sm:$0xff] %v219_v0  ;;  %222 = vst [vmem:[%s200_s16 + $0x8] sm:$0xff] %v221_v1  ;;  %v225_v3 = vld [vmem:[%s1482_s15 + $0x48] sm:$0xff] }
  0x1a   : > { %224 = vst [vmem:[%s200_s16 + $0x10] sm:$0xff] %v223_v2  ;;  %v227_v4 = vld [vmem:[%s1482_s15 + $0x80] sm:$0xff]  ;;  %v229_v5 = vld [vmem:[%s1482_s15 + $0x88] sm:$0xff]  ;;  %226 = vst [vmem:[%s200_s16 + $0x18] sm:$0xff] %v225_v3 }
  0x1b   : > { %228 = vst [vmem:[%s200_s16 + $0x20] sm:$0xff] %v227_v4  ;;  %230 = vst [vmem:[%s200_s16 + $0x28] sm:$0xff] %v229_v5  ;;  %v231_v6 = vld [vmem:[%s1482_s15 + $0xc0] sm:$0xff]  ;;  %v233_v7 = vld [vmem:[%s1482_s15 + $0xc8] sm:$0xff] }
  0x1c   : > { %v235_v8 = vld [vmem:[%s1482_s15 + $0x100] sm:$0xff]  ;;  %232 = vst [vmem:[%s200_s16 + $0x30] sm:$0xff] %v231_v6  ;;  %234 = vst [vmem:[%s200_s16 + $0x38] sm:$0xff] %v233_v7  ;;  %v237_v9 = vld [vmem:[%s1482_s15 + $0x108] sm:$0xff] }
  0x1d   : > { %236 = vst [vmem:[%s200_s16 + $0x40] sm:$0xff] %v235_v8  ;;  %v239_v10 = vld [vmem:[%s1482_s15 + $0x140] sm:$0xff]  ;;  %v241_v11 = vld [vmem:[%s1482_s15 + $0x148] sm:$0xff]  ;;  %238 = vst [vmem:[%s200_s16 + $0x48] sm:$0xff] %v237_v9 }
  0x1e   : > { %240 = vst [vmem:[%s200_s16 + $0x50] sm:$0xff] %v239_v10  ;;  %242 = vst [vmem:[%s200_s16 + $0x58] sm:$0xff] %v241_v11  ;;  %v243_v12 = vld [vmem:[%s1482_s15 + $0x180] sm:$0xff]  ;;  %v245_v13 = vld [vmem:[%s1482_s15 + $0x188] sm:$0xff] }
  0x1f   : > { %v247_v14 = vld [vmem:[%s1482_s15 + $0x1c0] sm:$0xff]  ;;  %244 = vst [vmem:[%s200_s16 + $0x60] sm:$0xff] %v243_v12  ;;  %246 = vst [vmem:[%s200_s16 + $0x68] sm:$0xff] %v245_v13  ;;  %v249_v15 = vld [vmem:[%s1482_s15 + $0x1c8] sm:$0xff] }
  0x20   : > { %248 = vst [vmem:[%s200_s16 + $0x70] sm:$0xff] %v247_v14  ;;  %250 = vst [vmem:[%s200_s16 + $0x78] sm:$0xff] %v249_v15 }
  0x21 PF: > { %p1040_p7 = scmp.ge.s32.totalorder %s1388_s24, 1  ;;  %p264_p8 = scmp.lt.s32.totalorder %s1388_s24, 9 }
  0x23   : > { %p265_p9 = pnand %p1040_p7, %p264_p8 }
  0x24   : > { %s271_s17 = sand.u32 (!%p265_p9), 1, %s1364_s18   ;;  %s1042_s27 = sshll.u32 (!%p265_p9), %s1372_s20, 6 }
  0x25   : > { %268 = sbr.rel (%p265_p9) target bundleno = 352 (0x160), region = 59  ;;  %s1041_s28 = sshll.u32 (!%p265_p9), %s271_s17, 7 }
  0x26   : > { %p306_p10 = scmp.lt.s32.totalorder (!%p265_p9), %s1042_s27, 255  ;;  %s1044_s29 = sshll.u32 (!%p265_p9), %s1376_s21, 3 }
  0x27   : > { %p312_p11 = scmp.lt.s32.totalorder (!%p265_p9), %s1044_s29, 15  ;;  %s1515_s18 = scalar_lea.vmem (!%p265_p9), [#allocation3], %s1041_s28 }
  0x28   : > { %p1046_p12 = scmp.ne.s32.totalorder (!%p265_p9), %s1372_s20, 0 }
  0x2c   : > { %s1628_s27 = smov (!%p306_p10, %s1042_s27), 255  ;;  %s1630_s29 = smov (!%p312_p11, %s1044_s29), 15 }
  0x2d   : > { %s1043_s30 = sshll.u32 %s1628_s27, 2  ;;  %s1045_s10 = sshll.u32 %s1630_s29, 2  ;;  %v1390_v16 = vmov (!%p1046_p12), 0.0  }
  0x2e   : > { %s1508_s9 = scalar_lea.vmem %s1610_s1, %s1043_s30  ;;  %s1513_s13 = scalar_lea.vmem %s1614_s5, %s1045_s10  ;;  %322 = vst [vmem:[#allocation2] sm:$0xff] (!%p1046_p12), %v1390_v16  ;;  %323 = vst [vmem:[#allocation2 + $0x8] sm:$0xff] (!%p1046_p12), %v1390_v16 }
  0x2f   : > { %321 = sbr.rel (%p1046_p12) target bundleno = 54 (0x36), region = 67  ;;  %324 = vst [vmem:[#allocation2 + $0x10] sm:$0xff] (!%p1046_p12), %v1390_v16  ;;  %325 = vst [vmem:[#allocation2 + $0x18] sm:$0xff] (!%p1046_p12), %v1390_v16 }
  0x30   : > { %326 = vst [vmem:[#allocation2 + $0x20] sm:$0xff] (!%p1046_p12), %v1390_v16  ;;  %327 = vst [vmem:[#allocation2 + $0x28] sm:$0xff] (!%p1046_p12), %v1390_v16 }
  0x31   : > { %328 = vst [vmem:[#allocation2 + $0x30] sm:$0xff] (!%p1046_p12), %v1390_v16  ;;  %329 = vst [vmem:[#allocation2 + $0x38] sm:$0xff] (!%p1046_p12), %v1390_v16 }
  0x36 PF: > { %v1278_v17 = vld [vmem:[%s1508_s9 + $0x40] sm:$0xff]   ;;  %v1282_v21 = vld [vmem:[%s1508_s9 + $0x48] sm:$0xff]   ;;  %v1286_v25 = vld [vmem:[%s1508_s9 + $0x50] sm:$0xff]   ;;  %p1095_p13 = scmp.ne.s32.totalorder %s1372_s20, 3 }
  0x37   : > { %v1279_v18 = vld [vmem:[%s1508_s9 + $0xc0] sm:$0xff]   ;;  %1140 = vmatprep.subr.bf16.mxu0 %v1278_v17  ;;  %v1283_v22 = vld [vmem:[%s1508_s9 + $0xc8] sm:$0xff]   ;;  %v1287_v26 = vld [vmem:[%s1508_s9 + $0xd0] sm:$0xff]  }
  0x38   : > { %v1280_v19 = vld [vmem:[%s1508_s9] sm:$0xff]   ;;  %1180 = vmatprep.subr.bf16.mxu1 %v1279_v18  ;;  %v1284_v23 = vld [vmem:[%s1508_s9 + $0x8] sm:$0xff]   ;;  %v1288_v27 = vld [vmem:[%s1508_s9 + $0x10] sm:$0xff]  }
  0x39   : > { %v1281_v20 = vld [vmem:[%s1508_s9 + $0x80] sm:$0xff]   ;;  %1141 = vmatpush3.bf16.msra.mxu0 %v1280_v19  ;;  %v1285_v24 = vld [vmem:[%s1508_s9 + $0x88] sm:$0xff]   ;;  %v1289_v28 = vld [vmem:[%s1508_s9 + $0x90] sm:$0xff]  }
  0x3a   : > { %1181 = vmatpush3.bf16.msra.mxu1 %v1281_v20  ;;  %1142 = vmatprep.subr.bf16.mxu0 %v1282_v21  ;;  %v1290_v29 = vld [vmem:[%s1508_s9 + $0x58] sm:$0xff]   ;;  %v1294_v33 = vld [vmem:[%s1508_s9 + $0x60] sm:$0xff]   ;;  %v1298_v37 = vld [vmem:[%s1508_s9 + $0x68] sm:$0xff]  }
  0x3b   : > { %1182 = vmatprep.subr.bf16.mxu1 %v1283_v22  ;;  %v1291_v30 = vld [vmem:[%s1508_s9 + $0xd8] sm:$0xff]   ;;  %v1295_v34 = vld [vmem:[%s1508_s9 + $0xe0] sm:$0xff]   ;;  %v1299_v38 = vld [vmem:[%s1508_s9 + $0xe8] sm:$0xff]  }
  0x3c   : > { %v1292_v31 = vld [vmem:[%s1508_s9 + $0x18] sm:$0xff]   ;;  %v1296_v35 = vld [vmem:[%s1508_s9 + $0x20] sm:$0xff]   ;;  %v1300_v39 = vld [vmem:[%s1508_s9 + $0x28] sm:$0xff]  }
  0x3d   : > { %1143 = vmatpush3.bf16.msra.mxu0 %v1284_v23  ;;  %v1293_v32 = vld [vmem:[%s1508_s9 + $0x98] sm:$0xff]   ;;  %v1297_v36 = vld [vmem:[%s1508_s9 + $0xa0] sm:$0xff]   ;;  %v1301_v40 = vld [vmem:[%s1508_s9 + $0xa8] sm:$0xff]  }
  0x3e   : > { %1183 = vmatpush3.bf16.msra.mxu1 %v1285_v24  ;;  %1144 = vmatprep.subr.bf16.mxu0 %v1286_v25  ;;  %v1302_v41 = vld [vmem:[%s1508_s9 + $0x70] sm:$0xff]   ;;  %v1306_v45 = vld [vmem:[%s1508_s9 + $0x78] sm:$0xff]   ;;  %v330_v10 = vld [vmem:[#allocation2] sm:$0xff] }
  0x3f   : > { %1184 = vmatprep.subr.bf16.mxu1 %v1287_v26  ;;  %v1303_v42 = vld [vmem:[%s1508_s9 + $0xf0] sm:$0xff]   ;;  %v1307_v46 = vld [vmem:[%s1508_s9 + $0xf8] sm:$0xff]   ;;  %v331_v15 = vld [vmem:[#allocation2 + $0x8] sm:$0xff] }
  0x40   : > { %v1304_v43 = vld [vmem:[%s1508_s9 + $0x30] sm:$0xff]   ;;  %v1308_v47 = vld [vmem:[%s1508_s9 + $0x38] sm:$0xff]  }
  0x41   : > { %1145 = vmatpush3.bf16.msra.mxu0 %v1288_v27  ;;  %v1305_v44 = vld [vmem:[%s1508_s9 + $0xb0] sm:$0xff]   ;;  %v1309_v48 = vld [vmem:[%s1508_s9 + $0xb8] sm:$0xff]  }
  0x42   : > { %1185 = vmatpush3.bf16.msra.mxu1 %v1289_v28  ;;  %1146 = vmatprep.subr.bf16.mxu0 %v1290_v29  ;;  %v1310_v49 = vld [vmem:[%s1515_s18] ss:$16 sps:$4 sm:$0xff]   ;;  %v1312_v50 = vld [vmem:[%s1515_s18 + $0x4] ss:$16 sps:$4 sm:$0xff]   ;;  %v1313_v51 = vld [vmem:[%s1515_s18 + $0x8] ss:$16 sps:$4 sm:$0xff]  }
  0x43   : > { %1186 = vmatprep.subr.bf16.mxu1 %v1291_v30  ;;  %v1315_v52 = vld [vmem:[%s1515_s18 + $0xc] ss:$16 sps:$4 sm:$0xff]   ;;  %722 = vmatprep.mubr.bf16.mxu0 %v1312_v50  ;;  %v1316_v53 = vld [vmem:[%s1515_s18 + $0x24] ss:$16 sps:$4 sm:$0xff]   ;;  %v1320_v55 = vld [vmem:[%s1515_s18 + $0x20] ss:$16 sps:$4 sm:$0xff]  }
  0x44   : > { %787 = vmatprep.mubr.bf16.mxu1 %v1315_v52  ;;  %v1318_v54 = vld [vmem:[%s1515_s18 + $0x2c] ss:$16 sps:$4 sm:$0xff]   ;;  %v1321_v56 = vld [vmem:[%s1515_s18 + $0x28] ss:$16 sps:$4 sm:$0xff]   ;;  %v1322_v57 = vld [vmem:[%s1515_s18 + $0x44] ss:$16 sps:$4 sm:$0xff]  }
  0x45   : > { %1147 = vmatpush3.bf16.msra.mxu0 %v1292_v31  ;;  %v1324_v58 = vld [vmem:[%s1515_s18 + $0x4c] ss:$16 sps:$4 sm:$0xff]   ;;  %v1326_v59 = vld [vmem:[%s1515_s18 + $0x40] ss:$16 sps:$4 sm:$0xff]   ;;  %v1327_v60 = vld [vmem:[%s1515_s18 + $0x48] ss:$16 sps:$4 sm:$0xff]  }
  0x46   : > { %1187 = vmatpush3.bf16.msra.mxu1 %v1293_v32  ;;  %1148 = vmatprep.subr.bf16.mxu0 %v1294_v33  ;;  %v1328_v61 = vld [vmem:[%s1515_s18 + $0x64] ss:$16 sps:$4 sm:$0xff]   ;;  %v1330_v62 = vld [vmem:[%s1515_s18 + $0x6c] ss:$16 sps:$4 sm:$0xff]   ;;  %v1332_v63 = vld [vmem:[%s1515_s18 + $0x60] ss:$16 sps:$4 sm:$0xff]  }
  0x47   : > { %1188 = vmatprep.subr.bf16.mxu1 %v1295_v34  ;;  %v1333_v0 = vld [vmem:[%s1515_s18 + $0x68] ss:$16 sps:$4 sm:$0xff]   ;;  %v332_v28 = vld [vmem:[#allocation2 + $0x10] sm:$0xff] }
  0x48   : > { %v333_v33 = vld [vmem:[#allocation2 + $0x18] sm:$0xff] }
  0x49   : > { %1149 = vmatpush3.bf16.msra.mxu0 %v1296_v35 }
  0x4a   : > { %1189 = vmatpush3.bf16.msra.mxu1 %v1297_v36  ;;  %1150 = vmatprep.subr.bf16.mxu0 %v1298_v37 }
  0x4b   : > { %1190 = vmatprep.subr.bf16.mxu1 %v1299_v38 }
  0x4d   : > { %1151 = vmatpush3.bf16.msra.mxu0 %v1300_v39 }
  0x4e   : > { %1191 = vmatpush3.bf16.msra.mxu1 %v1301_v40  ;;  %1152 = vmatprep.subr.bf16.mxu0 %v1302_v41 }
  0x4f   : > { %1192 = vmatprep.subr.bf16.mxu1 %v1303_v42 }
  0x51   : > { %1153 = vmatpush3.bf16.msra.mxu0 %v1304_v43 }
  0x52   : > { %1193 = vmatpush3.bf16.msra.mxu1 %v1305_v44  ;;  %1154 = vmatprep.subr.bf16.mxu0 %v1306_v45 }
  0x53   : > { %1194 = vmatprep.subr.bf16.mxu1 %v1307_v46  ;;  %v334_v46 = vld [vmem:[#allocation2 + $0x20] sm:$0xff] }
  0x55   : > { %1155 = vmatpush3.bf16.msra.mxu0 %v1308_v47 }
  0x56   : > { %1195 = vmatpush3.bf16.msra.mxu1 %v1309_v48 }
  0x58   : > { %723 = vmatmul.mubr.bf16.vlgmr.msra.gmra.mrb[0].mxu0 %v1310_v49 }
  0x59   : > { %788 = vmatmul.mubr.bf16.vlgmr.msra.gmra.mrb[0].mxu1 %v1313_v51  ;;  %730 = vmatprep.mubr.bf16.mxu0 %v1316_v53  ;;  %v335_v51 = vld [vmem:[#allocation2 + $0x28] sm:$0xff] }
  0x5a   : > { %795 = vmatprep.mubr.bf16.mxu1 %v1318_v54 }
  0x60   : > { %731 = vmatmul.mubr.bf16.gmra.mrb[4].mxu0 %v1320_v55 }
  0x61   : > { %796 = vmatmul.mubr.bf16.gmra.mrb[4].mxu1 %v1321_v56  ;;  %738 = vmatprep.mubr.bf16.mxu0 %v1322_v57 }
  0x62   : > { %803 = vmatprep.mubr.bf16.mxu1 %v1324_v58 }
  0x68   : > { %739 = vmatmul.mubr.bf16.gmra.mrb[8].mxu0 %v1326_v59 }
  0x69   : > { %804 = vmatmul.mubr.bf16.gmra.mrb[8].mxu1 %v1327_v60  ;;  %746 = vmatprep.mubr.bf16.mxu0 %v1328_v61 }
  0x6a   : > { %811 = vmatprep.mubr.bf16.mxu1 %v1330_v62 }
  0x70   : > { %747 = vmatmul.mubr.bf16.gmra.mrb[12].mxu0 %v1332_v63 }
  0x71   : > { %812 = vmatmul.mubr.bf16.gmra.mrb[12].mxu1 %v1333_v0  ;;  %v336_v0 = vld [vmem:[#allocation2 + $0x30] sm:$0xff] }
 0x12b   : > { %v1156_v1 = vpop.f32.mrb[0].mxu0 }
 0x12c   : > { %v1196_v2 = vpop.f32.mrb[0].mxu1  ;;  %v1157_v3 = vpop.f32.mrb[1].mxu0 }
 0x12d   : > { %v1158_v4 = vadd.f32 %v1157_v3, %v1156_v1  ;;  %v1197_v5 = vpop.f32.mrb[1].mxu1  ;;  %v1159_v6 = vpop.f32.mrb[2].mxu0 }
 0x12e   : > { %v1198_v7 = vadd.f32 %v1197_v5, %v1196_v2  ;;  %v1199_v8 = vpop.f32.mrb[2].mxu1  ;;  %v1160_v9 = vpop.f32.mrb[3].mxu0  ;;  %v337_v5 = vld [vmem:[#allocation2 + $0x38] sm:$0xff] }
 0x12f   : > { %v1161_v11 = vadd.f32 %v1160_v9, %v1159_v6  ;;  %v1200_v12 = vpop.f32.mrb[3].mxu1 }
 0x130   : > { %v790_v13 = vadd.f32 %v1198_v7, %v1158_v4  ;;  %v1201_v14 = vadd.f32 %v1200_v12, %v1199_v8  ;;  %v889_v12 = vlaneseq (!%p1095_p13) }
 0x132   : > { %v820_v16 = vadd.f32 %v790_v13, %v330_v10  ;;  %v793_v17 = vadd.f32 %v1201_v14, %v1161_v11  ;;  %v1096_v11 = vld [vmem:[%s1611_s2] ss:$0 sm:$0xff] (!%p1095_p13) }
 0x133   : > { %v1162_v18 = vpop.f32.mrb[4].mxu0 }
 0x134   : > { %828 = vst [vmem:[#allocation2] sm:$0xff] %v820_v16  ;;  %v821_v19 = vadd.f32 %v793_v17, %v331_v15  ;;  %v1202_v20 = vpop.f32.mrb[4].mxu1  ;;  %v1163_v21 = vpop.f32.mrb[5].mxu0  ;;  %v1097_v15 = vld [vmem:[%s1612_s3] ss:$0 sm:$0xff] (!%p1095_p13) }
 0x135   : > { %v1164_v22 = vadd.f32 %v1163_v21, %v1162_v18  ;;  %v1203_v23 = vpop.f32.mrb[5].mxu1  ;;  %v1165_v24 = vpop.f32.mrb[6].mxu0  ;;  %v878_v16 = vld [vmem:[%s1613_s4] sm:$0x1] (!%p1095_p13)  ;;  %v890_v18 = vshrl.u32 (!%p1095_p13), %v889_v12, 7 }
 0x136   : > { %829 = vst [vmem:[#allocation2 + $0x8] sm:$0xff] %v821_v19  ;;  %v1204_v25 = vadd.f32 %v1203_v23, %v1202_v20  ;;  %v1205_v26 = vpop.f32.mrb[6].mxu1  ;;  %v1166_v27 = vpop.f32.mrb[7].mxu0  ;;  %vm879_vm0 = vcmp.ne.f32.partialorder (!%p1095_p13), %v878_v16, 0.0 }
 0x137   : > { %v1167_v29 = vadd.f32 %v1166_v27, %v1165_v24  ;;  %v1206_v30 = vpop.f32.mrb[7].mxu1 }
 0x138   : > { %v798_v31 = vadd.f32 %v1204_v25, %v1164_v22  ;;  %v1207_v32 = vadd.f32 %v1206_v30, %v1205_v26  ;;  %v1391_v25 = vmov (!%p1095_p13), 0  }
 0x139   : > { %v888_v26 = vsel (!%p1095_p13), %vm879_vm0, 1, %v1391_v25 }
 0x13a   : > { %v822_v34 = vadd.f32 %v798_v31, %v332_v28  ;;  %v801_v35 = vadd.f32 %v1207_v32, %v1167_v29  ;;  %v891_v29 = vsub.s32 (!%p1095_p13), 0, %v890_v18 }
 0x13b   : > { %v1168_v36 = vpop.f32.mrb[8].mxu0  ;;  %v840_v9 = vld [vmem:[#allocation2] sm:$0xff] (!%p1095_p13) }
 0x13c   : > { %830 = vst [vmem:[#allocation2 + $0x10] sm:$0xff] %v822_v34  ;;  %v823_v37 = vadd.f32 %v801_v35, %v333_v33  ;;  %v1208_v38 = vpop.f32.mrb[8].mxu1  ;;  %v1169_v39 = vpop.f32.mrb[9].mxu0  ;;  %v855_v13 = vmul.f32 (!%p1095_p13), %v1096_v11, %v840_v9 }
 0x13d   : > { %v1170_v40 = vadd.f32 %v1169_v39, %v1168_v36  ;;  %v1209_v41 = vpop.f32.mrb[9].mxu1  ;;  %v1171_v42 = vpop.f32.mrb[10].mxu0  ;;  %v841_v10 = vld [vmem:[#allocation2 + $0x8] sm:$0xff] (!%p1095_p13) }
 0x13e   : > { %831 = vst [vmem:[#allocation2 + $0x18] sm:$0xff] %v823_v37  ;;  %v1210_v43 = vadd.f32 %v1209_v41, %v1208_v38  ;;  %v1211_v44 = vpop.f32.mrb[10].mxu1  ;;  %v1172_v45 = vpop.f32.mrb[11].mxu0  ;;  %v856_v14 = vmul.f32 (!%p1095_p13), %v1096_v11, %v841_v10  ;;  %v870_v23 = vadd.f32 (!%p1095_p13), %v1097_v15, %v855_v13  ;;  %v892_v38 = vrot.slane (!%p1095_p13), %v888_v26, %v891_v29 }
 0x13f   : > { %v1173_v47 = vadd.f32 %v1172_v45, %v1171_v42  ;;  %v1212_v48 = vpop.f32.mrb[11].mxu1 }
 0x140   : > { %v806_v49 = vadd.f32 %v1210_v43, %v1170_v40  ;;  %v1213_v50 = vadd.f32 %v1212_v48, %v1211_v44  ;;  %v871_v24 = vadd.f32 (!%p1095_p13), %v1097_v15, %v856_v14  ;;  %v880_v34 = vmax.f32 (!%p1095_p13), %v870_v23, 0.0 }
 0x141   : > { %vm893_vm1 = vcmp.eq.s32.totalorder (!%p1095_p13), %v892_v38, 1 }
 0x142   : > { %v824_v52 = vadd.f32 %v806_v49, %v334_v46  ;;  %v809_v53 = vadd.f32 %v1213_v50, %v1173_v47  ;;  %v881_v35 = vmax.f32 (!%p1095_p13), %v871_v24, 0.0  ;;  %v894_v47 = vsel (!%p1095_p13), %vm893_vm1, %v880_v34, %v870_v23 }
 0x143   : > { %v1174_v54 = vpop.f32.mrb[12].mxu0  ;;  %v842_v17 = vld [vmem:[#allocation2 + $0x10] sm:$0xff] (!%p1095_p13) }
 0x144   : > { %832 = vst [vmem:[#allocation2 + $0x20] sm:$0xff] %v824_v52  ;;  %v825_v55 = vadd.f32 %v809_v53, %v335_v51  ;;  %v1214_v56 = vpop.f32.mrb[12].mxu1  ;;  %v1175_v57 = vpop.f32.mrb[13].mxu0  ;;  %v857_v20 = vmul.f32 (!%p1095_p13), %v1096_v11, %v842_v17  ;;  %v895_v48 = vsel (!%p1095_p13), %vm893_vm1, %v881_v35, %v871_v24 }
 0x145   : > { %v1176_v58 = vadd.f32 %v1175_v57, %v1174_v54  ;;  %v1215_v59 = vpop.f32.mrb[13].mxu1  ;;  %v1177_v60 = vpop.f32.mrb[14].mxu0  ;;  %v843_v19 = vld [vmem:[#allocation2 + $0x18] sm:$0xff] (!%p1095_p13)  ;;  %v1120_v51 = vpack.c.bf16 (!%p1095_p13), %v895_v48, %v894_v47 }
 0x146   : > { %833 = vst [vmem:[#allocation2 + $0x28] sm:$0xff] %v825_v55  ;;  %v1216_v61 = vadd.f32 %v1215_v59, %v1214_v56  ;;  %v1217_v62 = vpop.f32.mrb[14].mxu1  ;;  %v1178_v63 = vpop.f32.mrb[15].mxu0  ;;  %v858_v27 = vmul.f32 (!%p1095_p13), %v1096_v11, %v843_v19  ;;  %v872_v30 = vadd.f32 (!%p1095_p13), %v1097_v15, %v857_v20 }
 0x147   : > { %v1179_v1 = vadd.f32 %v1178_v63, %v1177_v60  ;;  %v1218_v2 = vpop.f32.mrb[15].mxu1  ;;  %1121 = vst [vmem:[%s1513_s13] sm:$0xff] (!%p1095_p13), %v1120_v51  }
 0x148   : > { %v814_v3 = vadd.f32 %v1216_v61, %v1176_v58  ;;  %v1219_v4 = vadd.f32 %v1218_v2, %v1217_v62  ;;  %839 = sbr.rel (%p1095_p13) target bundleno = 352 (0x160), region = 71  ;;  %v873_v36 = vadd.f32 (!%p1095_p13), %v1097_v15, %v858_v27  ;;  %v882_v39 = vmax.f32 (!%p1095_p13), %v872_v30, 0.0 }
 0x14a   : > { %v826_v6 = vadd.f32 %v814_v3, %v336_v0  ;;  %v817_v7 = vadd.f32 %v1219_v4, %v1179_v1  ;;  %v883_v42 = vmax.f32 (!%p1095_p13), %v873_v36, 0.0  ;;  %v896_v49 = vsel (!%p1095_p13), %vm893_vm1, %v882_v39, %v872_v30 }
 0x14b   : > { %v844_v21 = vld [vmem:[#allocation2 + $0x20] sm:$0xff] (!%p1095_p13) }
 0x14c   : > { %834 = vst [vmem:[#allocation2 + $0x30] sm:$0xff] %v826_v6  ;;  %v827_v8 = vadd.f32 %v817_v7, %v337_v5  ;;  %v859_v31 = vmul.f32 (!%p1095_p13), %v1096_v11, %v844_v21  ;;  %v897_v50 = vsel (!%p1095_p13), %vm893_vm1, %v883_v42, %v873_v36 }
 0x14d   : > { %v845_v22 = vld [vmem:[#allocation2 + $0x28] sm:$0xff] (!%p1095_p13)  ;;  %v1125_v52 = vpack.c.bf16 (!%p1095_p13), %v897_v50, %v896_v49 }
 0x14e   : > { %835 = vst [vmem:[#allocation2 + $0x38] sm:$0xff] %v827_v8  ;;  %v860_v32 = vmul.f32 (!%p1095_p13), %v1096_v11, %v845_v22  ;;  %v874_v40 = vadd.f32 (!%p1095_p13), %v1097_v15, %v859_v31 }
 0x14f   : > { %1137 = vst [vmem:[%s1513_s13 + $0x8] sm:$0xff] %v1125_v52  }
 0x150   : > { %v875_v41 = vadd.f32 %v1097_v15, %v860_v32  ;;  %v884_v45 = vmax.f32 %v874_v40, 0.0 }
 0x152   : > { %v885_v46 = vmax.f32 %v875_v41, 0.0  ;;  %v898_v53 = vsel %vm893_vm1, %v884_v45, %v874_v40 }
 0x153   : > { %v846_v28 = vld [vmem:[#allocation2 + $0x30] sm:$0xff] }
 0x154   : > { %v861_v37 = vmul.f32 %v1096_v11, %v846_v28  ;;  %v899_v54 = vsel %vm893_vm1, %v885_v46, %v875_v41 }
 0x155   : > { %v847_v33 = vld [vmem:[#allocation2 + $0x38] sm:$0xff]  ;;  %v1130_v55 = vpack.c.bf16 %v899_v54, %v898_v53 }
 0x156   : > { %v862_v43 = vmul.f32 %v1096_v11, %v847_v33  ;;  %v876_v44 = vadd.f32 %v1097_v15, %v861_v37 }
 0x157   : > { %1138 = vst [vmem:[%s1513_s13 + $0x10] sm:$0xff] %v1130_v55  }
 0x158   : > { %v877_v56 = vadd.f32 %v1097_v15, %v862_v43  ;;  %v886_v57 = vmax.f32 %v876_v44, 0.0 }
 0x15a   : > { %v887_v58 = vmax.f32 %v877_v56, 0.0  ;;  %v900_v59 = vsel %vm893_vm1, %v886_v57, %v876_v44 }
 0x15c   : > { %v901_v60 = vsel %vm893_vm1, %v887_v58, %v877_v56 }
 0x15d   : > { %v1135_v61 = vpack.c.bf16 %v901_v60, %v900_v59 }
 0x15f   : > { %1139 = vst [vmem:[%s1513_s13 + $0x18] sm:$0xff] %v1135_v61  }
 0x160 PF: > { %s15_s24 = sadd.s32 1, %s1388_s24   ;;  %s1615_s18 = smov %s1368_s19 }
 0x161   : > { %p12_p0 = scmp.ge.s32.totalorder %s15_s24, 10   ;;  %s1616_s19 = smov %s1473_s6 }
 0x162   : > { %s1617_s20 = smov %s1380_s22  ;;  %s1618_s21 = smov %s1384_s23 }
 0x163   : > { %s1619_s22 = smov %s1622_s25  ;;  %s1620_s23 = smov %s1626_s26 }
 0x164   :  { %14 = sbr.rel (!%p12_p0) target bundleno = 4 (0x4), region = 109 }

// kernel: _lambda_.11
= control target key start
LH: loop header
LB: loop body
LE: loop exit
PB: predicated region body
PF: predicated region fallthrough
CT: control target
= control target key end

     0   :  { %s1104_s21 = smov 0   ;;  %s1106_s22 = smov 0   ;;  %s1255_s0 = inlined_call_operand.vmem [shape: bf16[128,256], index: 0, kind: input, shape index: {}]   ;;  %s1256_s1 = inlined_call_operand.vmem [shape: bf16[256,128], index: 1, kind: input, shape index: {}]   ;;  %s1257_s2 = inlined_call_operand.vmem [shape: f32[1,128], index: 2, kind: input, shape index: {}]   ;;  %s1258_s3 = inlined_call_operand.vmem [shape: f32[1,128], index: 3, kind: input, shape index: {}]   ;;  %s1259_s4 = inlined_call_operand.vmem [shape: f32[1,128], index: 4, kind: input, shape index: {}]   ;;  %s1260_s5 = inlined_call_operand.vmem [shape: bf16[128,128], index: 5, kind: input, shape index: {}]   ;;  %s1261_s6 = inlined_call_operand.vmem [shape: bf16[128,128], index: 6, kind: output, shape index: {}]  }
   0x1   :  { %s1108_s23 = smov 0  }
   0x2 LB: > { %s28_s24 = sadd.s32 1, %s1062_s22  ;;  %p840_p0 = scmp.ge.s32.totalorder %s1066_s23, 1  ;;  %s1066_s23 = sphi %s1108_s23, %s16_s23   ;;  %s1062_s22 = sphi %s1106_s22, %s1263_s22   ;;  %s1058_s21 = sphi %s1104_s21, %s1262_s21  }
   0x3   : > { %p30_p1 = scmp.ge.s32.totalorder %s28_s24, 2  ;;  %p255_p2 = scmp.lt.s32.totalorder %s1066_s23, 3 }
   0x5   : > { %s1265_s24 = smov (%p30_p1, %s28_s24), 0  ;;  %p256_p3 = pnand %p840_p0, %p255_p2 }
   0x6   : > { %v1016_v0 = vld [vmem:[%s1256_s1 + $0x40] sm:$0xff] (!%p256_p3)   ;;  %s841_s27 = sshll.u32 (!%p256_p3), %s1058_s21, 3  ;;  %v1018_v2 = vld [vmem:[%s1256_s1 + $0x48] sm:$0xff] (!%p256_p3)   ;;  %v1020_v4 = vld [vmem:[%s1256_s1 + $0x50] sm:$0xff] (!%p256_p3)   ;;  %v684_v24 = vlaneseq (!%p256_p3)  ;;  %v1068_v40 = vmov (!%p256_p3), 0  }
   0x7   : > { %259 = sbr.rel (%p256_p3) target bundleno = 276 (0x114), region = 44  ;;  %v1017_v1 = vld [vmem:[%s1256_s1] sm:$0xff] (!%p256_p3)   ;;  %935 = vmatprep.subr.bf16.mxu0 (!%p256_p3), %v1016_v0  ;;  %975 = vmatprep.subr.bf16.mxu1 (!%p256_p3), %v1016_v0  ;;  %v1019_v3 = vld [vmem:[%s1256_s1 + $0x8] sm:$0xff] (!%p256_p3)   ;;  %p302_p4 = scmp.lt.s32.totalorder (!%p256_p3), %s841_s27, 15  ;;  %v1021_v5 = vld [vmem:[%s1256_s1 + $0x10] sm:$0xff] (!%p256_p3)  }
   0x8   : > { %936 = vmatpush3.bf16.msra.mxu0 (!%p256_p3), %v1017_v1  ;;  %983 = vmatpush3.bf16.msra.mxu1 (!%p256_p3), %v1017_v1  ;;  %v1022_v6 = vld [vmem:[%s1256_s1 + $0x58] sm:$0xff] (!%p256_p3)   ;;  %v1024_v8 = vld [vmem:[%s1256_s1 + $0x60] sm:$0xff] (!%p256_p3)   ;;  %v1026_v10 = vld [vmem:[%s1256_s1 + $0x68] sm:$0xff] (!%p256_p3)   ;;  %v685_v26 = vshrl.u32 (!%p256_p3), %v684_v24, 7 }
   0x9   : > { %937 = vmatprep.subr.bf16.mxu0 (!%p256_p3), %v1018_v2  ;;  %976 = vmatprep.subr.bf16.mxu1 (!%p256_p3), %v1018_v2  ;;  %v1023_v7 = vld [vmem:[%s1256_s1 + $0x18] sm:$0xff] (!%p256_p3)   ;;  %v1025_v9 = vld [vmem:[%s1256_s1 + $0x20] sm:$0xff] (!%p256_p3)   ;;  %v1027_v13 = vld [vmem:[%s1256_s1 + $0x28] sm:$0xff] (!%p256_p3)  }
   0xa   : > { %v1028_v14 = vld [vmem:[%s1256_s1 + $0x70] sm:$0xff] (!%p256_p3)   ;;  %v1030_v16 = vld [vmem:[%s1256_s1 + $0x78] sm:$0xff] (!%p256_p3)   ;;  %v673_v25 = vld [vmem:[%s1259_s4] sm:$0x1] (!%p256_p3)  ;;  %v686_v42 = vsub.s32 (!%p256_p3), 0, %v685_v26 }
   0xb   : > { %v1029_v15 = vld [vmem:[%s1256_s1 + $0x30] sm:$0xff] (!%p256_p3)   ;;  %v1031_v17 = vld [vmem:[%s1256_s1 + $0x38] sm:$0xff] (!%p256_p3)   ;;  %vm674_vm0 = vcmp.ne.f32.partialorder (!%p256_p3), %v673_v25, 0.0  ;;  %v1202_v32 = vld [vmem:[%s1257_s2] ss:$0 sm:$0xff] (!%p256_p3) }
   0xc   : > { %938 = vmatpush3.bf16.msra.mxu0 (!%p256_p3), %v1019_v3  ;;  %984 = vmatpush3.bf16.msra.mxu1 (!%p256_p3), %v1019_v3  ;;  %v1207_v38 = vld [vmem:[%s1258_s3] ss:$0 sm:$0xff] (!%p256_p3)  ;;  %v683_v41 = vsel (!%p256_p3), %vm674_vm0, 1, %v1068_v40 }
   0xd   : > { %939 = vmatprep.subr.bf16.mxu0 (!%p256_p3), %v1020_v4  ;;  %977 = vmatprep.subr.bf16.mxu1 (!%p256_p3), %v1020_v4  ;;  %v687_v56 = vrot.slane (!%p256_p3), %v683_v41, %v686_v42 }
   0xe   : > { %s1267_s27 = smov (!%p302_p4, %s841_s27), 15 }
   0xf   : > { %s884_s18 = sshll.u32 %s1267_s27, 3  ;;  %vm688_vm1 = vcmp.eq.s32.totalorder %v687_v56, 1 }
  0x10   : > { %940 = vmatpush3.bf16.msra.mxu0 %v1021_v5  ;;  %985 = vmatpush3.bf16.msra.mxu1 %v1021_v5  ;;  %s1155_s26 = scalar_lea.vmem %s1255_s0, %s884_s18  ;;  %s845_s18 = sshll.u32 %s1267_s27, 2 }
  0x11   : > { %941 = vmatprep.subr.bf16.mxu0 %v1022_v6  ;;  %978 = vmatprep.subr.bf16.mxu1 %v1022_v6  ;;  %v1034_v11 = vld [vmem:[%s1155_s26 + $0x4] ss:$8 sps:$4 sm:$0xff]   ;;  %v1032_v18 = vld [vmem:[%s1155_s26] ss:$8 sps:$4 sm:$0xff]   ;;  %v1038_v20 = vld [vmem:[%s1155_s26 + $0x14] ss:$8 sps:$4 sm:$0xff]   ;;  %s1192_s21 = scalar_lea.vmem %s1260_s5, %s845_s18  ;;  %s1226_s10 = scalar_lea.vmem %s1261_s6, %s845_s18 }
  0x12   : > { %v1037_v12 = vld [vmem:[%s1155_s26 + $0x24] ss:$8 sps:$4 sm:$0xff]   ;;  %559 = vmatprep.mubr.bf16.mxu0 %v1034_v11  ;;  %v1035_v19 = vld [vmem:[%s1155_s26 + $0x20] ss:$8 sps:$4 sm:$0xff]   ;;  %v1040_v21 = vld [vmem:[%s1155_s26 + $0x34] ss:$8 sps:$4 sm:$0xff]  }
  0x13   : > { %575 = vmatprep.mubr.bf16.mxu1 %v1037_v12  ;;  %v1042_v22 = vld [vmem:[%s1155_s26 + $0x10] ss:$8 sps:$4 sm:$0xff]   ;;  %v894_v29 = vld [vmem:[%s1192_s21] sm:$0xff]   ;;  %v929_v0 = vld [vmem:[%s1192_s21 + $0x8] sm:$0xff]  }
  0x14   : > { %942 = vmatpush3.bf16.msra.mxu0 %v1023_v7  ;;  %986 = vmatpush3.bf16.msra.mxu1 %v1023_v7  ;;  %v1043_v23 = vld [vmem:[%s1155_s26 + $0x30] ss:$8 sps:$4 sm:$0xff]   ;;  %v895_v39 = vunpack.c.l.bf16 %v894_v29  ;;  %v896_v50 = vunpack.c.h.bf16 %v894_v29 }
  0x15   : > { %943 = vmatprep.subr.bf16.mxu0 %v1024_v8  ;;  %979 = vmatprep.subr.bf16.mxu1 %v1024_v8  ;;  %v930_v30 = vld [vmem:[%s1192_s21 + $0x10] sm:$0xff]   ;;  %v931_v2 = vld [vmem:[%s1192_s21 + $0x18] sm:$0xff]  }
  0x16   : > { %v903_v43 = vunpack.c.l.bf16 %v930_v30  ;;  %v904_v51 = vunpack.c.h.bf16 %v930_v30  ;;  %v900_v30 = vunpack.c.h.bf16 %v929_v0 }
  0x18   : > { %944 = vmatpush3.bf16.msra.mxu0 %v1025_v9  ;;  %987 = vmatpush3.bf16.msra.mxu1 %v1025_v9 }
  0x19   : > { %945 = vmatprep.subr.bf16.mxu0 %v1026_v10  ;;  %980 = vmatprep.subr.bf16.mxu1 %v1026_v10 }
  0x1c   : > { %946 = vmatpush3.bf16.msra.mxu0 %v1027_v13  ;;  %988 = vmatpush3.bf16.msra.mxu1 %v1027_v13 }
  0x1d   : > { %947 = vmatprep.subr.bf16.mxu0 %v1028_v14  ;;  %981 = vmatprep.subr.bf16.mxu1 %v1028_v14 }
  0x20   : > { %948 = vmatpush3.bf16.msra.mxu0 %v1029_v15  ;;  %989 = vmatpush3.bf16.msra.mxu1 %v1029_v15  ;;  %v899_v15 = vunpack.c.l.bf16 %v929_v0 }
  0x21   : > { %949 = vmatprep.subr.bf16.mxu0 %v1030_v16  ;;  %982 = vmatprep.subr.bf16.mxu1 %v1030_v16  ;;  %v907_v16 = vunpack.c.l.bf16 %v931_v2 }
  0x24   : > { %950 = vmatpush3.bf16.msra.mxu0 %v1031_v17  ;;  %990 = vmatpush3.bf16.msra.mxu1 %v1031_v17 }
  0x27   : > { %560 = vmatmul.mubr.bf16.vlgmr.msra.gmra.mrb[0].mxu0 %v1032_v18  ;;  %576 = vmatmul.mubr.bf16.vlgmr.msra.gmra.mrb[0].mxu1 %v1035_v19 }
  0x28   : > { %567 = vmatprep.mubr.bf16.mxu0 %v1038_v20  ;;  %583 = vmatprep.mubr.bf16.mxu1 %v1040_v21 }
  0x2f   : > { %568 = vmatmul.mubr.bf16.gmra.mrb[4].mxu0 %v1042_v22  ;;  %584 = vmatmul.mubr.bf16.gmra.mrb[4].mxu1 %v1043_v23 }
  0xfa   : > { %v951_v27 = vpop.f32.mrb[0].mxu0  ;;  %v963_v28 = vpop.f32.mrb[0].mxu1 }
  0xfb   : > { %v952_v31 = vpop.f32.mrb[1].mxu0  ;;  %v964_v33 = vpop.f32.mrb[1].mxu1 }
  0xfc   : > { %v953_v34 = vadd.f32 %v952_v31, %v951_v27  ;;  %v965_v35 = vadd.f32 %v964_v33, %v963_v28  ;;  %v954_v36 = vpop.f32.mrb[2].mxu0  ;;  %v966_v37 = vpop.f32.mrb[2].mxu1  ;;  %v908_v33 = vunpack.c.h.bf16 %v931_v2 }
  0xfd   : > { %v955_v44 = vpop.f32.mrb[3].mxu0  ;;  %v967_v45 = vpop.f32.mrb[3].mxu1 }
  0xfe   : > { %v626_v46 = vmul.f32 %v953_v34, %v1202_v32  ;;  %v630_v47 = vmul.f32 %v965_v35, %v1202_v32  ;;  %v956_v48 = vadd.f32 %v955_v44, %v954_v36  ;;  %v968_v49 = vadd.f32 %v967_v45, %v966_v37 }
 0x100   : > { %v641_v52 = vadd.f32 %v1207_v38, %v626_v46  ;;  %v645_v53 = vadd.f32 %v1207_v38, %v630_v47  ;;  %v627_v54 = vmul.f32 %v956_v48, %v1202_v32  ;;  %v631_v55 = vmul.f32 %v968_v49, %v1202_v32 }
 0x102   : > { %v665_v57 = vadd.f32 %v895_v39, %v641_v52  ;;  %v669_v58 = vadd.f32 %v903_v43, %v645_v53  ;;  %v642_v59 = vadd.f32 %v1207_v38, %v627_v54  ;;  %v646_v60 = vadd.f32 %v1207_v38, %v631_v55  ;;  %v957_v61 = vpop.f32.mrb[4].mxu0  ;;  %v969_v62 = vpop.f32.mrb[4].mxu1 }
 0x103   : > { %v958_v63 = vpop.f32.mrb[5].mxu0  ;;  %v970_v1 = vpop.f32.mrb[5].mxu1 }
 0x104   : > { %v675_v3 = vmax.f32 %v665_v57, 0.0  ;;  %v679_v4 = vmax.f32 %v669_v58, 0.0  ;;  %v666_v5 = vadd.f32 %v896_v50, %v642_v59  ;;  %v670_v6 = vadd.f32 %v904_v51, %v646_v60  ;;  %v960_v7 = vpop.f32.mrb[6].mxu0  ;;  %v972_v8 = vpop.f32.mrb[6].mxu1 }
 0x105   : > { %v959_v9 = vadd.f32 %v958_v63, %v957_v61  ;;  %v971_v10 = vadd.f32 %v970_v1, %v969_v62  ;;  %v961_v11 = vpop.f32.mrb[7].mxu0  ;;  %v973_v12 = vpop.f32.mrb[7].mxu1 }
 0x106   : > { %v676_v13 = vmax.f32 %v666_v5, 0.0  ;;  %v680_v14 = vmax.f32 %v670_v6, 0.0  ;;  %v962_v19 = vadd.f32 %v961_v11, %v960_v7  ;;  %v974_v20 = vadd.f32 %v973_v12, %v972_v8 }
 0x107   : > { %v628_v17 = vmul.f32 %v959_v9, %v1202_v32  ;;  %v632_v18 = vmul.f32 %v971_v10, %v1202_v32  ;;  %v689_v21 = vsel %vm688_vm1, %v675_v3, %v665_v57  ;;  %v693_v22 = vsel %vm688_vm1, %v679_v4, %v669_v58 }
 0x108   : > { %v690_v23 = vsel %vm688_vm1, %v676_v13, %v666_v5  ;;  %v694_v24 = vsel %vm688_vm1, %v680_v14, %v670_v6  ;;  %v629_v29 = vmul.f32 %v962_v19, %v1202_v32  ;;  %v633_v31 = vmul.f32 %v974_v20, %v1202_v32 }
 0x109   : > { %v912_v25 = vpack.c.bf16 %v690_v23, %v689_v21  ;;  %v922_v26 = vpack.c.bf16 %v694_v24, %v693_v22  ;;  %v643_v27 = vadd.f32 %v1207_v38, %v628_v17  ;;  %v647_v28 = vadd.f32 %v1207_v38, %v632_v18 }
 0x10a   : > { %v644_v36 = vadd.f32 %v1207_v38, %v629_v29  ;;  %v648_v37 = vadd.f32 %v1207_v38, %v633_v31 }
 0x10b   : > { %913 = vst [vmem:[%s1226_s10] sm:$0xff] %v912_v25   ;;  %933 = vst [vmem:[%s1226_s10 + $0x10] sm:$0xff] %v922_v26   ;;  %v667_v34 = vadd.f32 %v899_v15, %v643_v27  ;;  %v671_v35 = vadd.f32 %v907_v16, %v647_v28 }
 0x10c   : > { %v668_v41 = vadd.f32 %v900_v30, %v644_v36  ;;  %v672_v42 = vadd.f32 %v908_v33, %v648_v37 }
 0x10d   : > { %v677_v39 = vmax.f32 %v667_v34, 0.0  ;;  %v681_v40 = vmax.f32 %v671_v35, 0.0 }
 0x10e   : > { %v678_v43 = vmax.f32 %v668_v41, 0.0  ;;  %v682_v44 = vmax.f32 %v672_v42, 0.0 }
 0x10f   : > { %v691_v45 = vsel %vm688_vm1, %v677_v39, %v667_v34  ;;  %v695_v32 = vsel %vm688_vm1, %v681_v40, %v671_v35 }
 0x110   : > { %v692_v46 = vsel %vm688_vm1, %v678_v43, %v668_v41  ;;  %v696_v47 = vsel %vm688_vm1, %v682_v44, %v672_v42 }
 0x111   : > { %v917_v48 = vpack.c.bf16 %v692_v46, %v691_v45  ;;  %v927_v49 = vpack.c.bf16 %v696_v47, %v695_v32 }
 0x113   : > { %932 = vst [vmem:[%s1226_s10 + $0x8] sm:$0xff] %v917_v48   ;;  %934 = vst [vmem:[%s1226_s10 + $0x18] sm:$0xff] %v927_v49  }
 0x114 PF: > { %s16_s23 = sadd.s32 1, %s1066_s23   ;;  %s1262_s21 = smov %s1062_s22 }
 0x115   : > { %p13_p5 = scmp.ge.s32.totalorder %s16_s23, 4   ;;  %s1263_s22 = smov %s1265_s24 }
 0x117   :  { %15 = sbr.rel (!%p13_p5) target bundleno = 2 (0x2), region = 88 }

// kernel: _lambda_.12
= control target key start
LH: loop header
LB: loop body
LE: loop exit
PB: predicated region body
PF: predicated region fallthrough
CT: control target
= control target key end

     0   :  { %v350_v24 = vlaneseq  ;;  %v557_v30 = vmov 0   ;;  %s689_s1 = inlined_call_operand.vmem [shape: bf16[256,128], index: 1, kind: input, shape index: {}]   ;;  %s690_s0 = inlined_call_operand.vmem [shape: bf16[64,256], index: 0, kind: input, shape index: {}]   ;;  %s691_s4 = inlined_call_operand.vmem [shape: f32[1,128], index: 4, kind: input, shape index: {}]   ;;  %s692_s2 = inlined_call_operand.vmem [shape: f32[1,128], index: 2, kind: input, shape index: {}]   ;;  %s693_s3 = inlined_call_operand.vmem [shape: f32[1,128], index: 3, kind: input, shape index: {}]   ;;  %s694_s5 = inlined_call_operand.vmem [shape: bf16[64,128], index: 5, kind: output, shape index: {}]  }
   0x1   :  { %v529_v0 = vld [vmem:[%s689_s1 + $0x40] sm:$0xff]   ;;  %v531_v2 = vld [vmem:[%s689_s1 + $0x48] sm:$0xff]   ;;  %v533_v4 = vld [vmem:[%s689_s1 + $0x50] sm:$0xff]  }
   0x2   :  { %v530_v1 = vld [vmem:[%s689_s1] sm:$0xff]   ;;  %472 = vmatprep.subr.bf16.mxu0 %v529_v0  ;;  %512 = vmatprep.subr.bf16.mxu1 %v529_v0  ;;  %v532_v3 = vld [vmem:[%s689_s1 + $0x8] sm:$0xff]   ;;  %v534_v5 = vld [vmem:[%s689_s1 + $0x10] sm:$0xff]   ;;  %v351_v26 = vshrl.u32 %v350_v24, 7 }
   0x3   :  { %473 = vmatpush3.bf16.msra.mxu0 %v530_v1  ;;  %520 = vmatpush3.bf16.msra.mxu1 %v530_v1  ;;  %v535_v6 = vld [vmem:[%s689_s1 + $0x58] sm:$0xff]   ;;  %v537_v8 = vld [vmem:[%s689_s1 + $0x60] sm:$0xff]   ;;  %v539_v10 = vld [vmem:[%s689_s1 + $0x68] sm:$0xff]  }
   0x4   :  { %474 = vmatprep.subr.bf16.mxu0 %v531_v2  ;;  %513 = vmatprep.subr.bf16.mxu1 %v531_v2  ;;  %v536_v7 = vld [vmem:[%s689_s1 + $0x18] sm:$0xff]   ;;  %v538_v9 = vld [vmem:[%s689_s1 + $0x20] sm:$0xff]   ;;  %v540_v13 = vld [vmem:[%s689_s1 + $0x28] sm:$0xff]   ;;  %v352_v27 = vsub.s32 0, %v351_v26 }
   0x5   :  { %v547_v11 = vld [vmem:[%s690_s0 + $0x4] ss:$8 sps:$4 sm:$0xff]   ;;  %v541_v14 = vld [vmem:[%s689_s1 + $0x70] sm:$0xff]   ;;  %v543_v16 = vld [vmem:[%s689_s1 + $0x78] sm:$0xff]  }
   0x6   :  { %v550_v12 = vld [vmem:[%s690_s0 + $0x24] ss:$8 sps:$4 sm:$0xff]   ;;  %249 = vmatprep.mubr.bf16.mxu0 %v547_v11  ;;  %v542_v15 = vld [vmem:[%s689_s1 + $0x30] sm:$0xff]   ;;  %v544_v17 = vld [vmem:[%s689_s1 + $0x38] sm:$0xff]  }
   0x7   :  { %475 = vmatpush3.bf16.msra.mxu0 %v532_v3  ;;  %521 = vmatpush3.bf16.msra.mxu1 %v532_v3  ;;  %v545_v18 = vld [vmem:[%s690_s0] ss:$8 sps:$4 sm:$0xff]   ;;  %v551_v20 = vld [vmem:[%s690_s0 + $0x14] ss:$8 sps:$4 sm:$0xff]   ;;  %v555_v22 = vld [vmem:[%s690_s0 + $0x10] ss:$8 sps:$4 sm:$0xff]  }
   0x8   :  { %476 = vmatprep.subr.bf16.mxu0 %v533_v4  ;;  %514 = vmatprep.subr.bf16.mxu1 %v533_v4  ;;  %v548_v19 = vld [vmem:[%s690_s0 + $0x20] ss:$8 sps:$4 sm:$0xff]   ;;  %v553_v21 = vld [vmem:[%s690_s0 + $0x34] ss:$8 sps:$4 sm:$0xff]   ;;  %v556_v23 = vld [vmem:[%s690_s0 + $0x30] ss:$8 sps:$4 sm:$0xff]  }
   0x9   :  { %265 = vmatprep.mubr.bf16.mxu1 %v550_v12  ;;  %v339_v25 = vld [vmem:[%s691_s4] sm:$0x1] }
   0xa   :  { %vm340_vm0 = vcmp.ne.f32.partialorder %v339_v25, 0.0  ;;  %v431_v33 = vld [vmem:[%s692_s2] ss:$0 sm:$0xff] }
   0xb   :  { %477 = vmatpush3.bf16.msra.mxu0 %v534_v5  ;;  %522 = vmatpush3.bf16.msra.mxu1 %v534_v5  ;;  %v349_v31 = vsel %vm340_vm0, 1, %v557_v30  ;;  %v432_v39 = vld [vmem:[%s693_s3] ss:$0 sm:$0xff] }
   0xc   :  { %478 = vmatprep.subr.bf16.mxu0 %v535_v6  ;;  %515 = vmatprep.subr.bf16.mxu1 %v535_v6  ;;  %v353_v40 = vrot.slane %v349_v31, %v352_v27 }
   0xe   :  { %vm354_vm1 = vcmp.eq.s32.totalorder %v353_v40, 1 }
   0xf   :  { %479 = vmatpush3.bf16.msra.mxu0 %v536_v7  ;;  %523 = vmatpush3.bf16.msra.mxu1 %v536_v7 }
  0x10   :  { %480 = vmatprep.subr.bf16.mxu0 %v537_v8  ;;  %516 = vmatprep.subr.bf16.mxu1 %v537_v8 }
  0x13   :  { %481 = vmatpush3.bf16.msra.mxu0 %v538_v9  ;;  %524 = vmatpush3.bf16.msra.mxu1 %v538_v9 }
  0x14   :  { %482 = vmatprep.subr.bf16.mxu0 %v539_v10  ;;  %517 = vmatprep.subr.bf16.mxu1 %v539_v10 }
  0x17   :  { %483 = vmatpush3.bf16.msra.mxu0 %v540_v13  ;;  %525 = vmatpush3.bf16.msra.mxu1 %v540_v13 }
  0x18   :  { %484 = vmatprep.subr.bf16.mxu0 %v541_v14  ;;  %518 = vmatprep.subr.bf16.mxu1 %v541_v14 }
  0x1b   :  { %485 = vmatpush3.bf16.msra.mxu0 %v542_v15  ;;  %526 = vmatpush3.bf16.msra.mxu1 %v542_v15 }
  0x1c   :  { %486 = vmatprep.subr.bf16.mxu0 %v543_v16  ;;  %519 = vmatprep.subr.bf16.mxu1 %v543_v16 }
  0x1f   :  { %487 = vmatpush3.bf16.msra.mxu0 %v544_v17  ;;  %527 = vmatpush3.bf16.msra.mxu1 %v544_v17 }
  0x22   :  { %250 = vmatmul.mubr.bf16.vlgmr.msra.gmra.mrb[0].mxu0 %v545_v18  ;;  %266 = vmatmul.mubr.bf16.vlgmr.msra.gmra.mrb[0].mxu1 %v548_v19 }
  0x23   :  { %257 = vmatprep.mubr.bf16.mxu0 %v551_v20  ;;  %273 = vmatprep.mubr.bf16.mxu1 %v553_v21 }
  0x2a   :  { %258 = vmatmul.mubr.bf16.gmra.mrb[4].mxu0 %v555_v22  ;;  %274 = vmatmul.mubr.bf16.gmra.mrb[4].mxu1 %v556_v23 }
  0xf5   :  { %v488_v28 = vpop.f32.mrb[0].mxu0  ;;  %v500_v29 = vpop.f32.mrb[0].mxu1 }
  0xf6   :  { %v489_v32 = vpop.f32.mrb[1].mxu0  ;;  %v501_v34 = vpop.f32.mrb[1].mxu1 }
  0xf7   :  { %v490_v35 = vadd.f32 %v489_v32, %v488_v28  ;;  %v502_v36 = vadd.f32 %v501_v34, %v500_v29  ;;  %v491_v37 = vpop.f32.mrb[2].mxu0  ;;  %v503_v38 = vpop.f32.mrb[2].mxu1 }
  0xf8   :  { %v492_v41 = vpop.f32.mrb[3].mxu0  ;;  %v504_v42 = vpop.f32.mrb[3].mxu1 }
  0xf9   :  { %v316_v43 = vmul.f32 %v490_v35, %v431_v33  ;;  %v320_v44 = vmul.f32 %v502_v36, %v431_v33  ;;  %v493_v45 = vadd.f32 %v492_v41, %v491_v37  ;;  %v505_v46 = vadd.f32 %v504_v42, %v503_v38 }
  0xfb   :  { %v331_v47 = vadd.f32 %v432_v39, %v316_v43  ;;  %v335_v48 = vadd.f32 %v432_v39, %v320_v44  ;;  %v317_v49 = vmul.f32 %v493_v45, %v431_v33  ;;  %v321_v50 = vmul.f32 %v505_v46, %v431_v33 }
  0xfd   :  { %v341_v51 = vmax.f32 %v331_v47, 0.0  ;;  %v345_v52 = vmax.f32 %v335_v48, 0.0  ;;  %v332_v53 = vadd.f32 %v432_v39, %v317_v49  ;;  %v336_v54 = vadd.f32 %v432_v39, %v321_v50  ;;  %v494_v55 = vpop.f32.mrb[4].mxu0  ;;  %v506_v56 = vpop.f32.mrb[4].mxu1 }
  0xfe   :  { %v495_v57 = vpop.f32.mrb[5].mxu0  ;;  %v507_v58 = vpop.f32.mrb[5].mxu1 }
  0xff   :  { %v342_v59 = vmax.f32 %v332_v53, 0.0  ;;  %v346_v60 = vmax.f32 %v336_v54, 0.0  ;;  %v497_v61 = vpop.f32.mrb[6].mxu0  ;;  %v509_v62 = vpop.f32.mrb[6].mxu1  ;;  %v355_v63 = vsel %vm354_vm1, %v341_v51, %v331_v47  ;;  %v359_v0 = vsel %vm354_vm1, %v345_v52, %v335_v48 }
 0x100   :  { %v496_v1 = vadd.f32 %v495_v57, %v494_v55  ;;  %v508_v2 = vadd.f32 %v507_v58, %v506_v56  ;;  %v498_v3 = vpop.f32.mrb[7].mxu0  ;;  %v510_v4 = vpop.f32.mrb[7].mxu1 }
 0x101   :  { %v356_v5 = vsel %vm354_vm1, %v342_v59, %v332_v53  ;;  %v360_v6 = vsel %vm354_vm1, %v346_v60, %v336_v54  ;;  %v499_v7 = vadd.f32 %v498_v3, %v497_v61  ;;  %v511_v8 = vadd.f32 %v510_v4, %v509_v62 }
 0x102   :  { %v452_v9 = vpack.c.bf16 %v356_v5, %v355_v63  ;;  %v462_v10 = vpack.c.bf16 %v360_v6, %v359_v0  ;;  %v318_v11 = vmul.f32 %v496_v1, %v431_v33  ;;  %v322_v12 = vmul.f32 %v508_v2, %v431_v33 }
 0x103   :  { %v319_v13 = vmul.f32 %v499_v7, %v431_v33  ;;  %v323_v14 = vmul.f32 %v511_v8, %v431_v33 }
 0x104   :  { %453 = vst [vmem:[%s694_s5] sm:$0xff] %v452_v9   ;;  %470 = vst [vmem:[%s694_s5 + $0x10] sm:$0xff] %v462_v10   ;;  %v333_v15 = vadd.f32 %v432_v39, %v318_v11  ;;  %v337_v16 = vadd.f32 %v432_v39, %v322_v12 }
 0x105   :  { %v334_v17 = vadd.f32 %v432_v39, %v319_v13  ;;  %v338_v18 = vadd.f32 %v432_v39, %v323_v14 }
 0x106   :  { %v343_v19 = vmax.f32 %v333_v15, 0.0  ;;  %v347_v20 = vmax.f32 %v337_v16, 0.0 }
 0x107   :  { %v344_v21 = vmax.f32 %v334_v17, 0.0  ;;  %v348_v22 = vmax.f32 %v338_v18, 0.0 }
 0x108   :  { %v357_v23 = vsel %vm354_vm1, %v343_v19, %v333_v15  ;;  %v361_v24 = vsel %vm354_vm1, %v347_v20, %v337_v16 }
 0x109   :  { %v358_v25 = vsel %vm354_vm1, %v344_v21, %v334_v17  ;;  %v362_v26 = vsel %vm354_vm1, %v348_v22, %v338_v18 }
 0x10a   :  { %v457_v27 = vpack.c.bf16 %v358_v25, %v357_v23  ;;  %v467_v28 = vpack.c.bf16 %v362_v26, %v361_v24 }
 0x10c   :  { %469 = vst [vmem:[%s694_s5 + $0x8] sm:$0xff] %v457_v27   ;;  %471 = vst [vmem:[%s694_s5 + $0x18] sm:$0xff] %v467_v28  }

// kernel: _lambda_.13
= control target key start
LH: loop header
LB: loop body
LE: loop exit
PB: predicated region body
PF: predicated region fallthrough
CT: control target
= control target key end

     0   :  { %v618_v48 = vlaneseq  ;;  %s1172_s1 = inlined_call_operand.vmem [shape: bf16[512,128], index: 1, kind: input, shape index: {}]   ;;  %s1173_s0 = inlined_call_operand.vmem [shape: bf16[64,512], index: 0, kind: input, shape index: {}]   ;;  %s1174_s4 = inlined_call_operand.vmem [shape: f32[1,128], index: 4, kind: input, shape index: {}]   ;;  %s1175_s2 = inlined_call_operand.vmem [shape: f32[1,128], index: 2, kind: input, shape index: {}]   ;;  %s1176_s5 = inlined_call_operand.vmem [shape: bf16[64,128], index: 5, kind: input, shape index: {}]   ;;  %s1177_s3 = inlined_call_operand.vmem [shape: f32[1,128], index: 3, kind: input, shape index: {}]   ;;  %s1178_s6 = inlined_call_operand.vmem [shape: bf16[64,128], index: 6, kind: output, shape index: {}]  }
   0x1   :  { %v864_v0 = vld [vmem:[%s1172_s1 + $0x40] sm:$0xff]   ;;  %v868_v4 = vld [vmem:[%s1172_s1 + $0x48] sm:$0xff]   ;;  %v872_v8 = vld [vmem:[%s1172_s1 + $0x50] sm:$0xff]  }
   0x2   :  { %v865_v1 = vld [vmem:[%s1172_s1 + $0xc0] sm:$0xff]   ;;  %783 = vmatprep.subr.bf16.mxu0 %v864_v0  ;;  %v869_v5 = vld [vmem:[%s1172_s1 + $0xc8] sm:$0xff]   ;;  %v873_v9 = vld [vmem:[%s1172_s1 + $0xd0] sm:$0xff]   ;;  %v619_v55 = vshrl.u32 %v618_v48, 7 }
   0x3   :  { %v866_v2 = vld [vmem:[%s1172_s1] sm:$0xff]   ;;  %823 = vmatprep.subr.bf16.mxu1 %v865_v1  ;;  %v870_v6 = vld [vmem:[%s1172_s1 + $0x8] sm:$0xff]   ;;  %v874_v10 = vld [vmem:[%s1172_s1 + $0x10] sm:$0xff]  }
   0x4   :  { %v867_v3 = vld [vmem:[%s1172_s1 + $0x80] sm:$0xff]   ;;  %784 = vmatpush3.bf16.msra.mxu0 %v866_v2  ;;  %v871_v7 = vld [vmem:[%s1172_s1 + $0x88] sm:$0xff]   ;;  %v875_v11 = vld [vmem:[%s1172_s1 + $0x90] sm:$0xff]  }
   0x5   :  { %824 = vmatpush3.bf16.msra.mxu1 %v867_v3  ;;  %785 = vmatprep.subr.bf16.mxu0 %v868_v4  ;;  %v876_v12 = vld [vmem:[%s1172_s1 + $0x58] sm:$0xff]   ;;  %v880_v16 = vld [vmem:[%s1172_s1 + $0x60] sm:$0xff]   ;;  %v884_v20 = vld [vmem:[%s1172_s1 + $0x68] sm:$0xff]   ;;  %v620_v3 = vsub.s32 0, %v619_v55 }
   0x6   :  { %825 = vmatprep.subr.bf16.mxu1 %v869_v5  ;;  %v877_v13 = vld [vmem:[%s1172_s1 + $0xd8] sm:$0xff]   ;;  %v881_v17 = vld [vmem:[%s1172_s1 + $0xe0] sm:$0xff]   ;;  %v885_v21 = vld [vmem:[%s1172_s1 + $0xe8] sm:$0xff]  }
   0x7   :  { %v878_v14 = vld [vmem:[%s1172_s1 + $0x18] sm:$0xff]   ;;  %v882_v18 = vld [vmem:[%s1172_s1 + $0x20] sm:$0xff]   ;;  %v886_v22 = vld [vmem:[%s1172_s1 + $0x28] sm:$0xff]  }
   0x8   :  { %786 = vmatpush3.bf16.msra.mxu0 %v870_v6  ;;  %v879_v15 = vld [vmem:[%s1172_s1 + $0x98] sm:$0xff]   ;;  %v883_v19 = vld [vmem:[%s1172_s1 + $0xa0] sm:$0xff]   ;;  %v887_v23 = vld [vmem:[%s1172_s1 + $0xa8] sm:$0xff]   ;;  %v920_v6 = vmov 0  }
   0x9   :  { %826 = vmatpush3.bf16.msra.mxu1 %v871_v7  ;;  %787 = vmatprep.subr.bf16.mxu0 %v872_v8  ;;  %v888_v24 = vld [vmem:[%s1172_s1 + $0x70] sm:$0xff]   ;;  %v892_v28 = vld [vmem:[%s1172_s1 + $0x78] sm:$0xff]   ;;  %v607_v52 = vld [vmem:[%s1174_s4] sm:$0x1] }
   0xa   :  { %827 = vmatprep.subr.bf16.mxu1 %v873_v9  ;;  %v889_v25 = vld [vmem:[%s1172_s1 + $0xf0] sm:$0xff]   ;;  %v893_v29 = vld [vmem:[%s1172_s1 + $0xf8] sm:$0xff]   ;;  %v1106_v60 = vld [vmem:[%s1175_s2] ss:$0 sm:$0xff]  ;;  %vm608_vm0 = vcmp.ne.f32.partialorder %v607_v52, 0.0 }
   0xb   :  { %v890_v26 = vld [vmem:[%s1172_s1 + $0x30] sm:$0xff]   ;;  %v894_v30 = vld [vmem:[%s1172_s1 + $0x38] sm:$0xff]   ;;  %v742_v61 = vld [vmem:[%s1176_s5] sm:$0xff]   ;;  %v617_v7 = vsel %vm608_vm0, 1, %v920_v6 }
   0xc   :  { %788 = vmatpush3.bf16.msra.mxu0 %v874_v10  ;;  %v891_v27 = vld [vmem:[%s1172_s1 + $0xb0] sm:$0xff]   ;;  %v895_v31 = vld [vmem:[%s1172_s1 + $0xb8] sm:$0xff]   ;;  %v1114_v2 = vld [vmem:[%s1177_s3] ss:$0 sm:$0xff]  ;;  %v743_v5 = vunpack.c.l.bf16 %v742_v61 }
   0xd   :  { %828 = vmatpush3.bf16.msra.mxu1 %v875_v11  ;;  %789 = vmatprep.subr.bf16.mxu0 %v876_v12  ;;  %v896_v32 = vld [vmem:[%s1173_s0] ss:$16 sps:$4 sm:$0xff]   ;;  %v898_v33 = vld [vmem:[%s1173_s0 + $0x4] ss:$16 sps:$4 sm:$0xff]   ;;  %v899_v34 = vld [vmem:[%s1173_s0 + $0x8] ss:$16 sps:$4 sm:$0xff]   ;;  %v744_v12 = vunpack.c.h.bf16 %v742_v61 }
   0xe   :  { %829 = vmatprep.subr.bf16.mxu1 %v877_v13  ;;  %v901_v35 = vld [vmem:[%s1173_s0 + $0xc] ss:$16 sps:$4 sm:$0xff]   ;;  %428 = vmatprep.mubr.bf16.mxu0 %v898_v33  ;;  %v902_v36 = vld [vmem:[%s1173_s0 + $0x24] ss:$16 sps:$4 sm:$0xff]   ;;  %v906_v38 = vld [vmem:[%s1173_s0 + $0x20] ss:$16 sps:$4 sm:$0xff]  }
   0xf   :  { %493 = vmatprep.mubr.bf16.mxu1 %v901_v35  ;;  %v904_v37 = vld [vmem:[%s1173_s0 + $0x2c] ss:$16 sps:$4 sm:$0xff]   ;;  %v907_v39 = vld [vmem:[%s1173_s0 + $0x28] ss:$16 sps:$4 sm:$0xff]   ;;  %v908_v40 = vld [vmem:[%s1173_s0 + $0x44] ss:$16 sps:$4 sm:$0xff]  }
  0x10   :  { %790 = vmatpush3.bf16.msra.mxu0 %v878_v14  ;;  %v910_v41 = vld [vmem:[%s1173_s0 + $0x4c] ss:$16 sps:$4 sm:$0xff]   ;;  %v912_v42 = vld [vmem:[%s1173_s0 + $0x40] ss:$16 sps:$4 sm:$0xff]   ;;  %v913_v43 = vld [vmem:[%s1173_s0 + $0x48] ss:$16 sps:$4 sm:$0xff]  }
  0x11   :  { %830 = vmatpush3.bf16.msra.mxu1 %v879_v15  ;;  %791 = vmatprep.subr.bf16.mxu0 %v880_v16  ;;  %v914_v44 = vld [vmem:[%s1173_s0 + $0x64] ss:$16 sps:$4 sm:$0xff]   ;;  %v916_v45 = vld [vmem:[%s1173_s0 + $0x6c] ss:$16 sps:$4 sm:$0xff]   ;;  %v918_v46 = vld [vmem:[%s1173_s0 + $0x60] ss:$16 sps:$4 sm:$0xff]   ;;  %v1119_v15 = vrot.slane %v617_v7, %v620_v3 }
  0x12   :  { %831 = vmatprep.subr.bf16.mxu1 %v881_v17  ;;  %v919_v47 = vld [vmem:[%s1173_s0 + $0x68] ss:$16 sps:$4 sm:$0xff]   ;;  %v778_v52 = vld [vmem:[%s1176_s5 + $0x10] sm:$0xff]  }
  0x13   :  { %vm622_vm1 = vcmp.eq.s32.totalorder %v1119_v15, 1 }
  0x14   :  { %792 = vmatpush3.bf16.msra.mxu0 %v882_v18 }
  0x15   :  { %832 = vmatpush3.bf16.msra.mxu1 %v883_v19  ;;  %793 = vmatprep.subr.bf16.mxu0 %v884_v20 }
  0x16   :  { %833 = vmatprep.subr.bf16.mxu1 %v885_v21 }
  0x18   :  { %794 = vmatpush3.bf16.msra.mxu0 %v886_v22 }
  0x19   :  { %834 = vmatpush3.bf16.msra.mxu1 %v887_v23  ;;  %795 = vmatprep.subr.bf16.mxu0 %v888_v24  ;;  %v777_v24 = vld [vmem:[%s1176_s5 + $0x8] sm:$0xff]  }
  0x1a   :  { %835 = vmatprep.subr.bf16.mxu1 %v889_v25  ;;  %v747_v33 = vunpack.c.l.bf16 %v777_v24  ;;  %v748_v35 = vunpack.c.h.bf16 %v777_v24 }
  0x1c   :  { %796 = vmatpush3.bf16.msra.mxu0 %v890_v26 }
  0x1d   :  { %836 = vmatpush3.bf16.msra.mxu1 %v891_v27  ;;  %797 = vmatprep.subr.bf16.mxu0 %v892_v28 }
  0x1e   :  { %837 = vmatprep.subr.bf16.mxu1 %v893_v29 }
  0x20   :  { %798 = vmatpush3.bf16.msra.mxu0 %v894_v30 }
  0x21   :  { %838 = vmatpush3.bf16.msra.mxu1 %v895_v31 }
  0x23   :  { %429 = vmatmul.mubr.bf16.vlgmr.msra.gmra.mrb[0].mxu0 %v896_v32 }
  0x24   :  { %494 = vmatmul.mubr.bf16.vlgmr.msra.gmra.mrb[0].mxu1 %v899_v34  ;;  %436 = vmatprep.mubr.bf16.mxu0 %v902_v36 }
  0x25   :  { %501 = vmatprep.mubr.bf16.mxu1 %v904_v37 }
  0x2b   :  { %437 = vmatmul.mubr.bf16.gmra.mrb[4].mxu0 %v906_v38 }
  0x2c   :  { %502 = vmatmul.mubr.bf16.gmra.mrb[4].mxu1 %v907_v39  ;;  %444 = vmatprep.mubr.bf16.mxu0 %v908_v40 }
  0x2d   :  { %509 = vmatprep.mubr.bf16.mxu1 %v910_v41 }
  0x33   :  { %445 = vmatmul.mubr.bf16.gmra.mrb[8].mxu0 %v912_v42 }
  0x34   :  { %510 = vmatmul.mubr.bf16.gmra.mrb[8].mxu1 %v913_v43  ;;  %452 = vmatprep.mubr.bf16.mxu0 %v914_v44 }
  0x35   :  { %517 = vmatprep.mubr.bf16.mxu1 %v916_v45 }
  0x3b   :  { %453 = vmatmul.mubr.bf16.gmra.mrb[12].mxu0 %v918_v46 }
  0x3c   :  { %518 = vmatmul.mubr.bf16.gmra.mrb[12].mxu1 %v919_v47 }
  0xf6   :  { %v799_v49 = vpop.f32.mrb[0].mxu0 }
  0xf7   :  { %v839_v50 = vpop.f32.mrb[0].mxu1  ;;  %v800_v51 = vpop.f32.mrb[1].mxu0 }
  0xf8   :  { %v801_v53 = vadd.f32 %v800_v51, %v799_v49  ;;  %v840_v54 = vpop.f32.mrb[1].mxu1  ;;  %v802_v56 = vpop.f32.mrb[2].mxu0 }
  0xf9   :  { %v841_v57 = vadd.f32 %v840_v54, %v839_v50  ;;  %v842_v58 = vpop.f32.mrb[2].mxu1  ;;  %v803_v59 = vpop.f32.mrb[3].mxu0 }
  0xfa   :  { %v804_v62 = vadd.f32 %v803_v59, %v802_v56  ;;  %v843_v63 = vpop.f32.mrb[3].mxu1 }
  0xfb   :  { %v496_v0 = vadd.f32 %v841_v57, %v801_v53  ;;  %v844_v1 = vadd.f32 %v843_v63, %v842_v58 }
  0xfd   :  { %v560_v4 = vmul.f32 %v1106_v60, %v496_v0  ;;  %v499_v8 = vadd.f32 %v844_v1, %v804_v62  ;;  %v751_v62 = vunpack.c.l.bf16 %v778_v52  ;;  %v752_v0 = vunpack.c.h.bf16 %v778_v52 }
  0xfe   :  { %v805_v9 = vpop.f32.mrb[4].mxu0 }
  0xff   :  { %v575_v10 = vadd.f32 %v1114_v2, %v560_v4  ;;  %v561_v11 = vmul.f32 %v1106_v60, %v499_v8  ;;  %v845_v13 = vpop.f32.mrb[4].mxu1  ;;  %v806_v14 = vpop.f32.mrb[5].mxu0 }
 0x100   :  { %v807_v16 = vadd.f32 %v806_v14, %v805_v9  ;;  %v846_v17 = vpop.f32.mrb[5].mxu1  ;;  %v808_v18 = vpop.f32.mrb[6].mxu0 }
 0x101   :  { %v599_v19 = vadd.f32 %v743_v5, %v575_v10  ;;  %v576_v20 = vadd.f32 %v1114_v2, %v561_v11  ;;  %v847_v21 = vadd.f32 %v846_v17, %v845_v13  ;;  %v848_v22 = vpop.f32.mrb[6].mxu1  ;;  %v809_v23 = vpop.f32.mrb[7].mxu0 }
 0x102   :  { %v810_v25 = vadd.f32 %v809_v23, %v808_v18  ;;  %v849_v26 = vpop.f32.mrb[7].mxu1 }
 0x103   :  { %v609_v27 = vmax.f32 %v599_v19, 0.0  ;;  %v600_v28 = vadd.f32 %v744_v12, %v576_v20  ;;  %v504_v29 = vadd.f32 %v847_v21, %v807_v16  ;;  %v850_v30 = vadd.f32 %v849_v26, %v848_v22 }
 0x105   :  { %v610_v31 = vmax.f32 %v600_v28, 0.0  ;;  %v562_v32 = vmul.f32 %v1106_v60, %v504_v29  ;;  %v507_v34 = vadd.f32 %v850_v30, %v810_v25  ;;  %v623_v37 = vsel %vm622_vm1, %v609_v27, %v599_v19  ;;  %v779_v19 = vld [vmem:[%s1176_s5 + $0x18] sm:$0xff]  }
 0x106   :  { %v811_v36 = vpop.f32.mrb[8].mxu0  ;;  %v756_v30 = vunpack.c.h.bf16 %v779_v19 }
 0x107   :  { %v624_v38 = vsel %vm622_vm1, %v610_v31, %v600_v28  ;;  %v577_v39 = vadd.f32 %v1114_v2, %v562_v32  ;;  %v563_v40 = vmul.f32 %v1106_v60, %v507_v34  ;;  %v851_v41 = vpop.f32.mrb[8].mxu1  ;;  %v812_v42 = vpop.f32.mrb[9].mxu0  ;;  %v755_v28 = vunpack.c.l.bf16 %v779_v19 }
 0x108   :  { %v760_v43 = vpack.c.bf16 %v624_v38, %v623_v37  ;;  %v813_v44 = vadd.f32 %v812_v42, %v811_v36  ;;  %v852_v45 = vpop.f32.mrb[9].mxu1  ;;  %v814_v46 = vpop.f32.mrb[10].mxu0 }
 0x109   :  { %v601_v47 = vadd.f32 %v747_v33, %v577_v39  ;;  %v578_v48 = vadd.f32 %v1114_v2, %v563_v40  ;;  %v853_v49 = vadd.f32 %v852_v45, %v851_v41  ;;  %v854_v50 = vpop.f32.mrb[10].mxu1  ;;  %v815_v51 = vpop.f32.mrb[11].mxu0 }
 0x10a   :  { %761 = vst [vmem:[%s1178_s6] sm:$0xff] %v760_v43   ;;  %v816_v53 = vadd.f32 %v815_v51, %v814_v46  ;;  %v855_v54 = vpop.f32.mrb[11].mxu1 }
 0x10b   :  { %v611_v55 = vmax.f32 %v601_v47, 0.0  ;;  %v602_v56 = vadd.f32 %v748_v35, %v578_v48  ;;  %v512_v57 = vadd.f32 %v853_v49, %v813_v44  ;;  %v856_v58 = vadd.f32 %v855_v54, %v854_v50 }
 0x10d   :  { %v612_v59 = vmax.f32 %v602_v56, 0.0  ;;  %v564_v61 = vmul.f32 %v1106_v60, %v512_v57  ;;  %v515_v63 = vadd.f32 %v856_v58, %v816_v53  ;;  %v625_v3 = vsel %vm622_vm1, %v611_v55, %v601_v47 }
 0x10e   :  { %v817_v1 = vpop.f32.mrb[12].mxu0 }
 0x10f   :  { %v626_v4 = vsel %vm622_vm1, %v612_v59, %v602_v56  ;;  %v579_v5 = vadd.f32 %v1114_v2, %v564_v61  ;;  %v565_v6 = vmul.f32 %v1106_v60, %v515_v63  ;;  %v857_v7 = vpop.f32.mrb[12].mxu1  ;;  %v818_v8 = vpop.f32.mrb[13].mxu0 }
 0x110   :  { %v765_v9 = vpack.c.bf16 %v626_v4, %v625_v3  ;;  %v819_v10 = vadd.f32 %v818_v8, %v817_v1  ;;  %v858_v11 = vpop.f32.mrb[13].mxu1  ;;  %v820_v12 = vpop.f32.mrb[14].mxu0 }
 0x111   :  { %v603_v13 = vadd.f32 %v751_v62, %v579_v5  ;;  %v580_v14 = vadd.f32 %v1114_v2, %v565_v6  ;;  %v859_v16 = vadd.f32 %v858_v11, %v857_v7  ;;  %v860_v17 = vpop.f32.mrb[14].mxu1  ;;  %v821_v18 = vpop.f32.mrb[15].mxu0 }
 0x112   :  { %780 = vst [vmem:[%s1178_s6 + $0x8] sm:$0xff] %v765_v9   ;;  %v822_v20 = vadd.f32 %v821_v18, %v820_v12  ;;  %v861_v21 = vpop.f32.mrb[15].mxu1 }
 0x113   :  { %v613_v22 = vmax.f32 %v603_v13, 0.0  ;;  %v604_v23 = vadd.f32 %v752_v0, %v580_v14  ;;  %v520_v24 = vadd.f32 %v859_v16, %v819_v10  ;;  %v862_v25 = vadd.f32 %v861_v21, %v860_v17 }
 0x115   :  { %v614_v26 = vmax.f32 %v604_v23, 0.0  ;;  %v566_v27 = vmul.f32 %v1106_v60, %v520_v24  ;;  %v523_v29 = vadd.f32 %v862_v25, %v822_v20  ;;  %v627_v31 = vsel %vm622_vm1, %v613_v22, %v603_v13 }
 0x117   :  { %v628_v32 = vsel %vm622_vm1, %v614_v26, %v604_v23  ;;  %v581_v33 = vadd.f32 %v1114_v2, %v566_v27  ;;  %v567_v34 = vmul.f32 %v1106_v60, %v523_v29 }
 0x118   :  { %v770_v35 = vpack.c.bf16 %v628_v32, %v627_v31 }
 0x119   :  { %v605_v36 = vadd.f32 %v755_v28, %v581_v33  ;;  %v582_v37 = vadd.f32 %v1114_v2, %v567_v34 }
 0x11a   :  { %781 = vst [vmem:[%s1178_s6 + $0x10] sm:$0xff] %v770_v35  }
 0x11b   :  { %v615_v38 = vmax.f32 %v605_v36, 0.0  ;;  %v606_v39 = vadd.f32 %v756_v30, %v582_v37 }
 0x11d   :  { %v616_v40 = vmax.f32 %v606_v39, 0.0  ;;  %v629_v41 = vsel %vm622_vm1, %v615_v38, %v605_v36 }
 0x11f   :  { %v630_v42 = vsel %vm622_vm1, %v616_v40, %v606_v39 }
 0x120   :  { %v775_v43 = vpack.c.bf16 %v630_v42, %v629_v41 }
 0x122   :  { %782 = vst [vmem:[%s1178_s6 + $0x18] sm:$0xff] %v775_v43  }

// kernel: _lambda_.14
= control target key start
LH: loop header
LB: loop body
LE: loop exit
PB: predicated region body
PF: predicated region fallthrough
CT: control target
= control target key end

     0   :  { %v591_v48 = vlaneseq  ;;  %s1109_s1 = inlined_call_operand.vmem [shape: bf16[512,128], index: 1, kind: input, shape index: {}]   ;;  %s1110_s0 = inlined_call_operand.vmem [shape: bf16[64,512], index: 0, kind: input, shape index: {}]   ;;  %s1111_s4 = inlined_call_operand.vmem [shape: f32[1,128], index: 4, kind: input, shape index: {}]   ;;  %s1112_s2 = inlined_call_operand.vmem [shape: f32[1,128], index: 2, kind: input, shape index: {}]   ;;  %s1113_s3 = inlined_call_operand.vmem [shape: f32[1,128], index: 3, kind: input, shape index: {}]   ;;  %s1114_s5 = inlined_call_operand.vmem [shape: bf16[64,128], index: 5, kind: output, shape index: {}]  }
   0x1   :  { %v818_v0 = vld [vmem:[%s1109_s1 + $0x40] sm:$0xff]   ;;  %v822_v4 = vld [vmem:[%s1109_s1 + $0x48] sm:$0xff]   ;;  %v826_v8 = vld [vmem:[%s1109_s1 + $0x50] sm:$0xff]  }
   0x2   :  { %v819_v1 = vld [vmem:[%s1109_s1 + $0xc0] sm:$0xff]   ;;  %737 = vmatprep.subr.bf16.mxu0 %v818_v0  ;;  %v823_v5 = vld [vmem:[%s1109_s1 + $0xc8] sm:$0xff]   ;;  %v827_v9 = vld [vmem:[%s1109_s1 + $0xd0] sm:$0xff]   ;;  %v592_v51 = vshrl.u32 %v591_v48, 7 }
   0x3   :  { %v820_v2 = vld [vmem:[%s1109_s1] sm:$0xff]   ;;  %777 = vmatprep.subr.bf16.mxu1 %v819_v1  ;;  %v824_v6 = vld [vmem:[%s1109_s1 + $0x8] sm:$0xff]   ;;  %v828_v10 = vld [vmem:[%s1109_s1 + $0x10] sm:$0xff]   ;;  %v874_v1 = vmov 0  }
   0x4   :  { %v821_v3 = vld [vmem:[%s1109_s1 + $0x80] sm:$0xff]   ;;  %738 = vmatpush3.bf16.msra.mxu0 %v820_v2  ;;  %v825_v7 = vld [vmem:[%s1109_s1 + $0x88] sm:$0xff]   ;;  %v829_v11 = vld [vmem:[%s1109_s1 + $0x90] sm:$0xff]   ;;  %v593_v61 = vsub.s32 0, %v592_v51 }
   0x5   :  { %778 = vmatpush3.bf16.msra.mxu1 %v821_v3  ;;  %739 = vmatprep.subr.bf16.mxu0 %v822_v4  ;;  %v830_v12 = vld [vmem:[%s1109_s1 + $0x58] sm:$0xff]   ;;  %v834_v16 = vld [vmem:[%s1109_s1 + $0x60] sm:$0xff]   ;;  %v838_v20 = vld [vmem:[%s1109_s1 + $0x68] sm:$0xff]  }
   0x6   :  { %779 = vmatprep.subr.bf16.mxu1 %v823_v5  ;;  %v831_v13 = vld [vmem:[%s1109_s1 + $0xd8] sm:$0xff]   ;;  %v835_v17 = vld [vmem:[%s1109_s1 + $0xe0] sm:$0xff]   ;;  %v839_v21 = vld [vmem:[%s1109_s1 + $0xe8] sm:$0xff]  }
   0x7   :  { %v832_v14 = vld [vmem:[%s1109_s1 + $0x18] sm:$0xff]   ;;  %v836_v18 = vld [vmem:[%s1109_s1 + $0x20] sm:$0xff]   ;;  %v840_v22 = vld [vmem:[%s1109_s1 + $0x28] sm:$0xff]  }
   0x8   :  { %740 = vmatpush3.bf16.msra.mxu0 %v824_v6  ;;  %v833_v15 = vld [vmem:[%s1109_s1 + $0x98] sm:$0xff]   ;;  %v837_v19 = vld [vmem:[%s1109_s1 + $0xa0] sm:$0xff]   ;;  %v841_v23 = vld [vmem:[%s1109_s1 + $0xa8] sm:$0xff]  }
   0x9   :  { %780 = vmatpush3.bf16.msra.mxu1 %v825_v7  ;;  %741 = vmatprep.subr.bf16.mxu0 %v826_v8  ;;  %v842_v24 = vld [vmem:[%s1109_s1 + $0x70] sm:$0xff]   ;;  %v846_v28 = vld [vmem:[%s1109_s1 + $0x78] sm:$0xff]   ;;  %v580_v49 = vld [vmem:[%s1111_s4] sm:$0x1] }
   0xa   :  { %781 = vmatprep.subr.bf16.mxu1 %v827_v9  ;;  %v843_v25 = vld [vmem:[%s1109_s1 + $0xf0] sm:$0xff]   ;;  %v847_v29 = vld [vmem:[%s1109_s1 + $0xf8] sm:$0xff]   ;;  %vm581_vm0 = vcmp.ne.f32.partialorder %v580_v49, 0.0  ;;  %v1055_v60 = vld [vmem:[%s1112_s2] ss:$0 sm:$0xff] }
   0xb   :  { %v844_v26 = vld [vmem:[%s1109_s1 + $0x30] sm:$0xff]   ;;  %v848_v30 = vld [vmem:[%s1109_s1 + $0x38] sm:$0xff]   ;;  %v590_v2 = vsel %vm581_vm0, 1, %v874_v1  ;;  %v1060_v4 = vld [vmem:[%s1113_s3] ss:$0 sm:$0xff] }
   0xc   :  { %742 = vmatpush3.bf16.msra.mxu0 %v828_v10  ;;  %v845_v27 = vld [vmem:[%s1109_s1 + $0xb0] sm:$0xff]   ;;  %v849_v31 = vld [vmem:[%s1109_s1 + $0xb8] sm:$0xff]   ;;  %v1063_v7 = vrot.slane %v590_v2, %v593_v61 }
   0xd   :  { %782 = vmatpush3.bf16.msra.mxu1 %v829_v11  ;;  %743 = vmatprep.subr.bf16.mxu0 %v830_v12  ;;  %v850_v32 = vld [vmem:[%s1110_s0] ss:$16 sps:$4 sm:$0xff]   ;;  %v852_v33 = vld [vmem:[%s1110_s0 + $0x4] ss:$16 sps:$4 sm:$0xff]   ;;  %v853_v34 = vld [vmem:[%s1110_s0 + $0x8] ss:$16 sps:$4 sm:$0xff]  }
   0xe   :  { %783 = vmatprep.subr.bf16.mxu1 %v831_v13  ;;  %v855_v35 = vld [vmem:[%s1110_s0 + $0xc] ss:$16 sps:$4 sm:$0xff]   ;;  %425 = vmatprep.mubr.bf16.mxu0 %v852_v33  ;;  %v856_v36 = vld [vmem:[%s1110_s0 + $0x24] ss:$16 sps:$4 sm:$0xff]   ;;  %v860_v38 = vld [vmem:[%s1110_s0 + $0x20] ss:$16 sps:$4 sm:$0xff]  }
   0xf   :  { %490 = vmatprep.mubr.bf16.mxu1 %v855_v35  ;;  %v858_v37 = vld [vmem:[%s1110_s0 + $0x2c] ss:$16 sps:$4 sm:$0xff]   ;;  %v861_v39 = vld [vmem:[%s1110_s0 + $0x28] ss:$16 sps:$4 sm:$0xff]   ;;  %v862_v40 = vld [vmem:[%s1110_s0 + $0x44] ss:$16 sps:$4 sm:$0xff]  }
  0x10   :  { %744 = vmatpush3.bf16.msra.mxu0 %v832_v14  ;;  %v864_v41 = vld [vmem:[%s1110_s0 + $0x4c] ss:$16 sps:$4 sm:$0xff]   ;;  %v866_v42 = vld [vmem:[%s1110_s0 + $0x40] ss:$16 sps:$4 sm:$0xff]   ;;  %v867_v43 = vld [vmem:[%s1110_s0 + $0x48] ss:$16 sps:$4 sm:$0xff]  }
  0x11   :  { %784 = vmatpush3.bf16.msra.mxu1 %v833_v15  ;;  %745 = vmatprep.subr.bf16.mxu0 %v834_v16  ;;  %v868_v44 = vld [vmem:[%s1110_s0 + $0x64] ss:$16 sps:$4 sm:$0xff]   ;;  %v870_v45 = vld [vmem:[%s1110_s0 + $0x6c] ss:$16 sps:$4 sm:$0xff]   ;;  %v872_v46 = vld [vmem:[%s1110_s0 + $0x60] ss:$16 sps:$4 sm:$0xff]  }
  0x12   :  { %785 = vmatprep.subr.bf16.mxu1 %v835_v17  ;;  %v873_v47 = vld [vmem:[%s1110_s0 + $0x68] ss:$16 sps:$4 sm:$0xff]   ;;  %vm595_vm1 = vcmp.eq.s32.totalorder %v1063_v7, 1 }
  0x14   :  { %746 = vmatpush3.bf16.msra.mxu0 %v836_v18 }
  0x15   :  { %786 = vmatpush3.bf16.msra.mxu1 %v837_v19  ;;  %747 = vmatprep.subr.bf16.mxu0 %v838_v20 }
  0x16   :  { %787 = vmatprep.subr.bf16.mxu1 %v839_v21 }
  0x18   :  { %748 = vmatpush3.bf16.msra.mxu0 %v840_v22 }
  0x19   :  { %788 = vmatpush3.bf16.msra.mxu1 %v841_v23  ;;  %749 = vmatprep.subr.bf16.mxu0 %v842_v24 }
  0x1a   :  { %789 = vmatprep.subr.bf16.mxu1 %v843_v25 }
  0x1c   :  { %750 = vmatpush3.bf16.msra.mxu0 %v844_v26 }
  0x1d   :  { %790 = vmatpush3.bf16.msra.mxu1 %v845_v27  ;;  %751 = vmatprep.subr.bf16.mxu0 %v846_v28 }
  0x1e   :  { %791 = vmatprep.subr.bf16.mxu1 %v847_v29 }
  0x20   :  { %752 = vmatpush3.bf16.msra.mxu0 %v848_v30 }
  0x21   :  { %792 = vmatpush3.bf16.msra.mxu1 %v849_v31 }
  0x23   :  { %426 = vmatmul.mubr.bf16.vlgmr.msra.gmra.mrb[0].mxu0 %v850_v32 }
  0x24   :  { %491 = vmatmul.mubr.bf16.vlgmr.msra.gmra.mrb[0].mxu1 %v853_v34  ;;  %433 = vmatprep.mubr.bf16.mxu0 %v856_v36 }
  0x25   :  { %498 = vmatprep.mubr.bf16.mxu1 %v858_v37 }
  0x2b   :  { %434 = vmatmul.mubr.bf16.gmra.mrb[4].mxu0 %v860_v38 }
  0x2c   :  { %499 = vmatmul.mubr.bf16.gmra.mrb[4].mxu1 %v861_v39  ;;  %441 = vmatprep.mubr.bf16.mxu0 %v862_v40 }
  0x2d   :  { %506 = vmatprep.mubr.bf16.mxu1 %v864_v41 }
  0x33   :  { %442 = vmatmul.mubr.bf16.gmra.mrb[8].mxu0 %v866_v42 }
  0x34   :  { %507 = vmatmul.mubr.bf16.gmra.mrb[8].mxu1 %v867_v43  ;;  %449 = vmatprep.mubr.bf16.mxu0 %v868_v44 }
  0x35   :  { %514 = vmatprep.mubr.bf16.mxu1 %v870_v45 }
  0x3b   :  { %450 = vmatmul.mubr.bf16.gmra.mrb[12].mxu0 %v872_v46 }
  0x3c   :  { %515 = vmatmul.mubr.bf16.gmra.mrb[12].mxu1 %v873_v47 }
  0xf6   :  { %v753_v50 = vpop.f32.mrb[0].mxu0 }
  0xf7   :  { %v793_v52 = vpop.f32.mrb[0].mxu1  ;;  %v754_v53 = vpop.f32.mrb[1].mxu0 }
  0xf8   :  { %v755_v54 = vadd.f32 %v754_v53, %v753_v50  ;;  %v794_v55 = vpop.f32.mrb[1].mxu1  ;;  %v756_v56 = vpop.f32.mrb[2].mxu0 }
  0xf9   :  { %v795_v57 = vadd.f32 %v794_v55, %v793_v52  ;;  %v796_v58 = vpop.f32.mrb[2].mxu1  ;;  %v757_v59 = vpop.f32.mrb[3].mxu0 }
  0xfa   :  { %v758_v62 = vadd.f32 %v757_v59, %v756_v56  ;;  %v797_v63 = vpop.f32.mrb[3].mxu1 }
  0xfb   :  { %v493_v0 = vadd.f32 %v795_v57, %v755_v54  ;;  %v798_v3 = vadd.f32 %v797_v63, %v796_v58 }
  0xfd   :  { %v557_v5 = vmul.f32 %v1055_v60, %v493_v0  ;;  %v496_v6 = vadd.f32 %v798_v3, %v758_v62 }
  0xfe   :  { %v759_v8 = vpop.f32.mrb[4].mxu0 }
  0xff   :  { %v572_v9 = vadd.f32 %v1060_v4, %v557_v5  ;;  %v558_v10 = vmul.f32 %v1055_v60, %v496_v6  ;;  %v799_v11 = vpop.f32.mrb[4].mxu1  ;;  %v760_v12 = vpop.f32.mrb[5].mxu0 }
 0x100   :  { %v761_v13 = vadd.f32 %v760_v12, %v759_v8  ;;  %v800_v14 = vpop.f32.mrb[5].mxu1  ;;  %v762_v15 = vpop.f32.mrb[6].mxu0 }
 0x101   :  { %v582_v16 = vmax.f32 %v572_v9, 0.0  ;;  %v573_v17 = vadd.f32 %v1060_v4, %v558_v10  ;;  %v801_v18 = vadd.f32 %v800_v14, %v799_v11  ;;  %v802_v19 = vpop.f32.mrb[6].mxu1  ;;  %v763_v20 = vpop.f32.mrb[7].mxu0 }
 0x102   :  { %v764_v21 = vadd.f32 %v763_v20, %v762_v15  ;;  %v803_v22 = vpop.f32.mrb[7].mxu1 }
 0x103   :  { %v583_v23 = vmax.f32 %v573_v17, 0.0  ;;  %v501_v24 = vadd.f32 %v801_v18, %v761_v13  ;;  %v804_v25 = vadd.f32 %v803_v22, %v802_v19  ;;  %v596_v26 = vsel %vm595_vm1, %v582_v16, %v572_v9 }
 0x105   :  { %v597_v27 = vsel %vm595_vm1, %v583_v23, %v573_v17  ;;  %v559_v28 = vmul.f32 %v1055_v60, %v501_v24  ;;  %v504_v29 = vadd.f32 %v804_v25, %v764_v21 }
 0x106   :  { %v717_v30 = vpack.c.bf16 %v597_v27, %v596_v26  ;;  %v765_v31 = vpop.f32.mrb[8].mxu0 }
 0x107   :  { %v574_v32 = vadd.f32 %v1060_v4, %v559_v28  ;;  %v560_v33 = vmul.f32 %v1055_v60, %v504_v29  ;;  %v805_v34 = vpop.f32.mrb[8].mxu1  ;;  %v766_v35 = vpop.f32.mrb[9].mxu0 }
 0x108   :  { %718 = vst [vmem:[%s1114_s5] sm:$0xff] %v717_v30   ;;  %v767_v36 = vadd.f32 %v766_v35, %v765_v31  ;;  %v806_v37 = vpop.f32.mrb[9].mxu1  ;;  %v768_v38 = vpop.f32.mrb[10].mxu0 }
 0x109   :  { %v584_v39 = vmax.f32 %v574_v32, 0.0  ;;  %v575_v40 = vadd.f32 %v1060_v4, %v560_v33  ;;  %v807_v41 = vadd.f32 %v806_v37, %v805_v34  ;;  %v808_v42 = vpop.f32.mrb[10].mxu1  ;;  %v769_v43 = vpop.f32.mrb[11].mxu0 }
 0x10a   :  { %v770_v44 = vadd.f32 %v769_v43, %v768_v38  ;;  %v809_v45 = vpop.f32.mrb[11].mxu1 }
 0x10b   :  { %v585_v46 = vmax.f32 %v575_v40, 0.0  ;;  %v509_v47 = vadd.f32 %v807_v41, %v767_v36  ;;  %v810_v48 = vadd.f32 %v809_v45, %v808_v42  ;;  %v598_v49 = vsel %vm595_vm1, %v584_v39, %v574_v32 }
 0x10d   :  { %v599_v50 = vsel %vm595_vm1, %v585_v46, %v575_v40  ;;  %v561_v51 = vmul.f32 %v1055_v60, %v509_v47  ;;  %v512_v52 = vadd.f32 %v810_v48, %v770_v44 }
 0x10e   :  { %v722_v53 = vpack.c.bf16 %v599_v50, %v598_v49  ;;  %v771_v54 = vpop.f32.mrb[12].mxu0 }
 0x10f   :  { %v576_v55 = vadd.f32 %v1060_v4, %v561_v51  ;;  %v562_v56 = vmul.f32 %v1055_v60, %v512_v52  ;;  %v811_v57 = vpop.f32.mrb[12].mxu1  ;;  %v772_v58 = vpop.f32.mrb[13].mxu0 }
 0x110   :  { %734 = vst [vmem:[%s1114_s5 + $0x8] sm:$0xff] %v722_v53   ;;  %v773_v59 = vadd.f32 %v772_v58, %v771_v54  ;;  %v812_v61 = vpop.f32.mrb[13].mxu1  ;;  %v774_v62 = vpop.f32.mrb[14].mxu0 }
 0x111   :  { %v586_v63 = vmax.f32 %v576_v55, 0.0  ;;  %v577_v0 = vadd.f32 %v1060_v4, %v562_v56  ;;  %v813_v1 = vadd.f32 %v812_v61, %v811_v57  ;;  %v814_v2 = vpop.f32.mrb[14].mxu1  ;;  %v775_v3 = vpop.f32.mrb[15].mxu0 }
 0x112   :  { %v776_v5 = vadd.f32 %v775_v3, %v774_v62  ;;  %v815_v6 = vpop.f32.mrb[15].mxu1 }
 0x113   :  { %v587_v8 = vmax.f32 %v577_v0, 0.0  ;;  %v517_v9 = vadd.f32 %v813_v1, %v773_v59  ;;  %v816_v10 = vadd.f32 %v815_v6, %v814_v2  ;;  %v600_v11 = vsel %vm595_vm1, %v586_v63, %v576_v55 }
 0x115   :  { %v601_v12 = vsel %vm595_vm1, %v587_v8, %v577_v0  ;;  %v563_v13 = vmul.f32 %v1055_v60, %v517_v9  ;;  %v520_v14 = vadd.f32 %v816_v10, %v776_v5 }
 0x116   :  { %v727_v15 = vpack.c.bf16 %v601_v12, %v600_v11 }
 0x117   :  { %v578_v16 = vadd.f32 %v1060_v4, %v563_v13  ;;  %v564_v17 = vmul.f32 %v1055_v60, %v520_v14 }
 0x118   :  { %735 = vst [vmem:[%s1114_s5 + $0x10] sm:$0xff] %v727_v15  }
 0x119   :  { %v588_v18 = vmax.f32 %v578_v16, 0.0  ;;  %v579_v19 = vadd.f32 %v1060_v4, %v564_v17 }
 0x11b   :  { %v589_v20 = vmax.f32 %v579_v19, 0.0  ;;  %v602_v21 = vsel %vm595_vm1, %v588_v18, %v578_v16 }
 0x11d   :  { %v603_v22 = vsel %vm595_vm1, %v589_v20, %v579_v19 }
 0x11e   :  { %v732_v23 = vpack.c.bf16 %v603_v22, %v602_v21 }
 0x120   :  { %736 = vst [vmem:[%s1114_s5 + $0x18] sm:$0xff] %v732_v23  }

// kernel: _lambda_.15
= control target key start
LH: loop header
LB: loop body
LE: loop exit
PB: predicated region body
PF: predicated region fallthrough
CT: control target
= control target key end

     0   :  { %s1855_s1 = inlined_call_operand.vmem [shape: bf16[896,128], index: 1, kind: input, shape index: {}]   ;;  %s1856_s0 = inlined_call_operand.vmem [shape: bf16[64,896], index: 0, kind: input, shape index: {}]   ;;  %s1857_s4 = inlined_call_operand.vmem [shape: f32[1,128], index: 4, kind: input, shape index: {}]   ;;  %s1858_s2 = inlined_call_operand.vmem [shape: f32[1,128], index: 2, kind: input, shape index: {}]   ;;  %s1859_s5 = inlined_call_operand.vmem [shape: bf16[64,128], index: 5, kind: input, shape index: {}]   ;;  %s1860_s3 = inlined_call_operand.vmem [shape: f32[1,128], index: 3, kind: input, shape index: {}]   ;;  %s1861_s6 = inlined_call_operand.vmem [shape: bf16[64,128], index: 6, kind: output, shape index: {}]  }
   0x1   :  { %v1378_v0 = vld [vmem:[%s1855_s1 + $0x40] sm:$0xff]   ;;  %v1382_v4 = vld [vmem:[%s1855_s1 + $0x48] sm:$0xff]   ;;  %v1386_v8 = vld [vmem:[%s1855_s1 + $0x50] sm:$0xff]  }
   0x2   :  { %v1379_v1 = vld [vmem:[%s1855_s1 + $0xc0] sm:$0xff]   ;;  %1221 = vmatprep.subr.bf16.mxu0 %v1378_v0  ;;  %v1383_v5 = vld [vmem:[%s1855_s1 + $0xc8] sm:$0xff]   ;;  %v1387_v9 = vld [vmem:[%s1855_s1 + $0xd0] sm:$0xff]  }
   0x3   :  { %v1380_v2 = vld [vmem:[%s1855_s1] sm:$0xff]   ;;  %1261 = vmatprep.subr.bf16.mxu1 %v1379_v1  ;;  %v1384_v6 = vld [vmem:[%s1855_s1 + $0x8] sm:$0xff]   ;;  %v1388_v10 = vld [vmem:[%s1855_s1 + $0x10] sm:$0xff]  }
   0x4   :  { %v1381_v3 = vld [vmem:[%s1855_s1 + $0x80] sm:$0xff]   ;;  %1222 = vmatpush3.bf16.msra.mxu0 %v1380_v2  ;;  %v1385_v7 = vld [vmem:[%s1855_s1 + $0x88] sm:$0xff]   ;;  %v1389_v11 = vld [vmem:[%s1855_s1 + $0x90] sm:$0xff]  }
   0x5   :  { %1262 = vmatpush3.bf16.msra.mxu1 %v1381_v3  ;;  %1223 = vmatprep.subr.bf16.mxu0 %v1382_v4  ;;  %v1390_v12 = vld [vmem:[%s1855_s1 + $0x58] sm:$0xff]   ;;  %v1394_v16 = vld [vmem:[%s1855_s1 + $0x60] sm:$0xff]   ;;  %v1398_v20 = vld [vmem:[%s1855_s1 + $0x68] sm:$0xff]  }
   0x6   :  { %1263 = vmatprep.subr.bf16.mxu1 %v1383_v5  ;;  %v1391_v13 = vld [vmem:[%s1855_s1 + $0xd8] sm:$0xff]   ;;  %v1395_v17 = vld [vmem:[%s1855_s1 + $0xe0] sm:$0xff]   ;;  %v1399_v21 = vld [vmem:[%s1855_s1 + $0xe8] sm:$0xff]  }
   0x7   :  { %v1392_v14 = vld [vmem:[%s1855_s1 + $0x18] sm:$0xff]   ;;  %v1396_v18 = vld [vmem:[%s1855_s1 + $0x20] sm:$0xff]   ;;  %v1400_v22 = vld [vmem:[%s1855_s1 + $0x28] sm:$0xff]  }
   0x8   :  { %1224 = vmatpush3.bf16.msra.mxu0 %v1384_v6  ;;  %v1393_v15 = vld [vmem:[%s1855_s1 + $0x98] sm:$0xff]   ;;  %v1397_v19 = vld [vmem:[%s1855_s1 + $0xa0] sm:$0xff]   ;;  %v1401_v23 = vld [vmem:[%s1855_s1 + $0xa8] sm:$0xff]  }
   0x9   :  { %1264 = vmatpush3.bf16.msra.mxu1 %v1385_v7  ;;  %1225 = vmatprep.subr.bf16.mxu0 %v1386_v8  ;;  %v1402_v24 = vld [vmem:[%s1855_s1 + $0x70] sm:$0xff]   ;;  %v1406_v28 = vld [vmem:[%s1855_s1 + $0x78] sm:$0xff]   ;;  %v1412_v33 = vld [vmem:[%s1856_s0 + $0x4] ss:$28 sps:$4 sm:$0xff]  }
   0xa   :  { %1265 = vmatprep.subr.bf16.mxu1 %v1387_v9  ;;  %v1403_v25 = vld [vmem:[%s1855_s1 + $0xf0] sm:$0xff]   ;;  %v1407_v29 = vld [vmem:[%s1855_s1 + $0xf8] sm:$0xff]   ;;  %v1413_v34 = vld [vmem:[%s1856_s0 + $0x8] ss:$28 sps:$4 sm:$0xff]   ;;  %700 = vmatprep.mubr.bf16.mxu0 %v1412_v33 }
   0xb   :  { %v1404_v26 = vld [vmem:[%s1855_s1 + $0x30] sm:$0xff]   ;;  %v1408_v30 = vld [vmem:[%s1855_s1 + $0x38] sm:$0xff]   ;;  %v1415_v35 = vld [vmem:[%s1856_s0 + $0xc] ss:$28 sps:$4 sm:$0xff]  }
   0xc   :  { %1226 = vmatpush3.bf16.msra.mxu0 %v1388_v10  ;;  %v1405_v27 = vld [vmem:[%s1855_s1 + $0xb0] sm:$0xff]   ;;  %v1409_v31 = vld [vmem:[%s1855_s1 + $0xb8] sm:$0xff]   ;;  %v1416_v36 = vld [vmem:[%s1855_s1 + $0x140] sm:$0xff]   ;;  %765 = vmatprep.mubr.bf16.mxu1 %v1415_v35 }
   0xd   :  { %1266 = vmatpush3.bf16.msra.mxu1 %v1389_v11  ;;  %1227 = vmatprep.subr.bf16.mxu0 %v1390_v12  ;;  %v1410_v32 = vld [vmem:[%s1856_s0] ss:$28 sps:$4 sm:$0xff]   ;;  %v1418_v38 = vld [vmem:[%s1855_s1 + $0x148] sm:$0xff]   ;;  %v1425_v43 = vld [vmem:[%s1856_s0 + $0x38] ss:$28 sps:$4 sm:$0xff]  }
   0xe   :  { %1267 = vmatprep.subr.bf16.mxu1 %v1391_v13  ;;  %v1417_v37 = vld [vmem:[%s1855_s1 + $0x100] sm:$0xff]   ;;  %v1420_v40 = vld [vmem:[%s1855_s1 + $0x108] sm:$0xff]   ;;  %v1421_v41 = vld [vmem:[%s1856_s0 + $0x3c] ss:$28 sps:$4 sm:$0xff]  }
   0xf   :  { %v1419_v39 = vld [vmem:[%s1855_s1 + $0x180] sm:$0xff]   ;;  %v1427_v45 = vld [vmem:[%s1855_s1 + $0x150] sm:$0xff]   ;;  %v1428_v46 = vld [vmem:[%s1855_s1 + $0x188] sm:$0xff]  }
  0x10   :  { %1228 = vmatpush3.bf16.msra.mxu0 %v1392_v14  ;;  %v1423_v42 = vld [vmem:[%s1856_s0 + $0x44] ss:$28 sps:$4 sm:$0xff]   ;;  %v1429_v47 = vld [vmem:[%s1855_s1 + $0x110] sm:$0xff]   ;;  %v1430_v48 = vld [vmem:[%s1855_s1 + $0x158] sm:$0xff]  }
  0x11   :  { %1268 = vmatpush3.bf16.msra.mxu1 %v1393_v15  ;;  %1229 = vmatprep.subr.bf16.mxu0 %v1394_v16  ;;  %v1426_v44 = vld [vmem:[%s1856_s0 + $0x40] ss:$28 sps:$4 sm:$0xff]   ;;  %v1431_v49 = vld [vmem:[%s1855_s1 + $0x190] sm:$0xff]   ;;  %v1442_v58 = vld [vmem:[%s1855_s1 + $0x168] sm:$0xff]  }
  0x12   :  { %1269 = vmatprep.subr.bf16.mxu1 %v1395_v17  ;;  %v1432_v50 = vld [vmem:[%s1855_s1 + $0x118] sm:$0xff]   ;;  %v1433_v51 = vld [vmem:[%s1856_s0 + $0x74] ss:$28 sps:$4 sm:$0xff]   ;;  %v1439_v55 = vld [vmem:[%s1855_s1 + $0x160] sm:$0xff]  }
  0x13   :  { %v1435_v52 = vld [vmem:[%s1856_s0 + $0x7c] ss:$28 sps:$4 sm:$0xff]   ;;  %v1437_v53 = vld [vmem:[%s1856_s0 + $0x70] ss:$28 sps:$4 sm:$0xff]   ;;  %v1441_v57 = vld [vmem:[%s1855_s1 + $0x120] sm:$0xff]  }
  0x14   :  { %1230 = vmatpush3.bf16.msra.mxu0 %v1396_v18  ;;  %v1438_v54 = vld [vmem:[%s1856_s0 + $0x78] ss:$28 sps:$4 sm:$0xff]   ;;  %v1443_v59 = vld [vmem:[%s1855_s1 + $0x1a0] sm:$0xff]   ;;  %v1444_v60 = vld [vmem:[%s1855_s1 + $0x128] sm:$0xff]  }
  0x15   :  { %1270 = vmatpush3.bf16.msra.mxu1 %v1397_v19  ;;  %1231 = vmatprep.subr.bf16.mxu0 %v1398_v20  ;;  %v1440_v56 = vld [vmem:[%s1855_s1 + $0x198] sm:$0xff]   ;;  %v1445_v61 = vld [vmem:[%s1856_s0 + $0xac] ss:$28 sps:$4 sm:$0xff]   ;;  %v1447_v62 = vld [vmem:[%s1856_s0 + $0xb4] ss:$28 sps:$4 sm:$0xff]  }
  0x16   :  { %1271 = vmatprep.subr.bf16.mxu1 %v1399_v21  ;;  %v1449_v63 = vld [vmem:[%s1856_s0 + $0xa8] ss:$28 sps:$4 sm:$0xff]   ;;  %v1450_v0 = vld [vmem:[%s1856_s0 + $0xb0] ss:$28 sps:$4 sm:$0xff]   ;;  %v1454_v4 = vld [vmem:[%s1855_s1 + $0x178] sm:$0xff]  }
  0x17   :  { %v1451_v1 = vld [vmem:[%s1855_s1 + $0x170] sm:$0xff]   ;;  %v1452_v2 = vld [vmem:[%s1855_s1 + $0x1a8] sm:$0xff]   ;;  %v1456_v6 = vld [vmem:[%s1855_s1 + $0x138] sm:$0xff]  }
  0x18   :  { %1232 = vmatpush3.bf16.msra.mxu0 %v1400_v22  ;;  %v1453_v3 = vld [vmem:[%s1855_s1 + $0x130] sm:$0xff]   ;;  %v1460_v9 = vld [vmem:[%s1855_s1 + $0x1b8] sm:$0xff]   ;;  %v1463_v11 = vld [vmem:[%s1856_s0 + $0x4c] ss:$28 sps:$4 sm:$0xff]  }
  0x19   :  { %1272 = vmatpush3.bf16.msra.mxu1 %v1401_v23  ;;  %1233 = vmatprep.subr.bf16.mxu0 %v1402_v24  ;;  %v1455_v5 = vld [vmem:[%s1855_s1 + $0x1b0] sm:$0xff]   ;;  %v1469_v13 = vld [vmem:[%s1856_s0 + $0x88] ss:$28 sps:$4 sm:$0xff]   ;;  %v1470_v16 = vld [vmem:[%s1856_s0 + $0xc0] ss:$28 sps:$4 sm:$0xff]  }
  0x1a   :  { %1273 = vmatprep.subr.bf16.mxu1 %v1403_v25  ;;  %v1457_v7 = vld [vmem:[%s1856_s0 + $0x10] ss:$28 sps:$4 sm:$0xff]   ;;  %v1461_v10 = vld [vmem:[%s1856_s0 + $0x18] ss:$28 sps:$4 sm:$0xff]   ;;  %v1465_v14 = vld [vmem:[%s1856_s0 + $0x48] ss:$28 sps:$4 sm:$0xff]  }
  0x1b   :  { %v1459_v8 = vld [vmem:[%s1856_s0 + $0x14] ss:$28 sps:$4 sm:$0xff]   ;;  %v1466_v15 = vld [vmem:[%s1856_s0 + $0x84] ss:$28 sps:$4 sm:$0xff]   ;;  %v1471_v18 = vld [vmem:[%s1856_s0 + $0xbc] ss:$28 sps:$4 sm:$0xff]  }
  0x1c   :  { %1234 = vmatpush3.bf16.msra.mxu0 %v1404_v26  ;;  %v1462_v12 = vld [vmem:[%s1856_s0 + $0x50] ss:$28 sps:$4 sm:$0xff]   ;;  %v1468_v17 = vld [vmem:[%s1856_s0 + $0x80] ss:$28 sps:$4 sm:$0xff]   ;;  %v1473_v19 = vld [vmem:[%s1856_s0 + $0xb8] ss:$28 sps:$4 sm:$0xff]  }
  0x1d   :  { %1274 = vmatpush3.bf16.msra.mxu1 %v1405_v27  ;;  %1235 = vmatprep.subr.bf16.mxu0 %v1406_v28 }
  0x1e   :  { %1275 = vmatprep.subr.bf16.mxu1 %v1407_v29 }
  0x20   :  { %1236 = vmatpush3.bf16.msra.mxu0 %v1408_v30 }
  0x21   :  { %1276 = vmatpush3.bf16.msra.mxu1 %v1409_v31  ;;  %1301 = vmatprep.subr.bf16.mxu0 %v1416_v36 }
  0x22   :  { %1353 = vmatprep.subr.bf16.mxu1 %v1419_v39 }
  0x23   :  { %701 = vmatmul.mubr.bf16.vlgmr.msra.gmra.mrb[0].mxu0 %v1410_v32 }
  0x24   :  { %766 = vmatmul.mubr.bf16.vlgmr.msra.gmra.mrb[0].mxu1 %v1413_v34  ;;  %1302 = vmatpush3.bf16.msra.mxu0 %v1417_v37 }
  0x25   :  { %1303 = vmatprep.subr.bf16.mxu0 %v1418_v38  ;;  %1354 = vmatpush3.bf16.msra.mxu1 %v1419_v39 }
  0x26   :  { %708 = vmatprep.mubr.bf16.mxu0 %v1421_v41  ;;  %773 = vmatprep.mubr.bf16.mxu1 %v1423_v42 }
  0x27   :  { %1355 = vmatprep.subr.bf16.mxu1 %v1428_v46 }
  0x28   :  { %1304 = vmatpush3.bf16.msra.mxu0 %v1420_v40 }
  0x29   :  { %1305 = vmatprep.subr.bf16.mxu0 %v1427_v45  ;;  %1356 = vmatpush3.bf16.msra.mxu1 %v1428_v46 }
  0x2a   :  { %1357 = vmatprep.subr.bf16.mxu1 %v1431_v49 }
  0x2b   :  { %709 = vmatmul.mubr.bf16.gmra.mrb[4].mxu0 %v1425_v43 }
  0x2c   :  { %774 = vmatmul.mubr.bf16.gmra.mrb[4].mxu1 %v1426_v44  ;;  %1306 = vmatpush3.bf16.msra.mxu0 %v1429_v47 }
  0x2d   :  { %1307 = vmatprep.subr.bf16.mxu0 %v1430_v48  ;;  %1358 = vmatpush3.bf16.msra.mxu1 %v1431_v49 }
  0x2e   :  { %716 = vmatprep.mubr.bf16.mxu0 %v1433_v51  ;;  %781 = vmatprep.mubr.bf16.mxu1 %v1435_v52 }
  0x2f   :  { %1359 = vmatprep.subr.bf16.mxu1 %v1440_v56 }
  0x30   :  { %1308 = vmatpush3.bf16.msra.mxu0 %v1432_v50 }
  0x31   :  { %1309 = vmatprep.subr.bf16.mxu0 %v1439_v55  ;;  %1360 = vmatpush3.bf16.msra.mxu1 %v1440_v56 }
  0x32   :  { %1361 = vmatprep.subr.bf16.mxu1 %v1443_v59 }
  0x33   :  { %717 = vmatmul.mubr.bf16.gmra.mrb[8].mxu0 %v1437_v53 }
  0x34   :  { %782 = vmatmul.mubr.bf16.gmra.mrb[8].mxu1 %v1438_v54  ;;  %1310 = vmatpush3.bf16.msra.mxu0 %v1441_v57 }
  0x35   :  { %1311 = vmatprep.subr.bf16.mxu0 %v1442_v58  ;;  %1362 = vmatpush3.bf16.msra.mxu1 %v1443_v59 }
  0x36   :  { %724 = vmatprep.mubr.bf16.mxu0 %v1445_v61  ;;  %789 = vmatprep.mubr.bf16.mxu1 %v1447_v62 }
  0x37   :  { %1363 = vmatprep.subr.bf16.mxu1 %v1452_v2 }
  0x38   :  { %1312 = vmatpush3.bf16.msra.mxu0 %v1444_v60 }
  0x39   :  { %1313 = vmatprep.subr.bf16.mxu0 %v1451_v1  ;;  %1364 = vmatpush3.bf16.msra.mxu1 %v1452_v2 }
  0x3a   :  { %1365 = vmatprep.subr.bf16.mxu1 %v1455_v5 }
  0x3b   :  { %725 = vmatmul.mubr.bf16.gmra.mrb[12].mxu0 %v1449_v63 }
  0x3c   :  { %790 = vmatmul.mubr.bf16.gmra.mrb[12].mxu1 %v1450_v0  ;;  %1314 = vmatpush3.bf16.msra.mxu0 %v1453_v3 }
  0x3d   :  { %1315 = vmatprep.subr.bf16.mxu0 %v1454_v4  ;;  %1366 = vmatpush3.bf16.msra.mxu1 %v1455_v5 }
  0x3e   :  { %830 = vmatprep.mubr.bf16.mxu0 %v1459_v8  ;;  %1367 = vmatprep.subr.bf16.mxu1 %v1460_v9 }
  0x3f   :  { %1369 = vmatprep.mubr.bf16.mxu1 %v1461_v10 }
  0x40   :  { %1316 = vmatpush3.bf16.msra.mxu0 %v1456_v6 }
  0x41   :  { %1368 = vmatpush3.bf16.msra.mxu1 %v1460_v9 }
  0x43   :  { %831 = vmatmul.mubr.bf16.vlgmr.msra.gmra.mrb[16].mxu0 %v1457_v7 }
  0x44   :  { %838 = vmatprep.mubr.bf16.mxu0 %v1463_v11  ;;  %1370 = vmatmul.mubr.bf16.vlgmr.msra.gmra.mrb[16].mxu1 %v1462_v12  ;;  %v1020_v12 = vlaneseq }
  0x45   :  { %1373 = vmatprep.mubr.bf16.mxu1 %v1469_v13 }
  0x4b   :  { %839 = vmatmul.mubr.bf16.gmra.mrb[20].mxu0 %v1465_v14  ;;  %v1009_v14 = vld [vmem:[%s1857_s4] sm:$0x1] }
  0x4c   :  { %846 = vmatprep.mubr.bf16.mxu0 %v1466_v15  ;;  %1374 = vmatmul.mubr.bf16.gmra.mrb[20].mxu1 %v1470_v16  ;;  %v1021_v16 = vshrl.u32 %v1020_v12, 7  ;;  %vm1010_vm0 = vcmp.ne.f32.partialorder %v1009_v14, 0.0 }
  0x53   :  { %847 = vmatmul.mubr.bf16.gmra.mrb[24].mxu0 %v1468_v17 }
  0x54   :  { %854 = vmatprep.mubr.bf16.mxu0 %v1471_v18 }
  0x5b   :  { %855 = vmatmul.mubr.bf16.gmra.mrb[28].mxu0 %v1473_v19 }
  0xf6   :  { %v1237_v20 = vpop.f32.mrb[0].mxu0 }
  0xf7   :  { %v1277_v21 = vpop.f32.mrb[0].mxu1  ;;  %v1238_v22 = vpop.f32.mrb[1].mxu0 }
  0xf8   :  { %v1239_v23 = vadd.f32 %v1238_v22, %v1237_v20  ;;  %v1278_v24 = vpop.f32.mrb[1].mxu1  ;;  %v1240_v25 = vpop.f32.mrb[2].mxu0 }
  0xf9   :  { %v1279_v26 = vadd.f32 %v1278_v24, %v1277_v21  ;;  %v1280_v27 = vpop.f32.mrb[2].mxu1  ;;  %v1241_v28 = vpop.f32.mrb[3].mxu0  ;;  %v1782_v24 = vld [vmem:[%s1858_s2] ss:$0 sm:$0xff] }
  0xfa   :  { %v1242_v29 = vadd.f32 %v1241_v28, %v1240_v25  ;;  %v1281_v30 = vpop.f32.mrb[3].mxu1  ;;  %v1180_v25 = vld [vmem:[%s1859_s5] sm:$0xff]   ;;  %v1474_v28 = vmov 0  }
  0xfb   :  { %v768_v31 = vadd.f32 %v1279_v26, %v1239_v23  ;;  %v1282_v32 = vadd.f32 %v1281_v30, %v1280_v27  ;;  %v1022_v26 = vsub.s32 0, %v1021_v16 }
  0xfd   :  { %v1762_v33 = vadd.f32 %v1282_v32, %v1242_v29  ;;  %v1019_v29 = vsel %vm1010_vm0, 1, %v1474_v28 }
  0xfe   :  { %v1243_v34 = vpop.f32.mrb[4].mxu0 }
  0xff   :  { %v1283_v35 = vpop.f32.mrb[4].mxu1  ;;  %v1244_v36 = vpop.f32.mrb[5].mxu0 }
 0x100   :  { %v1245_v37 = vadd.f32 %v1244_v36, %v1243_v34  ;;  %v1284_v38 = vpop.f32.mrb[5].mxu1  ;;  %v1246_v39 = vpop.f32.mrb[6].mxu0  ;;  %v1181_v36 = vunpack.c.l.bf16 %v1180_v25 }
 0x101   :  { %v1285_v40 = vadd.f32 %v1284_v38, %v1283_v35  ;;  %v1286_v41 = vpop.f32.mrb[6].mxu1  ;;  %v1247_v42 = vpop.f32.mrb[7].mxu0 }
 0x102   :  { %v1248_v43 = vadd.f32 %v1247_v42, %v1246_v39  ;;  %v1287_v44 = vpop.f32.mrb[7].mxu1  ;;  %v1794_v39 = vrot.slane %v1019_v29, %v1022_v26 }
 0x103   :  { %v1764_v45 = vadd.f32 %v1285_v40, %v1245_v37  ;;  %v1288_v46 = vadd.f32 %v1287_v44, %v1286_v41 }
 0x104   :  { %vm1024_vm1 = vcmp.eq.s32.totalorder %v1794_v39, 1 }
 0x105   :  { %v1766_v47 = vadd.f32 %v1288_v46, %v1248_v43  ;;  %v1182_v43 = vunpack.c.h.bf16 %v1180_v25 }
 0x106   :  { %v1249_v48 = vpop.f32.mrb[8].mxu0 }
 0x107   :  { %v1289_v49 = vpop.f32.mrb[8].mxu1  ;;  %v1250_v50 = vpop.f32.mrb[9].mxu0 }
 0x108   :  { %v1290_v51 = vpop.f32.mrb[9].mxu1  ;;  %v1251_v52 = vadd.f32 %v1250_v50, %v1249_v48  ;;  %v1252_v54 = vpop.f32.mrb[10].mxu0 }
 0x109   :  { %v1291_v53 = vadd.f32 %v1290_v51, %v1289_v49  ;;  %v1292_v55 = vpop.f32.mrb[10].mxu1  ;;  %v1253_v56 = vpop.f32.mrb[11].mxu0 }
 0x10a   :  { %v1293_v57 = vpop.f32.mrb[11].mxu1  ;;  %v1254_v59 = vadd.f32 %v1253_v56, %v1252_v54 }
 0x10b   :  { %v1768_v58 = vadd.f32 %v1291_v53, %v1251_v52  ;;  %v1294_v60 = vadd.f32 %v1293_v57, %v1292_v55  ;;  %v1215_v53 = vld [vmem:[%s1859_s5 + $0x8] sm:$0xff]  }
 0x10d   :  { %v1770_v61 = vadd.f32 %v1294_v60, %v1254_v59 }
 0x10e   :  { %v1255_v62 = vpop.f32.mrb[12].mxu0 }
 0x10f   :  { %v1295_v63 = vpop.f32.mrb[12].mxu1  ;;  %v1256_v0 = vpop.f32.mrb[13].mxu0 }
 0x110   :  { %v1296_v1 = vpop.f32.mrb[13].mxu1  ;;  %v1257_v2 = vadd.f32 %v1256_v0, %v1255_v62  ;;  %v1258_v4 = vpop.f32.mrb[14].mxu0 }
 0x111   :  { %v1297_v3 = vadd.f32 %v1296_v1, %v1295_v63  ;;  %v1298_v5 = vpop.f32.mrb[14].mxu1  ;;  %v1259_v6 = vpop.f32.mrb[15].mxu0 }
 0x112   :  { %v1299_v7 = vpop.f32.mrb[15].mxu1  ;;  %v1260_v9 = vadd.f32 %v1259_v6, %v1258_v4  ;;  %v1186_v4 = vunpack.c.h.bf16 %v1215_v53 }
 0x113   :  { %v1772_v8 = vadd.f32 %v1297_v3, %v1257_v2  ;;  %v1300_v10 = vadd.f32 %v1299_v7, %v1298_v5 }
 0x115   :  { %v1774_v11 = vadd.f32 %v1300_v10, %v1260_v9 }
 0x116   :  { %v1317_v13 = vpop.f32.mrb[16].mxu0 }
 0x117   :  { %v1318_v15 = vpop.f32.mrb[17].mxu0  ;;  %v1371_v21 = vpop.f32.mrb[16].mxu1 }
 0x118   :  { %v1319_v17 = vadd.f32 %v1318_v15, %v1317_v13  ;;  %v1320_v18 = vpop.f32.mrb[18].mxu0  ;;  %v897_v23 = vpop.f32.mrb[17].mxu1 }
 0x119   :  { %v1321_v19 = vpop.f32.mrb[19].mxu0  ;;  %v1372_v30 = vpop.f32.mrb[18].mxu1 }
 0x11a   :  { %v1322_v20 = vadd.f32 %v1321_v19, %v1320_v18  ;;  %v833_v22 = vadd.f32 %v1319_v17, %v768_v31  ;;  %v1791_v31 = vld [vmem:[%s1860_s3] ss:$0 sm:$0xff]  ;;  %v900_v34 = vpop.f32.mrb[19].mxu1  ;;  %v1216_v18 = vld [vmem:[%s1859_s5 + $0x10] sm:$0xff]  }
 0x11b   :  { %v1189_v26 = vunpack.c.l.bf16 %v1216_v18  ;;  %v1190_v29 = vunpack.c.h.bf16 %v1216_v18 }
 0x11c   :  { %v898_v27 = vadd.f32 %v897_v23, %v833_v22  ;;  %v836_v32 = vadd.f32 %v1322_v20, %v1762_v33 }
 0x11e   :  { %v962_v35 = vmul.f32 %v1782_v24, %v898_v27  ;;  %v901_v37 = vadd.f32 %v900_v34, %v836_v32  ;;  %v1323_v38 = vpop.f32.mrb[20].mxu0 }
 0x11f   :  { %v1324_v40 = vpop.f32.mrb[21].mxu0  ;;  %v1375_v52 = vpop.f32.mrb[20].mxu1 }
 0x120   :  { %v977_v41 = vadd.f32 %v1791_v31, %v962_v35  ;;  %v963_v42 = vmul.f32 %v1782_v24, %v901_v37  ;;  %v1325_v33 = vadd.f32 %v1324_v40, %v1323_v38  ;;  %v1326_v44 = vpop.f32.mrb[22].mxu0  ;;  %v913_v54 = vpop.f32.mrb[21].mxu1 }
 0x121   :  { %v1327_v46 = vpop.f32.mrb[23].mxu0  ;;  %v1376_v60 = vpop.f32.mrb[22].mxu1 }
 0x122   :  { %v1001_v48 = vadd.f32 %v1181_v36, %v977_v41  ;;  %v978_v49 = vadd.f32 %v1791_v31, %v963_v42  ;;  %v841_v50 = vadd.f32 %v1325_v33, %v1764_v45  ;;  %v1328_v51 = vadd.f32 %v1327_v46, %v1326_v44  ;;  %v916_v62 = vpop.f32.mrb[23].mxu1  ;;  %v1217_v33 = vld [vmem:[%s1859_s5 + $0x18] sm:$0xff]  }
 0x123   :  { %v1185_v45 = vunpack.c.l.bf16 %v1215_v53  ;;  %v1193_v53 = vunpack.c.l.bf16 %v1217_v33 }
 0x124   :  { %v1011_v55 = vmax.f32 %v1001_v48, 0.0  ;;  %v1002_v56 = vadd.f32 %v1182_v43, %v978_v49  ;;  %v906_v57 = vadd.f32 %v1371_v21, %v841_v50  ;;  %v844_v59 = vadd.f32 %v1328_v51, %v1766_v47 }
 0x126   :  { %v1012_v63 = vmax.f32 %v1002_v56, 0.0  ;;  %v964_v0 = vmul.f32 %v1782_v24, %v906_v57  ;;  %v909_v1 = vadd.f32 %v1372_v30, %v844_v59  ;;  %v1329_v2 = vpop.f32.mrb[24].mxu0  ;;  %v1025_v3 = vsel %vm1024_vm1, %v1011_v55, %v1001_v48 }
 0x127   :  { %v1330_v5 = vpop.f32.mrb[25].mxu0 }
 0x128   :  { %v1026_v6 = vsel %vm1024_vm1, %v1012_v63, %v1002_v56  ;;  %v979_v7 = vadd.f32 %v1791_v31, %v964_v0  ;;  %v965_v47 = vmul.f32 %v1782_v24, %v909_v1  ;;  %v1331_v9 = vadd.f32 %v1330_v5, %v1329_v2  ;;  %v1332_v10 = vpop.f32.mrb[26].mxu0 }
 0x129   :  { %v1198_v12 = vpack.c.bf16 %v1026_v6, %v1025_v3  ;;  %v1333_v13 = vpop.f32.mrb[27].mxu0 }
 0x12a   :  { %v1003_v14 = vadd.f32 %v1185_v45, %v979_v7  ;;  %v980_v15 = vadd.f32 %v1791_v31, %v965_v47  ;;  %v1334_v16 = vadd.f32 %v1333_v13, %v1332_v10  ;;  %v849_v17 = vadd.f32 %v1331_v9, %v1768_v58 }
 0x12b   :  { %1199 = vst [vmem:[%s1861_s6] sm:$0xff] %v1198_v12  }
 0x12c   :  { %v1013_v19 = vmax.f32 %v1003_v14, 0.0  ;;  %v1004_v20 = vadd.f32 %v1186_v4, %v980_v15  ;;  %v914_v21 = vadd.f32 %v913_v54, %v849_v17  ;;  %v852_v22 = vadd.f32 %v1334_v16, %v1770_v61 }
 0x12e   :  { %v1014_v23 = vmax.f32 %v1004_v20, 0.0  ;;  %v966_v25 = vmul.f32 %v1782_v24, %v914_v21  ;;  %v917_v27 = vadd.f32 %v916_v62, %v852_v22  ;;  %v1335_v28 = vpop.f32.mrb[28].mxu0  ;;  %v1027_v58 = vsel %vm1024_vm1, %v1013_v19, %v1003_v14 }
 0x12f   :  { %v1336_v30 = vpop.f32.mrb[29].mxu0 }
 0x130   :  { %v1028_v32 = vsel %vm1024_vm1, %v1014_v23, %v1004_v20  ;;  %v981_v34 = vadd.f32 %v1791_v31, %v966_v25  ;;  %v967_v35 = vmul.f32 %v1782_v24, %v917_v27  ;;  %v1337_v36 = vadd.f32 %v1336_v30, %v1335_v28  ;;  %v1338_v61 = vpop.f32.mrb[30].mxu0 }
 0x131   :  { %v1203_v37 = vpack.c.bf16 %v1028_v32, %v1027_v58  ;;  %v1339_v38 = vpop.f32.mrb[31].mxu0 }
 0x132   :  { %v1005_v40 = vadd.f32 %v1189_v26, %v981_v34  ;;  %v982_v41 = vadd.f32 %v1791_v31, %v967_v35  ;;  %v857_v42 = vadd.f32 %v1337_v36, %v1772_v8  ;;  %v1340_v43 = vadd.f32 %v1339_v38, %v1338_v61 }
 0x133   :  { %1218 = vst [vmem:[%s1861_s6 + $0x8] sm:$0xff] %v1203_v37   ;;  %v1194_v8 = vunpack.c.h.bf16 %v1217_v33 }
 0x134   :  { %v1015_v44 = vmax.f32 %v1005_v40, 0.0  ;;  %v1006_v46 = vadd.f32 %v1190_v29, %v982_v41  ;;  %v922_v48 = vadd.f32 %v1375_v52, %v857_v42  ;;  %v860_v49 = vadd.f32 %v1340_v43, %v1774_v11 }
 0x136   :  { %v1016_v50 = vmax.f32 %v1006_v46, 0.0  ;;  %v968_v51 = vmul.f32 %v1782_v24, %v922_v48  ;;  %v925_v54 = vadd.f32 %v1376_v60, %v860_v49  ;;  %v1029_v55 = vsel %vm1024_vm1, %v1015_v44, %v1005_v40 }
 0x138   :  { %v1030_v56 = vsel %vm1024_vm1, %v1016_v50, %v1006_v46  ;;  %v983_v57 = vadd.f32 %v1791_v31, %v968_v51  ;;  %v969_v59 = vmul.f32 %v1782_v24, %v925_v54 }
 0x139   :  { %v1208_v62 = vpack.c.bf16 %v1030_v56, %v1029_v55 }
 0x13a   :  { %v1007_v52 = vadd.f32 %v1193_v53, %v983_v57  ;;  %v984_v11 = vadd.f32 %v1791_v31, %v969_v59 }
 0x13b   :  { %1219 = vst [vmem:[%s1861_s6 + $0x10] sm:$0xff] %v1208_v62  }
 0x13c   :  { %v1017_v60 = vmax.f32 %v1007_v52, 0.0  ;;  %v1008_v63 = vadd.f32 %v1194_v8, %v984_v11 }
 0x13e   :  { %v1018_v0 = vmax.f32 %v1008_v63, 0.0  ;;  %v1031_v45 = vsel %vm1024_vm1, %v1017_v60, %v1007_v52 }
 0x140   :  { %v1032_v1 = vsel %vm1024_vm1, %v1018_v0, %v1008_v63 }
 0x141   :  { %v1213_v2 = vpack.c.bf16 %v1032_v1, %v1031_v45 }
 0x143   :  { %1220 = vst [vmem:[%s1861_s6 + $0x18] sm:$0xff] %v1213_v2  }

// kernel: _lambda_.16
= control target key start
LH: loop header
LB: loop body
LE: loop exit
PB: predicated region body
PF: predicated region fallthrough
CT: control target
= control target key end

     0   :  { %s1792_s1 = inlined_call_operand.vmem [shape: bf16[896,128], index: 1, kind: input, shape index: {}]   ;;  %s1793_s0 = inlined_call_operand.vmem [shape: bf16[64,896], index: 0, kind: input, shape index: {}]   ;;  %s1794_s4 = inlined_call_operand.vmem [shape: f32[1,128], index: 4, kind: input, shape index: {}]   ;;  %s1795_s2 = inlined_call_operand.vmem [shape: f32[1,128], index: 2, kind: input, shape index: {}]   ;;  %s1796_s3 = inlined_call_operand.vmem [shape: f32[1,128], index: 3, kind: input, shape index: {}]   ;;  %s1797_s5 = inlined_call_operand.vmem [shape: bf16[64,128], index: 5, kind: output, shape index: {}]  }
   0x1   :  { %v1332_v0 = vld [vmem:[%s1792_s1 + $0x40] sm:$0xff]   ;;  %v1336_v4 = vld [vmem:[%s1792_s1 + $0x48] sm:$0xff]   ;;  %v1340_v8 = vld [vmem:[%s1792_s1 + $0x50] sm:$0xff]  }
   0x2   :  { %v1333_v1 = vld [vmem:[%s1792_s1 + $0xc0] sm:$0xff]   ;;  %1175 = vmatprep.subr.bf16.mxu0 %v1332_v0  ;;  %v1337_v5 = vld [vmem:[%s1792_s1 + $0xc8] sm:$0xff]   ;;  %v1341_v9 = vld [vmem:[%s1792_s1 + $0xd0] sm:$0xff]  }
   0x3   :  { %v1334_v2 = vld [vmem:[%s1792_s1] sm:$0xff]   ;;  %1215 = vmatprep.subr.bf16.mxu1 %v1333_v1  ;;  %v1338_v6 = vld [vmem:[%s1792_s1 + $0x8] sm:$0xff]   ;;  %v1342_v10 = vld [vmem:[%s1792_s1 + $0x10] sm:$0xff]  }
   0x4   :  { %v1335_v3 = vld [vmem:[%s1792_s1 + $0x80] sm:$0xff]   ;;  %1176 = vmatpush3.bf16.msra.mxu0 %v1334_v2  ;;  %v1339_v7 = vld [vmem:[%s1792_s1 + $0x88] sm:$0xff]   ;;  %v1343_v11 = vld [vmem:[%s1792_s1 + $0x90] sm:$0xff]  }
   0x5   :  { %1216 = vmatpush3.bf16.msra.mxu1 %v1335_v3  ;;  %1177 = vmatprep.subr.bf16.mxu0 %v1336_v4  ;;  %v1344_v12 = vld [vmem:[%s1792_s1 + $0x58] sm:$0xff]   ;;  %v1348_v16 = vld [vmem:[%s1792_s1 + $0x60] sm:$0xff]   ;;  %v1352_v20 = vld [vmem:[%s1792_s1 + $0x68] sm:$0xff]  }
   0x6   :  { %1217 = vmatprep.subr.bf16.mxu1 %v1337_v5  ;;  %v1345_v13 = vld [vmem:[%s1792_s1 + $0xd8] sm:$0xff]   ;;  %v1349_v17 = vld [vmem:[%s1792_s1 + $0xe0] sm:$0xff]   ;;  %v1353_v21 = vld [vmem:[%s1792_s1 + $0xe8] sm:$0xff]  }
   0x7   :  { %v1346_v14 = vld [vmem:[%s1792_s1 + $0x18] sm:$0xff]   ;;  %v1350_v18 = vld [vmem:[%s1792_s1 + $0x20] sm:$0xff]   ;;  %v1354_v22 = vld [vmem:[%s1792_s1 + $0x28] sm:$0xff]  }
   0x8   :  { %1178 = vmatpush3.bf16.msra.mxu0 %v1338_v6  ;;  %v1347_v15 = vld [vmem:[%s1792_s1 + $0x98] sm:$0xff]   ;;  %v1351_v19 = vld [vmem:[%s1792_s1 + $0xa0] sm:$0xff]   ;;  %v1355_v23 = vld [vmem:[%s1792_s1 + $0xa8] sm:$0xff]  }
   0x9   :  { %1218 = vmatpush3.bf16.msra.mxu1 %v1339_v7  ;;  %1179 = vmatprep.subr.bf16.mxu0 %v1340_v8  ;;  %v1356_v24 = vld [vmem:[%s1792_s1 + $0x70] sm:$0xff]   ;;  %v1360_v28 = vld [vmem:[%s1792_s1 + $0x78] sm:$0xff]   ;;  %v1366_v33 = vld [vmem:[%s1793_s0 + $0x4] ss:$28 sps:$4 sm:$0xff]  }
   0xa   :  { %1219 = vmatprep.subr.bf16.mxu1 %v1341_v9  ;;  %v1357_v25 = vld [vmem:[%s1792_s1 + $0xf0] sm:$0xff]   ;;  %v1361_v29 = vld [vmem:[%s1792_s1 + $0xf8] sm:$0xff]   ;;  %v1367_v34 = vld [vmem:[%s1793_s0 + $0x8] ss:$28 sps:$4 sm:$0xff]   ;;  %697 = vmatprep.mubr.bf16.mxu0 %v1366_v33 }
   0xb   :  { %v1358_v26 = vld [vmem:[%s1792_s1 + $0x30] sm:$0xff]   ;;  %v1362_v30 = vld [vmem:[%s1792_s1 + $0x38] sm:$0xff]   ;;  %v1369_v35 = vld [vmem:[%s1793_s0 + $0xc] ss:$28 sps:$4 sm:$0xff]  }
   0xc   :  { %1180 = vmatpush3.bf16.msra.mxu0 %v1342_v10  ;;  %v1359_v27 = vld [vmem:[%s1792_s1 + $0xb0] sm:$0xff]   ;;  %v1363_v31 = vld [vmem:[%s1792_s1 + $0xb8] sm:$0xff]   ;;  %v1370_v36 = vld [vmem:[%s1792_s1 + $0x140] sm:$0xff]   ;;  %762 = vmatprep.mubr.bf16.mxu1 %v1369_v35 }
   0xd   :  { %1220 = vmatpush3.bf16.msra.mxu1 %v1343_v11  ;;  %1181 = vmatprep.subr.bf16.mxu0 %v1344_v12  ;;  %v1364_v32 = vld [vmem:[%s1793_s0] ss:$28 sps:$4 sm:$0xff]   ;;  %v1372_v38 = vld [vmem:[%s1792_s1 + $0x148] sm:$0xff]   ;;  %v1379_v43 = vld [vmem:[%s1793_s0 + $0x38] ss:$28 sps:$4 sm:$0xff]  }
   0xe   :  { %1221 = vmatprep.subr.bf16.mxu1 %v1345_v13  ;;  %v1371_v37 = vld [vmem:[%s1792_s1 + $0x100] sm:$0xff]   ;;  %v1374_v40 = vld [vmem:[%s1792_s1 + $0x108] sm:$0xff]   ;;  %v1375_v41 = vld [vmem:[%s1793_s0 + $0x3c] ss:$28 sps:$4 sm:$0xff]  }
   0xf   :  { %v1373_v39 = vld [vmem:[%s1792_s1 + $0x180] sm:$0xff]   ;;  %v1381_v45 = vld [vmem:[%s1792_s1 + $0x150] sm:$0xff]   ;;  %v1382_v46 = vld [vmem:[%s1792_s1 + $0x188] sm:$0xff]  }
  0x10   :  { %1182 = vmatpush3.bf16.msra.mxu0 %v1346_v14  ;;  %v1377_v42 = vld [vmem:[%s1793_s0 + $0x44] ss:$28 sps:$4 sm:$0xff]   ;;  %v1383_v47 = vld [vmem:[%s1792_s1 + $0x110] sm:$0xff]   ;;  %v1384_v48 = vld [vmem:[%s1792_s1 + $0x158] sm:$0xff]  }
  0x11   :  { %1222 = vmatpush3.bf16.msra.mxu1 %v1347_v15  ;;  %1183 = vmatprep.subr.bf16.mxu0 %v1348_v16  ;;  %v1380_v44 = vld [vmem:[%s1793_s0 + $0x40] ss:$28 sps:$4 sm:$0xff]   ;;  %v1385_v49 = vld [vmem:[%s1792_s1 + $0x190] sm:$0xff]   ;;  %v1396_v58 = vld [vmem:[%s1792_s1 + $0x168] sm:$0xff]  }
  0x12   :  { %1223 = vmatprep.subr.bf16.mxu1 %v1349_v17  ;;  %v1386_v50 = vld [vmem:[%s1792_s1 + $0x118] sm:$0xff]   ;;  %v1387_v51 = vld [vmem:[%s1793_s0 + $0x74] ss:$28 sps:$4 sm:$0xff]   ;;  %v1393_v55 = vld [vmem:[%s1792_s1 + $0x160] sm:$0xff]  }
  0x13   :  { %v1389_v52 = vld [vmem:[%s1793_s0 + $0x7c] ss:$28 sps:$4 sm:$0xff]   ;;  %v1391_v53 = vld [vmem:[%s1793_s0 + $0x70] ss:$28 sps:$4 sm:$0xff]   ;;  %v1395_v57 = vld [vmem:[%s1792_s1 + $0x120] sm:$0xff]  }
  0x14   :  { %1184 = vmatpush3.bf16.msra.mxu0 %v1350_v18  ;;  %v1392_v54 = vld [vmem:[%s1793_s0 + $0x78] ss:$28 sps:$4 sm:$0xff]   ;;  %v1397_v59 = vld [vmem:[%s1792_s1 + $0x1a0] sm:$0xff]   ;;  %v1398_v60 = vld [vmem:[%s1792_s1 + $0x128] sm:$0xff]  }
  0x15   :  { %1224 = vmatpush3.bf16.msra.mxu1 %v1351_v19  ;;  %1185 = vmatprep.subr.bf16.mxu0 %v1352_v20  ;;  %v1394_v56 = vld [vmem:[%s1792_s1 + $0x198] sm:$0xff]   ;;  %v1399_v61 = vld [vmem:[%s1793_s0 + $0xac] ss:$28 sps:$4 sm:$0xff]   ;;  %v1401_v62 = vld [vmem:[%s1793_s0 + $0xb4] ss:$28 sps:$4 sm:$0xff]  }
  0x16   :  { %1225 = vmatprep.subr.bf16.mxu1 %v1353_v21  ;;  %v1403_v63 = vld [vmem:[%s1793_s0 + $0xa8] ss:$28 sps:$4 sm:$0xff]   ;;  %v1404_v0 = vld [vmem:[%s1793_s0 + $0xb0] ss:$28 sps:$4 sm:$0xff]   ;;  %v1408_v4 = vld [vmem:[%s1792_s1 + $0x178] sm:$0xff]  }
  0x17   :  { %v1405_v1 = vld [vmem:[%s1792_s1 + $0x170] sm:$0xff]   ;;  %v1406_v2 = vld [vmem:[%s1792_s1 + $0x1a8] sm:$0xff]   ;;  %v1410_v6 = vld [vmem:[%s1792_s1 + $0x138] sm:$0xff]  }
  0x18   :  { %1186 = vmatpush3.bf16.msra.mxu0 %v1354_v22  ;;  %v1407_v3 = vld [vmem:[%s1792_s1 + $0x130] sm:$0xff]   ;;  %v1414_v9 = vld [vmem:[%s1792_s1 + $0x1b8] sm:$0xff]   ;;  %v1417_v11 = vld [vmem:[%s1793_s0 + $0x4c] ss:$28 sps:$4 sm:$0xff]  }
  0x19   :  { %1226 = vmatpush3.bf16.msra.mxu1 %v1355_v23  ;;  %1187 = vmatprep.subr.bf16.mxu0 %v1356_v24  ;;  %v1409_v5 = vld [vmem:[%s1792_s1 + $0x1b0] sm:$0xff]   ;;  %v1423_v13 = vld [vmem:[%s1793_s0 + $0x88] ss:$28 sps:$4 sm:$0xff]   ;;  %v1424_v16 = vld [vmem:[%s1793_s0 + $0xc0] ss:$28 sps:$4 sm:$0xff]  }
  0x1a   :  { %1227 = vmatprep.subr.bf16.mxu1 %v1357_v25  ;;  %v1411_v7 = vld [vmem:[%s1793_s0 + $0x10] ss:$28 sps:$4 sm:$0xff]   ;;  %v1415_v10 = vld [vmem:[%s1793_s0 + $0x18] ss:$28 sps:$4 sm:$0xff]   ;;  %v1419_v14 = vld [vmem:[%s1793_s0 + $0x48] ss:$28 sps:$4 sm:$0xff]  }
  0x1b   :  { %v1413_v8 = vld [vmem:[%s1793_s0 + $0x14] ss:$28 sps:$4 sm:$0xff]   ;;  %v1420_v15 = vld [vmem:[%s1793_s0 + $0x84] ss:$28 sps:$4 sm:$0xff]   ;;  %v1425_v18 = vld [vmem:[%s1793_s0 + $0xbc] ss:$28 sps:$4 sm:$0xff]  }
  0x1c   :  { %1188 = vmatpush3.bf16.msra.mxu0 %v1358_v26  ;;  %v1416_v12 = vld [vmem:[%s1793_s0 + $0x50] ss:$28 sps:$4 sm:$0xff]   ;;  %v1422_v17 = vld [vmem:[%s1793_s0 + $0x80] ss:$28 sps:$4 sm:$0xff]   ;;  %v1427_v19 = vld [vmem:[%s1793_s0 + $0xb8] ss:$28 sps:$4 sm:$0xff]  }
  0x1d   :  { %1228 = vmatpush3.bf16.msra.mxu1 %v1359_v27  ;;  %1189 = vmatprep.subr.bf16.mxu0 %v1360_v28 }
  0x1e   :  { %1229 = vmatprep.subr.bf16.mxu1 %v1361_v29 }
  0x20   :  { %1190 = vmatpush3.bf16.msra.mxu0 %v1362_v30 }
  0x21   :  { %1230 = vmatpush3.bf16.msra.mxu1 %v1363_v31  ;;  %1255 = vmatprep.subr.bf16.mxu0 %v1370_v36 }
  0x22   :  { %1307 = vmatprep.subr.bf16.mxu1 %v1373_v39 }
  0x23   :  { %698 = vmatmul.mubr.bf16.vlgmr.msra.gmra.mrb[0].mxu0 %v1364_v32 }
  0x24   :  { %763 = vmatmul.mubr.bf16.vlgmr.msra.gmra.mrb[0].mxu1 %v1367_v34  ;;  %1256 = vmatpush3.bf16.msra.mxu0 %v1371_v37 }
  0x25   :  { %1257 = vmatprep.subr.bf16.mxu0 %v1372_v38  ;;  %1308 = vmatpush3.bf16.msra.mxu1 %v1373_v39 }
  0x26   :  { %705 = vmatprep.mubr.bf16.mxu0 %v1375_v41  ;;  %770 = vmatprep.mubr.bf16.mxu1 %v1377_v42 }
  0x27   :  { %1309 = vmatprep.subr.bf16.mxu1 %v1382_v46 }
  0x28   :  { %1258 = vmatpush3.bf16.msra.mxu0 %v1374_v40 }
  0x29   :  { %1259 = vmatprep.subr.bf16.mxu0 %v1381_v45  ;;  %1310 = vmatpush3.bf16.msra.mxu1 %v1382_v46 }
  0x2a   :  { %1311 = vmatprep.subr.bf16.mxu1 %v1385_v49 }
  0x2b   :  { %706 = vmatmul.mubr.bf16.gmra.mrb[4].mxu0 %v1379_v43 }
  0x2c   :  { %771 = vmatmul.mubr.bf16.gmra.mrb[4].mxu1 %v1380_v44  ;;  %1260 = vmatpush3.bf16.msra.mxu0 %v1383_v47 }
  0x2d   :  { %1261 = vmatprep.subr.bf16.mxu0 %v1384_v48  ;;  %1312 = vmatpush3.bf16.msra.mxu1 %v1385_v49 }
  0x2e   :  { %713 = vmatprep.mubr.bf16.mxu0 %v1387_v51  ;;  %778 = vmatprep.mubr.bf16.mxu1 %v1389_v52 }
  0x2f   :  { %1313 = vmatprep.subr.bf16.mxu1 %v1394_v56 }
  0x30   :  { %1262 = vmatpush3.bf16.msra.mxu0 %v1386_v50 }
  0x31   :  { %1263 = vmatprep.subr.bf16.mxu0 %v1393_v55  ;;  %1314 = vmatpush3.bf16.msra.mxu1 %v1394_v56 }
  0x32   :  { %1315 = vmatprep.subr.bf16.mxu1 %v1397_v59 }
  0x33   :  { %714 = vmatmul.mubr.bf16.gmra.mrb[8].mxu0 %v1391_v53 }
  0x34   :  { %779 = vmatmul.mubr.bf16.gmra.mrb[8].mxu1 %v1392_v54  ;;  %1264 = vmatpush3.bf16.msra.mxu0 %v1395_v57 }
  0x35   :  { %1265 = vmatprep.subr.bf16.mxu0 %v1396_v58  ;;  %1316 = vmatpush3.bf16.msra.mxu1 %v1397_v59 }
  0x36   :  { %721 = vmatprep.mubr.bf16.mxu0 %v1399_v61  ;;  %786 = vmatprep.mubr.bf16.mxu1 %v1401_v62 }
  0x37   :  { %1317 = vmatprep.subr.bf16.mxu1 %v1406_v2 }
  0x38   :  { %1266 = vmatpush3.bf16.msra.mxu0 %v1398_v60 }
  0x39   :  { %1267 = vmatprep.subr.bf16.mxu0 %v1405_v1  ;;  %1318 = vmatpush3.bf16.msra.mxu1 %v1406_v2 }
  0x3a   :  { %1319 = vmatprep.subr.bf16.mxu1 %v1409_v5 }
  0x3b   :  { %722 = vmatmul.mubr.bf16.gmra.mrb[12].mxu0 %v1403_v63 }
  0x3c   :  { %787 = vmatmul.mubr.bf16.gmra.mrb[12].mxu1 %v1404_v0  ;;  %1268 = vmatpush3.bf16.msra.mxu0 %v1407_v3 }
  0x3d   :  { %1269 = vmatprep.subr.bf16.mxu0 %v1408_v4  ;;  %1320 = vmatpush3.bf16.msra.mxu1 %v1409_v5 }
  0x3e   :  { %827 = vmatprep.mubr.bf16.mxu0 %v1413_v8  ;;  %1321 = vmatprep.subr.bf16.mxu1 %v1414_v9 }
  0x3f   :  { %1323 = vmatprep.mubr.bf16.mxu1 %v1415_v10 }
  0x40   :  { %1270 = vmatpush3.bf16.msra.mxu0 %v1410_v6 }
  0x41   :  { %1322 = vmatpush3.bf16.msra.mxu1 %v1414_v9 }
  0x43   :  { %828 = vmatmul.mubr.bf16.vlgmr.msra.gmra.mrb[16].mxu0 %v1411_v7 }
  0x44   :  { %835 = vmatprep.mubr.bf16.mxu0 %v1417_v11  ;;  %1324 = vmatmul.mubr.bf16.vlgmr.msra.gmra.mrb[16].mxu1 %v1416_v12  ;;  %v993_v12 = vlaneseq }
  0x45   :  { %1327 = vmatprep.mubr.bf16.mxu1 %v1423_v13 }
  0x4b   :  { %836 = vmatmul.mubr.bf16.gmra.mrb[20].mxu0 %v1419_v14  ;;  %v982_v14 = vld [vmem:[%s1794_s4] sm:$0x1] }
  0x4c   :  { %843 = vmatprep.mubr.bf16.mxu0 %v1420_v15  ;;  %1328 = vmatmul.mubr.bf16.gmra.mrb[20].mxu1 %v1424_v16  ;;  %v994_v16 = vshrl.u32 %v993_v12, 7  ;;  %vm983_vm0 = vcmp.ne.f32.partialorder %v982_v14, 0.0 }
  0x53   :  { %844 = vmatmul.mubr.bf16.gmra.mrb[24].mxu0 %v1422_v17 }
  0x54   :  { %851 = vmatprep.mubr.bf16.mxu0 %v1425_v18 }
  0x5b   :  { %852 = vmatmul.mubr.bf16.gmra.mrb[28].mxu0 %v1427_v19 }
  0xf6   :  { %v1191_v20 = vpop.f32.mrb[0].mxu0 }
  0xf7   :  { %v1231_v21 = vpop.f32.mrb[0].mxu1  ;;  %v1192_v22 = vpop.f32.mrb[1].mxu0 }
  0xf8   :  { %v1193_v23 = vadd.f32 %v1192_v22, %v1191_v20  ;;  %v1232_v24 = vpop.f32.mrb[1].mxu1  ;;  %v1194_v25 = vpop.f32.mrb[2].mxu0 }
  0xf9   :  { %v1233_v26 = vadd.f32 %v1232_v24, %v1231_v21  ;;  %v1234_v27 = vpop.f32.mrb[2].mxu1  ;;  %v1195_v28 = vpop.f32.mrb[3].mxu0  ;;  %v1731_v24 = vld [vmem:[%s1795_s2] ss:$0 sm:$0xff] }
  0xfa   :  { %v1196_v29 = vadd.f32 %v1195_v28, %v1194_v25  ;;  %v1235_v30 = vpop.f32.mrb[3].mxu1  ;;  %v995_v25 = vsub.s32 0, %v994_v16 }
  0xfb   :  { %v765_v31 = vadd.f32 %v1233_v26, %v1193_v23  ;;  %v1236_v32 = vadd.f32 %v1235_v30, %v1234_v27  ;;  %v1428_v27 = vmov 0  }
  0xfc   :  { %v992_v28 = vsel %vm983_vm0, 1, %v1428_v27 }
  0xfd   :  { %v1711_v33 = vadd.f32 %v1236_v32, %v1196_v29  ;;  %v1737_v32 = vld [vmem:[%s1796_s3] ss:$0 sm:$0xff] }
  0xfe   :  { %v1197_v34 = vpop.f32.mrb[4].mxu0 }
  0xff   :  { %v1237_v35 = vpop.f32.mrb[4].mxu1  ;;  %v1198_v36 = vpop.f32.mrb[5].mxu0 }
 0x100   :  { %v1199_v37 = vadd.f32 %v1198_v36, %v1197_v34  ;;  %v1238_v38 = vpop.f32.mrb[5].mxu1  ;;  %v1200_v39 = vpop.f32.mrb[6].mxu0 }
 0x101   :  { %v1239_v40 = vadd.f32 %v1238_v38, %v1237_v35  ;;  %v1240_v41 = vpop.f32.mrb[6].mxu1  ;;  %v1201_v42 = vpop.f32.mrb[7].mxu0 }
 0x102   :  { %v1202_v43 = vadd.f32 %v1201_v42, %v1200_v39  ;;  %v1241_v44 = vpop.f32.mrb[7].mxu1 }
 0x103   :  { %v1713_v45 = vadd.f32 %v1239_v40, %v1199_v37  ;;  %v1242_v46 = vadd.f32 %v1241_v44, %v1240_v41  ;;  %v1740_v37 = vrot.slane %v992_v28, %v995_v25 }
 0x105   :  { %v1715_v47 = vadd.f32 %v1242_v46, %v1202_v43  ;;  %vm997_vm1 = vcmp.eq.s32.totalorder %v1740_v37, 1 }
 0x106   :  { %v1203_v48 = vpop.f32.mrb[8].mxu0 }
 0x107   :  { %v1243_v49 = vpop.f32.mrb[8].mxu1  ;;  %v1204_v50 = vpop.f32.mrb[9].mxu0 }
 0x108   :  { %v1244_v51 = vpop.f32.mrb[9].mxu1  ;;  %v1205_v52 = vadd.f32 %v1204_v50, %v1203_v48  ;;  %v1206_v54 = vpop.f32.mrb[10].mxu0 }
 0x109   :  { %v1245_v53 = vadd.f32 %v1244_v51, %v1243_v49  ;;  %v1246_v55 = vpop.f32.mrb[10].mxu1  ;;  %v1207_v56 = vpop.f32.mrb[11].mxu0 }
 0x10a   :  { %v1247_v57 = vpop.f32.mrb[11].mxu1  ;;  %v1208_v59 = vadd.f32 %v1207_v56, %v1206_v54 }
 0x10b   :  { %v1717_v58 = vadd.f32 %v1245_v53, %v1205_v52  ;;  %v1248_v60 = vadd.f32 %v1247_v57, %v1246_v55 }
 0x10d   :  { %v1719_v61 = vadd.f32 %v1248_v60, %v1208_v59 }
 0x10e   :  { %v1209_v62 = vpop.f32.mrb[12].mxu0 }
 0x10f   :  { %v1249_v63 = vpop.f32.mrb[12].mxu1  ;;  %v1210_v0 = vpop.f32.mrb[13].mxu0 }
 0x110   :  { %v1250_v1 = vpop.f32.mrb[13].mxu1  ;;  %v1211_v2 = vadd.f32 %v1210_v0, %v1209_v62  ;;  %v1212_v4 = vpop.f32.mrb[14].mxu0 }
 0x111   :  { %v1251_v3 = vadd.f32 %v1250_v1, %v1249_v63  ;;  %v1252_v5 = vpop.f32.mrb[14].mxu1  ;;  %v1213_v6 = vpop.f32.mrb[15].mxu0 }
 0x112   :  { %v1253_v7 = vpop.f32.mrb[15].mxu1  ;;  %v1214_v9 = vadd.f32 %v1213_v6, %v1212_v4 }
 0x113   :  { %v1721_v8 = vadd.f32 %v1251_v3, %v1211_v2  ;;  %v1254_v10 = vadd.f32 %v1253_v7, %v1252_v5 }
 0x115   :  { %v1723_v11 = vadd.f32 %v1254_v10, %v1214_v9 }
 0x116   :  { %v1271_v13 = vpop.f32.mrb[16].mxu0 }
 0x117   :  { %v1272_v15 = vpop.f32.mrb[17].mxu0  ;;  %v1325_v21 = vpop.f32.mrb[16].mxu1 }
 0x118   :  { %v1273_v17 = vadd.f32 %v1272_v15, %v1271_v13  ;;  %v1274_v18 = vpop.f32.mrb[18].mxu0  ;;  %v894_v23 = vpop.f32.mrb[17].mxu1 }
 0x119   :  { %v1275_v19 = vpop.f32.mrb[19].mxu0  ;;  %v1326_v29 = vpop.f32.mrb[18].mxu1 }
 0x11a   :  { %v1276_v20 = vadd.f32 %v1275_v19, %v1274_v18  ;;  %v830_v22 = vadd.f32 %v1273_v17, %v765_v31  ;;  %v897_v34 = vpop.f32.mrb[19].mxu1 }
 0x11c   :  { %v895_v26 = vadd.f32 %v894_v23, %v830_v22  ;;  %v833_v30 = vadd.f32 %v1276_v20, %v1711_v33 }
 0x11e   :  { %v959_v31 = vmul.f32 %v1731_v24, %v895_v26  ;;  %v898_v35 = vadd.f32 %v897_v34, %v833_v30  ;;  %v1277_v36 = vpop.f32.mrb[20].mxu0 }
 0x11f   :  { %v1278_v38 = vpop.f32.mrb[21].mxu0  ;;  %v1329_v49 = vpop.f32.mrb[20].mxu1 }
 0x120   :  { %v974_v39 = vadd.f32 %v1737_v32, %v959_v31  ;;  %v960_v40 = vmul.f32 %v1731_v24, %v898_v35  ;;  %v1279_v41 = vadd.f32 %v1278_v38, %v1277_v36  ;;  %v1280_v42 = vpop.f32.mrb[22].mxu0  ;;  %v910_v50 = vpop.f32.mrb[21].mxu1 }
 0x121   :  { %v1281_v33 = vpop.f32.mrb[23].mxu0  ;;  %v1330_v54 = vpop.f32.mrb[22].mxu1 }
 0x122   :  { %v984_v43 = vmax.f32 %v974_v39, 0.0  ;;  %v975_v44 = vadd.f32 %v1737_v32, %v960_v40  ;;  %v838_v46 = vadd.f32 %v1279_v41, %v1713_v45  ;;  %v1282_v48 = vadd.f32 %v1281_v33, %v1280_v42  ;;  %v913_v55 = vpop.f32.mrb[23].mxu1 }
 0x124   :  { %v985_v51 = vmax.f32 %v975_v44, 0.0  ;;  %v903_v52 = vadd.f32 %v1325_v21, %v838_v46  ;;  %v841_v53 = vadd.f32 %v1282_v48, %v1715_v47  ;;  %v998_v56 = vsel %vm997_vm1, %v984_v43, %v974_v39 }
 0x126   :  { %v999_v57 = vsel %vm997_vm1, %v985_v51, %v975_v44  ;;  %v961_v59 = vmul.f32 %v1731_v24, %v903_v52  ;;  %v906_v45 = vadd.f32 %v1326_v29, %v841_v53  ;;  %v1283_v60 = vpop.f32.mrb[24].mxu0 }
 0x127   :  { %v1155_v62 = vpack.c.bf16 %v999_v57, %v998_v56  ;;  %v1284_v63 = vpop.f32.mrb[25].mxu0 }
 0x128   :  { %v976_v0 = vadd.f32 %v1737_v32, %v961_v59  ;;  %v962_v1 = vmul.f32 %v1731_v24, %v906_v45  ;;  %v1285_v2 = vadd.f32 %v1284_v63, %v1283_v60  ;;  %v1286_v47 = vpop.f32.mrb[26].mxu0 }
 0x129   :  { %1156 = vst [vmem:[%s1797_s5] sm:$0xff] %v1155_v62   ;;  %v1287_v3 = vpop.f32.mrb[27].mxu0 }
 0x12a   :  { %v986_v4 = vmax.f32 %v976_v0, 0.0  ;;  %v977_v5 = vadd.f32 %v1737_v32, %v962_v1  ;;  %v1288_v6 = vadd.f32 %v1287_v3, %v1286_v47  ;;  %v846_v7 = vadd.f32 %v1285_v2, %v1717_v58 }
 0x12c   :  { %v987_v9 = vmax.f32 %v977_v5, 0.0  ;;  %v911_v10 = vadd.f32 %v910_v50, %v846_v7  ;;  %v849_v12 = vadd.f32 %v1288_v6, %v1719_v61  ;;  %v1000_v13 = vsel %vm997_vm1, %v986_v4, %v976_v0 }
 0x12e   :  { %v1001_v14 = vsel %vm997_vm1, %v987_v9, %v977_v5  ;;  %v963_v15 = vmul.f32 %v1731_v24, %v911_v10  ;;  %v914_v16 = vadd.f32 %v913_v55, %v849_v12  ;;  %v1289_v17 = vpop.f32.mrb[28].mxu0 }
 0x12f   :  { %v1160_v18 = vpack.c.bf16 %v1001_v14, %v1000_v13  ;;  %v1290_v19 = vpop.f32.mrb[29].mxu0 }
 0x130   :  { %v978_v20 = vadd.f32 %v1737_v32, %v963_v15  ;;  %v964_v58 = vmul.f32 %v1731_v24, %v914_v16  ;;  %v1291_v21 = vadd.f32 %v1290_v19, %v1289_v17  ;;  %v1292_v22 = vpop.f32.mrb[30].mxu0 }
 0x131   :  { %1172 = vst [vmem:[%s1797_s5 + $0x8] sm:$0xff] %v1160_v18   ;;  %v1293_v61 = vpop.f32.mrb[31].mxu0 }
 0x132   :  { %v988_v23 = vmax.f32 %v978_v20, 0.0  ;;  %v979_v25 = vadd.f32 %v1737_v32, %v964_v58  ;;  %v854_v26 = vadd.f32 %v1291_v21, %v1721_v8  ;;  %v1294_v27 = vadd.f32 %v1293_v61, %v1292_v22 }
 0x134   :  { %v989_v28 = vmax.f32 %v979_v25, 0.0  ;;  %v919_v29 = vadd.f32 %v1329_v49, %v854_v26  ;;  %v857_v30 = vadd.f32 %v1294_v27, %v1723_v11  ;;  %v1002_v34 = vsel %vm997_vm1, %v988_v23, %v978_v20 }
 0x136   :  { %v1003_v31 = vsel %vm997_vm1, %v989_v28, %v979_v25  ;;  %v965_v35 = vmul.f32 %v1731_v24, %v919_v29  ;;  %v922_v36 = vadd.f32 %v1330_v54, %v857_v30 }
 0x137   :  { %v1165_v38 = vpack.c.bf16 %v1003_v31, %v1002_v34 }
 0x138   :  { %v980_v39 = vadd.f32 %v1737_v32, %v965_v35  ;;  %v966_v40 = vmul.f32 %v1731_v24, %v922_v36 }
 0x139   :  { %1173 = vst [vmem:[%s1797_s5 + $0x10] sm:$0xff] %v1165_v38  }
 0x13a   :  { %v990_v8 = vmax.f32 %v980_v39, 0.0  ;;  %v981_v11 = vadd.f32 %v1737_v32, %v966_v40 }
 0x13c   :  { %v991_v41 = vmax.f32 %v981_v11, 0.0  ;;  %v1004_v42 = vsel %vm997_vm1, %v990_v8, %v980_v39 }
 0x13e   :  { %v1005_v33 = vsel %vm997_vm1, %v991_v41, %v981_v11 }
 0x13f   :  { %v1170_v43 = vpack.c.bf16 %v1005_v33, %v1004_v42 }
 0x141   :  { %1174 = vst [vmem:[%s1797_s5 + $0x18] sm:$0xff] %v1170_v43  }

// kernel: _lambda_.17
= control target key start
LH: loop header
LB: loop body
LE: loop exit
PB: predicated region body
PF: predicated region fallthrough
CT: control target
= control target key end

     0   :  { %s1494_s21 = smov 0   ;;  %s1496_s22 = smov 0   ;;  %s1672_s0 = inlined_call_operand.vmem [shape: bf16[64,2048], index: 0, kind: input, shape index: {}]   ;;  %s1673_s1 = inlined_call_operand.vmem [shape: bf16[2048,128], index: 1, kind: input, shape index: {}]   ;;  %s1674_s2 = inlined_call_operand.vmem [shape: f32[1,128], index: 2, kind: input, shape index: {}]   ;;  %s1675_s3 = inlined_call_operand.vmem [shape: f32[1,128], index: 3, kind: input, shape index: {}]   ;;  %s1676_s4 = inlined_call_operand.vmem [shape: f32[1,128], index: 4, kind: input, shape index: {}]   ;;  %s1677_s5 = inlined_call_operand.vmem [shape: bf16[64,128], index: 5, kind: input, shape index: {}]   ;;  %s1678_s6 = inlined_call_operand.vmem [shape: bf16[64,128], index: 6, kind: output, shape index: {}]  }
   0x1   :  { %s1498_s23 = smov 0   ;;  %s1500_s24 = smov 0  }
   0x2   :  { %s1502_s25 = smov 0  }
   0x3 LB: > { %s25_s26 = sadd.s32 1, %s1451_s24  ;;  %p44_p1 = scmp.ne.s32.totalorder %s1443_s22, %s1439_s21  ;;  %s1455_s25 = sphi %s1502_s25, %s16_s25   ;;  %s1451_s24 = sphi %s1500_s24, %s1682_s24   ;;  %s1447_s23 = sphi %s1498_s23, %s1681_s23   ;;  %s1443_s22 = sphi %s1496_s22, %s1680_s22   ;;  %s1439_s21 = sphi %s1494_s21, %s1679_s21  }
   0x4   : > { %p26_p0 = scmp.ge.s32.totalorder %s25_s26, 4  ;;  %p45_p2 = scmp.eq.s32.totalorder %s1455_s25, 0 }
   0x5   : > { %s37_s28 = sadd.s32 1, %s1443_s22  ;;  %p1116_p5 = scmp.ge.s32.totalorder %s1455_s25, 4 }
   0x6   : > { %s1684_s26 = smov (%p26_p0, %s25_s26), 0  ;;  %p46_p3 = por %p45_p2, %p44_p1 }
   0x7   : > { %s33_s27 = ssub.s32 %s1451_s24, %s1684_s26  ;;  %229 = sbr.rel (%p1116_p5) target bundleno = 26 (0x1a), region = 32 }
   0x8   : > { %p35_p4 = scmp.eq.s32.totalorder %s33_s27, 0 }
   0xa   : > { %s1529_s29 = scalar_select %p35_p4, %s1443_s22, %s37_s28  }
   0xe   : > { %232 = sbr.rel (!%p46_p3) target bundleno = 26 (0x1a), region = 36  ;;  %s234_s30 = sand.u32 (%p46_p3), 1, %s1443_s22  }
   0xf   : > { %s1188_s7 = sshll.u32 (%p46_p3), %s1451_s24, 4  ;;  %s1117_s8 = sshll.u32 (%p46_p3), %s234_s30, 7 }
  0x10   : > { %s1537_s11 = scalar_lea.vmem (%p46_p3), %s1672_s0, %s1188_s7  ;;  %s236_s12 = scalar_lea.vmem (%p46_p3), [#allocation3], %s1117_s8 }
  0x11   : > { %v255_v0 = vld [vmem:[%s1537_s11] sm:$0xff] (%p46_p3)  ;;  %v257_v1 = vld [vmem:[%s1537_s11 + $0x8] sm:$0xff] (%p46_p3) }
  0x12   : > { %v259_v2 = vld [vmem:[%s1537_s11 + $0x40] sm:$0xff] (%p46_p3)  ;;  %256 = vst [vmem:[%s236_s12] sm:$0xff] (%p46_p3), %v255_v0  ;;  %258 = vst [vmem:[%s236_s12 + $0x8] sm:$0xff] (%p46_p3), %v257_v1  ;;  %v261_v3 = vld [vmem:[%s1537_s11 + $0x48] sm:$0xff] (%p46_p3) }
  0x13   : > { %260 = vst [vmem:[%s236_s12 + $0x10] sm:$0xff] (%p46_p3), %v259_v2  ;;  %v263_v4 = vld [vmem:[%s1537_s11 + $0x80] sm:$0xff] (%p46_p3)  ;;  %v265_v5 = vld [vmem:[%s1537_s11 + $0x88] sm:$0xff] (%p46_p3)  ;;  %262 = vst [vmem:[%s236_s12 + $0x18] sm:$0xff] (%p46_p3), %v261_v3 }
  0x14   : > { %264 = vst [vmem:[%s236_s12 + $0x20] sm:$0xff] (%p46_p3), %v263_v4  ;;  %266 = vst [vmem:[%s236_s12 + $0x28] sm:$0xff] (%p46_p3), %v265_v5  ;;  %v267_v6 = vld [vmem:[%s1537_s11 + $0xc0] sm:$0xff] (%p46_p3)  ;;  %v269_v7 = vld [vmem:[%s1537_s11 + $0xc8] sm:$0xff] (%p46_p3) }
  0x15   : > { %v271_v8 = vld [vmem:[%s1537_s11 + $0x100] sm:$0xff]  ;;  %268 = vst [vmem:[%s236_s12 + $0x30] sm:$0xff] %v267_v6  ;;  %270 = vst [vmem:[%s236_s12 + $0x38] sm:$0xff] %v269_v7  ;;  %v273_v9 = vld [vmem:[%s1537_s11 + $0x108] sm:$0xff] }
  0x16   : > { %272 = vst [vmem:[%s236_s12 + $0x40] sm:$0xff] %v271_v8  ;;  %v275_v10 = vld [vmem:[%s1537_s11 + $0x140] sm:$0xff]  ;;  %v277_v11 = vld [vmem:[%s1537_s11 + $0x148] sm:$0xff]  ;;  %274 = vst [vmem:[%s236_s12 + $0x48] sm:$0xff] %v273_v9 }
  0x17   : > { %276 = vst [vmem:[%s236_s12 + $0x50] sm:$0xff] %v275_v10  ;;  %278 = vst [vmem:[%s236_s12 + $0x58] sm:$0xff] %v277_v11  ;;  %v279_v12 = vld [vmem:[%s1537_s11 + $0x180] sm:$0xff]  ;;  %v281_v13 = vld [vmem:[%s1537_s11 + $0x188] sm:$0xff] }
  0x18   : > { %v283_v14 = vld [vmem:[%s1537_s11 + $0x1c0] sm:$0xff]  ;;  %280 = vst [vmem:[%s236_s12 + $0x60] sm:$0xff] %v279_v12  ;;  %282 = vst [vmem:[%s236_s12 + $0x68] sm:$0xff] %v281_v13  ;;  %v285_v15 = vld [vmem:[%s1537_s11 + $0x1c8] sm:$0xff] }
  0x19   : > { %284 = vst [vmem:[%s236_s12 + $0x70] sm:$0xff] %v283_v14  ;;  %286 = vst [vmem:[%s236_s12 + $0x78] sm:$0xff] %v285_v15 }
  0x1a PF: > { %p1120_p6 = scmp.ge.s32.totalorder %s1455_s25, 1  ;;  %p300_p7 = scmp.lt.s32.totalorder %s1455_s25, 5 }
  0x1c   : > { %p301_p8 = pnand %p1120_p6, %p300_p7 }
  0x1d   : > { %s307_s13 = sand.u32 (!%p301_p8), 1, %s1439_s21   ;;  %s1122_s14 = sshll.u32 (!%p301_p8), %s1447_s23, 6 }
  0x1e   : > { %304 = sbr.rel (%p301_p8) target bundleno = 344 (0x158), region = 63  ;;  %s1121_s15 = sshll.u32 (!%p301_p8), %s307_s13, 7 }
  0x1f   : > { %p349_p9 = scmp.lt.s32.totalorder (!%p301_p8), %s1122_s14, 255  ;;  %s1564_s20 = scalar_lea.vmem (!%p301_p8), [#allocation3], %s1121_s15 }
  0x20   : > { %p1124_p10 = scmp.ne.s32.totalorder (!%p301_p8), %s1447_s23, 0 }
  0x25   : > { %s1686_s14 = smov (!%p349_p9, %s1122_s14), 255  ;;  %370 = sbr.rel (%p1124_p10) target bundleno = 44 (0x2c), region = 71 }
  0x26   : > { %s1123_s16 = sshll.u32 %s1686_s14, 2  ;;  %v1457_v16 = vmov (!%p1124_p10), 0.0  }
  0x27   : > { %s1562_s19 = scalar_lea.vmem %s1673_s1, %s1123_s16  ;;  %371 = vst [vmem:[#allocation2] sm:$0xff] (!%p1124_p10), %v1457_v16  ;;  %372 = vst [vmem:[#allocation2 + $0x8] sm:$0xff] (!%p1124_p10), %v1457_v16 }
  0x28   : > { %373 = vst [vmem:[#allocation2 + $0x10] sm:$0xff] (!%p1124_p10), %v1457_v16  ;;  %374 = vst [vmem:[#allocation2 + $0x18] sm:$0xff] (!%p1124_p10), %v1457_v16 }
  0x29   : > { %375 = vst [vmem:[#allocation2 + $0x20] sm:$0xff] (!%p1124_p10), %v1457_v16  ;;  %376 = vst [vmem:[#allocation2 + $0x28] sm:$0xff] (!%p1124_p10), %v1457_v16 }
  0x2a   : > { %377 = vst [vmem:[#allocation2 + $0x30] sm:$0xff] (!%p1124_p10), %v1457_v16  ;;  %378 = vst [vmem:[#allocation2 + $0x38] sm:$0xff] (!%p1124_p10), %v1457_v16 }
  0x2c PF: > { %v1361_v17 = vld [vmem:[%s1562_s19 + $0x40] sm:$0xff]   ;;  %v1365_v21 = vld [vmem:[%s1562_s19 + $0x48] sm:$0xff]   ;;  %v1369_v25 = vld [vmem:[%s1562_s19 + $0x50] sm:$0xff]   ;;  %p1173_p11 = scmp.ne.s32.totalorder %s1447_s23, 3 }
  0x2d   : > { %v1362_v18 = vld [vmem:[%s1562_s19 + $0xc0] sm:$0xff]   ;;  %1239 = vmatprep.subr.bf16.mxu0 %v1361_v17  ;;  %v1366_v22 = vld [vmem:[%s1562_s19 + $0xc8] sm:$0xff]   ;;  %v1370_v26 = vld [vmem:[%s1562_s19 + $0xd0] sm:$0xff]  }
  0x2e   : > { %v1363_v19 = vld [vmem:[%s1562_s19] sm:$0xff]   ;;  %1279 = vmatprep.subr.bf16.mxu1 %v1362_v18  ;;  %v1367_v23 = vld [vmem:[%s1562_s19 + $0x8] sm:$0xff]   ;;  %v1371_v27 = vld [vmem:[%s1562_s19 + $0x10] sm:$0xff]  }
  0x2f   : > { %v1364_v20 = vld [vmem:[%s1562_s19 + $0x80] sm:$0xff]   ;;  %1240 = vmatpush3.bf16.msra.mxu0 %v1363_v19  ;;  %v1368_v24 = vld [vmem:[%s1562_s19 + $0x88] sm:$0xff]   ;;  %v1372_v28 = vld [vmem:[%s1562_s19 + $0x90] sm:$0xff]  }
  0x30   : > { %1280 = vmatpush3.bf16.msra.mxu1 %v1364_v20  ;;  %1241 = vmatprep.subr.bf16.mxu0 %v1365_v21  ;;  %v1373_v29 = vld [vmem:[%s1562_s19 + $0x58] sm:$0xff]   ;;  %v1377_v33 = vld [vmem:[%s1562_s19 + $0x60] sm:$0xff]   ;;  %v1381_v37 = vld [vmem:[%s1562_s19 + $0x68] sm:$0xff]  }
  0x31   : > { %1281 = vmatprep.subr.bf16.mxu1 %v1366_v22  ;;  %v1374_v30 = vld [vmem:[%s1562_s19 + $0xd8] sm:$0xff]   ;;  %v1378_v34 = vld [vmem:[%s1562_s19 + $0xe0] sm:$0xff]   ;;  %v1382_v38 = vld [vmem:[%s1562_s19 + $0xe8] sm:$0xff]  }
  0x32   : > { %v1375_v31 = vld [vmem:[%s1562_s19 + $0x18] sm:$0xff]   ;;  %v1379_v35 = vld [vmem:[%s1562_s19 + $0x20] sm:$0xff]   ;;  %v1383_v39 = vld [vmem:[%s1562_s19 + $0x28] sm:$0xff]  }
  0x33   : > { %1242 = vmatpush3.bf16.msra.mxu0 %v1367_v23  ;;  %v1376_v32 = vld [vmem:[%s1562_s19 + $0x98] sm:$0xff]   ;;  %v1380_v36 = vld [vmem:[%s1562_s19 + $0xa0] sm:$0xff]   ;;  %v1384_v40 = vld [vmem:[%s1562_s19 + $0xa8] sm:$0xff]  }
  0x34   : > { %1282 = vmatpush3.bf16.msra.mxu1 %v1368_v24  ;;  %1243 = vmatprep.subr.bf16.mxu0 %v1369_v25  ;;  %v1385_v41 = vld [vmem:[%s1562_s19 + $0x70] sm:$0xff]   ;;  %v1389_v45 = vld [vmem:[%s1562_s19 + $0x78] sm:$0xff]   ;;  %v379_v10 = vld [vmem:[#allocation2] sm:$0xff] }
  0x35   : > { %1283 = vmatprep.subr.bf16.mxu1 %v1370_v26  ;;  %v1386_v42 = vld [vmem:[%s1562_s19 + $0xf0] sm:$0xff]   ;;  %v1390_v46 = vld [vmem:[%s1562_s19 + $0xf8] sm:$0xff]   ;;  %v380_v15 = vld [vmem:[#allocation2 + $0x8] sm:$0xff] }
  0x36   : > { %v1387_v43 = vld [vmem:[%s1562_s19 + $0x30] sm:$0xff]   ;;  %v1391_v47 = vld [vmem:[%s1562_s19 + $0x38] sm:$0xff]  }
  0x37   : > { %1244 = vmatpush3.bf16.msra.mxu0 %v1371_v27  ;;  %v1388_v44 = vld [vmem:[%s1562_s19 + $0xb0] sm:$0xff]   ;;  %v1392_v48 = vld [vmem:[%s1562_s19 + $0xb8] sm:$0xff]  }
  0x38   : > { %1284 = vmatpush3.bf16.msra.mxu1 %v1372_v28  ;;  %1245 = vmatprep.subr.bf16.mxu0 %v1373_v29  ;;  %v1393_v49 = vld [vmem:[%s1564_s20] ss:$16 sps:$4 sm:$0xff]   ;;  %v1395_v50 = vld [vmem:[%s1564_s20 + $0x4] ss:$16 sps:$4 sm:$0xff]   ;;  %v1396_v51 = vld [vmem:[%s1564_s20 + $0x8] ss:$16 sps:$4 sm:$0xff]  }
  0x39   : > { %1285 = vmatprep.subr.bf16.mxu1 %v1374_v30  ;;  %v1398_v52 = vld [vmem:[%s1564_s20 + $0xc] ss:$16 sps:$4 sm:$0xff]   ;;  %771 = vmatprep.mubr.bf16.mxu0 %v1395_v50  ;;  %v1399_v53 = vld [vmem:[%s1564_s20 + $0x24] ss:$16 sps:$4 sm:$0xff]   ;;  %v1403_v55 = vld [vmem:[%s1564_s20 + $0x20] ss:$16 sps:$4 sm:$0xff]  }
  0x3a   : > { %836 = vmatprep.mubr.bf16.mxu1 %v1398_v52  ;;  %v1401_v54 = vld [vmem:[%s1564_s20 + $0x2c] ss:$16 sps:$4 sm:$0xff]   ;;  %v1404_v56 = vld [vmem:[%s1564_s20 + $0x28] ss:$16 sps:$4 sm:$0xff]   ;;  %v1405_v57 = vld [vmem:[%s1564_s20 + $0x44] ss:$16 sps:$4 sm:$0xff]  }
  0x3b   : > { %1246 = vmatpush3.bf16.msra.mxu0 %v1375_v31  ;;  %v1407_v58 = vld [vmem:[%s1564_s20 + $0x4c] ss:$16 sps:$4 sm:$0xff]   ;;  %v1409_v59 = vld [vmem:[%s1564_s20 + $0x40] ss:$16 sps:$4 sm:$0xff]   ;;  %v1410_v60 = vld [vmem:[%s1564_s20 + $0x48] ss:$16 sps:$4 sm:$0xff]  }
  0x3c   : > { %1286 = vmatpush3.bf16.msra.mxu1 %v1376_v32  ;;  %1247 = vmatprep.subr.bf16.mxu0 %v1377_v33  ;;  %v1411_v61 = vld [vmem:[%s1564_s20 + $0x64] ss:$16 sps:$4 sm:$0xff]   ;;  %v1413_v62 = vld [vmem:[%s1564_s20 + $0x6c] ss:$16 sps:$4 sm:$0xff]   ;;  %v1415_v63 = vld [vmem:[%s1564_s20 + $0x60] ss:$16 sps:$4 sm:$0xff]  }
  0x3d   : > { %1287 = vmatprep.subr.bf16.mxu1 %v1378_v34  ;;  %v1416_v0 = vld [vmem:[%s1564_s20 + $0x68] ss:$16 sps:$4 sm:$0xff]   ;;  %v381_v28 = vld [vmem:[#allocation2 + $0x10] sm:$0xff] }
  0x3e   : > { %v382_v33 = vld [vmem:[#allocation2 + $0x18] sm:$0xff] }
  0x3f   : > { %1248 = vmatpush3.bf16.msra.mxu0 %v1379_v35 }
  0x40   : > { %1288 = vmatpush3.bf16.msra.mxu1 %v1380_v36  ;;  %1249 = vmatprep.subr.bf16.mxu0 %v1381_v37 }
  0x41   : > { %1289 = vmatprep.subr.bf16.mxu1 %v1382_v38 }
  0x43   : > { %1250 = vmatpush3.bf16.msra.mxu0 %v1383_v39 }
  0x44   : > { %1290 = vmatpush3.bf16.msra.mxu1 %v1384_v40  ;;  %1251 = vmatprep.subr.bf16.mxu0 %v1385_v41 }
  0x45   : > { %1291 = vmatprep.subr.bf16.mxu1 %v1386_v42 }
  0x47   : > { %1252 = vmatpush3.bf16.msra.mxu0 %v1387_v43 }
  0x48   : > { %1292 = vmatpush3.bf16.msra.mxu1 %v1388_v44  ;;  %1253 = vmatprep.subr.bf16.mxu0 %v1389_v45 }
  0x49   : > { %1293 = vmatprep.subr.bf16.mxu1 %v1390_v46  ;;  %v383_v46 = vld [vmem:[#allocation2 + $0x20] sm:$0xff] }
  0x4b   : > { %1254 = vmatpush3.bf16.msra.mxu0 %v1391_v47 }
  0x4c   : > { %1294 = vmatpush3.bf16.msra.mxu1 %v1392_v48 }
  0x4e   : > { %772 = vmatmul.mubr.bf16.vlgmr.msra.gmra.mrb[0].mxu0 %v1393_v49 }
  0x4f   : > { %837 = vmatmul.mubr.bf16.vlgmr.msra.gmra.mrb[0].mxu1 %v1396_v51  ;;  %779 = vmatprep.mubr.bf16.mxu0 %v1399_v53  ;;  %v384_v51 = vld [vmem:[#allocation2 + $0x28] sm:$0xff] }
  0x50   : > { %844 = vmatprep.mubr.bf16.mxu1 %v1401_v54 }
  0x56   : > { %780 = vmatmul.mubr.bf16.gmra.mrb[4].mxu0 %v1403_v55 }
  0x57   : > { %845 = vmatmul.mubr.bf16.gmra.mrb[4].mxu1 %v1404_v56  ;;  %787 = vmatprep.mubr.bf16.mxu0 %v1405_v57 }
  0x58   : > { %852 = vmatprep.mubr.bf16.mxu1 %v1407_v58 }
  0x5e   : > { %788 = vmatmul.mubr.bf16.gmra.mrb[8].mxu0 %v1409_v59 }
  0x5f   : > { %853 = vmatmul.mubr.bf16.gmra.mrb[8].mxu1 %v1410_v60  ;;  %795 = vmatprep.mubr.bf16.mxu0 %v1411_v61 }
  0x60   : > { %860 = vmatprep.mubr.bf16.mxu1 %v1413_v62 }
  0x66   : > { %796 = vmatmul.mubr.bf16.gmra.mrb[12].mxu0 %v1415_v63 }
  0x67   : > { %861 = vmatmul.mubr.bf16.gmra.mrb[12].mxu1 %v1416_v0  ;;  %v385_v0 = vld [vmem:[#allocation2 + $0x30] sm:$0xff] }
 0x121   : > { %v1255_v1 = vpop.f32.mrb[0].mxu0 }
 0x122   : > { %v1295_v2 = vpop.f32.mrb[0].mxu1  ;;  %v1256_v3 = vpop.f32.mrb[1].mxu0 }
 0x123   : > { %v1257_v4 = vadd.f32 %v1256_v3, %v1255_v1  ;;  %v1296_v5 = vpop.f32.mrb[1].mxu1  ;;  %v1258_v6 = vpop.f32.mrb[2].mxu0 }
 0x124   : > { %v1297_v7 = vadd.f32 %v1296_v5, %v1295_v2  ;;  %v1298_v8 = vpop.f32.mrb[2].mxu1  ;;  %v1259_v9 = vpop.f32.mrb[3].mxu0  ;;  %v386_v5 = vld [vmem:[#allocation2 + $0x38] sm:$0xff] }
 0x125   : > { %v1260_v11 = vadd.f32 %v1259_v9, %v1258_v6  ;;  %v1299_v12 = vpop.f32.mrb[3].mxu1 }
 0x126   : > { %v839_v13 = vadd.f32 %v1297_v7, %v1257_v4  ;;  %v1300_v14 = vadd.f32 %v1299_v12, %v1298_v8  ;;  %v962_v12 = vlaneseq (!%p1173_p11) }
 0x128   : > { %v869_v16 = vadd.f32 %v839_v13, %v379_v10  ;;  %v842_v17 = vadd.f32 %v1300_v14, %v1260_v11  ;;  %v1174_v11 = vld [vmem:[%s1674_s2] ss:$0 sm:$0xff] (!%p1173_p11) }
 0x129   : > { %v1261_v18 = vpop.f32.mrb[4].mxu0 }
 0x12a   : > { %877 = vst [vmem:[#allocation2] sm:$0xff] %v869_v16  ;;  %v870_v19 = vadd.f32 %v842_v17, %v380_v15  ;;  %v1301_v20 = vpop.f32.mrb[4].mxu1  ;;  %v1262_v21 = vpop.f32.mrb[5].mxu0  ;;  %v1175_v15 = vld [vmem:[%s1675_s3] ss:$0 sm:$0xff] (!%p1173_p11) }
 0x12b   : > { %v1263_v22 = vadd.f32 %v1262_v21, %v1261_v18  ;;  %v1302_v23 = vpop.f32.mrb[5].mxu1  ;;  %v1264_v24 = vpop.f32.mrb[6].mxu0  ;;  %v1198_v16 = vld [vmem:[%s1677_s5] sm:$0xff] (!%p1173_p11)  }
 0x12c   : > { %878 = vst [vmem:[#allocation2 + $0x8] sm:$0xff] %v870_v19  ;;  %v1303_v25 = vadd.f32 %v1302_v23, %v1301_v20  ;;  %v1304_v26 = vpop.f32.mrb[6].mxu1  ;;  %v1265_v27 = vpop.f32.mrb[7].mxu0  ;;  %v951_v17 = vld [vmem:[%s1676_s4] sm:$0x1] (!%p1173_p11)  ;;  %v1199_v18 = vunpack.c.l.bf16 (!%p1173_p11), %v1198_v16  ;;  %v1200_v19 = vunpack.c.h.bf16 (!%p1173_p11), %v1198_v16  ;;  %v963_v20 = vshrl.u32 (!%p1173_p11), %v962_v12, 7 }
 0x12d   : > { %v1266_v29 = vadd.f32 %v1265_v27, %v1264_v24  ;;  %v1305_v30 = vpop.f32.mrb[7].mxu1  ;;  %vm952_vm0 = vcmp.ne.f32.partialorder (!%p1173_p11), %v951_v17, 0.0  ;;  %v1233_v23 = vld [vmem:[%s1677_s5 + $0x8] sm:$0xff] (!%p1173_p11)  }
 0x12e   : > { %v847_v31 = vadd.f32 %v1303_v25, %v1263_v22  ;;  %v1306_v32 = vadd.f32 %v1305_v30, %v1304_v26  ;;  %v1458_v26 = vmov (!%p1173_p11), 0  }
 0x12f   : > { %v961_v27 = vsel (!%p1173_p11), %vm952_vm0, 1, %v1458_v26 }
 0x130   : > { %v871_v34 = vadd.f32 %v847_v31, %v381_v28  ;;  %v850_v35 = vadd.f32 %v1306_v32, %v1266_v29  ;;  %v1234_v31 = vld [vmem:[%s1677_s5 + $0x10] sm:$0xff] (!%p1173_p11)   ;;  %v964_v32 = vsub.s32 (!%p1173_p11), 0, %v963_v20 }
 0x131   : > { %v1267_v36 = vpop.f32.mrb[8].mxu0  ;;  %v889_v9 = vld [vmem:[#allocation2] sm:$0xff] (!%p1173_p11) }
 0x132   : > { %879 = vst [vmem:[#allocation2 + $0x10] sm:$0xff] %v871_v34  ;;  %v872_v37 = vadd.f32 %v850_v35, %v382_v33  ;;  %v1307_v38 = vpop.f32.mrb[8].mxu1  ;;  %v1268_v39 = vpop.f32.mrb[9].mxu0  ;;  %v904_v13 = vmul.f32 (!%p1173_p11), %v1174_v11, %v889_v9  ;;  %v1203_v34 = vunpack.c.l.bf16 (!%p1173_p11), %v1233_v23  ;;  %v1204_v35 = vunpack.c.h.bf16 (!%p1173_p11), %v1233_v23 }
 0x133   : > { %v1269_v40 = vadd.f32 %v1268_v39, %v1267_v36  ;;  %v1308_v41 = vpop.f32.mrb[9].mxu1  ;;  %v1270_v42 = vpop.f32.mrb[10].mxu0  ;;  %v890_v10 = vld [vmem:[#allocation2 + $0x8] sm:$0xff] (!%p1173_p11) }
 0x134   : > { %880 = vst [vmem:[#allocation2 + $0x18] sm:$0xff] %v872_v37  ;;  %v1309_v43 = vadd.f32 %v1308_v41, %v1307_v38  ;;  %v1310_v44 = vpop.f32.mrb[10].mxu1  ;;  %v1271_v45 = vpop.f32.mrb[11].mxu0  ;;  %v905_v14 = vmul.f32 (!%p1173_p11), %v1174_v11, %v890_v10  ;;  %v919_v24 = vadd.f32 (!%p1173_p11), %v1175_v15, %v904_v13 }
 0x135   : > { %v1272_v47 = vadd.f32 %v1271_v45, %v1270_v42  ;;  %v1311_v48 = vpop.f32.mrb[11].mxu1 }
 0x136   : > { %v855_v49 = vadd.f32 %v1309_v43, %v1269_v40  ;;  %v1312_v50 = vadd.f32 %v1311_v48, %v1310_v44  ;;  %v920_v25 = vadd.f32 (!%p1173_p11), %v1175_v15, %v905_v14  ;;  %v943_v36 = vadd.f32 (!%p1173_p11), %v1199_v18, %v919_v24 }
 0x137   : > { %v965_v40 = vrot.slane (!%p1173_p11), %v961_v27, %v964_v32  ;;  %v1207_v43 = vunpack.c.l.bf16 (!%p1173_p11), %v1234_v31 }
 0x138   : > { %v873_v52 = vadd.f32 %v855_v49, %v383_v46  ;;  %v858_v53 = vadd.f32 %v1312_v50, %v1272_v47  ;;  %v944_v37 = vadd.f32 (!%p1173_p11), %v1200_v19, %v920_v25  ;;  %v953_v44 = vmax.f32 (!%p1173_p11), %v943_v36, 0.0 }
 0x139   : > { %v1273_v54 = vpop.f32.mrb[12].mxu0  ;;  %v891_v21 = vld [vmem:[#allocation2 + $0x10] sm:$0xff] (!%p1173_p11)  ;;  %vm966_vm1 = vcmp.eq.s32.totalorder (!%p1173_p11), %v965_v40, 1 }
 0x13a   : > { %881 = vst [vmem:[#allocation2 + $0x20] sm:$0xff] %v873_v52  ;;  %v874_v55 = vadd.f32 %v858_v53, %v384_v51  ;;  %v1313_v56 = vpop.f32.mrb[12].mxu1  ;;  %v1274_v57 = vpop.f32.mrb[13].mxu0  ;;  %v906_v28 = vmul.f32 (!%p1173_p11), %v1174_v11, %v891_v21  ;;  %v954_v45 = vmax.f32 (!%p1173_p11), %v944_v37, 0.0  ;;  %v1208_v51 = vunpack.c.h.bf16 (!%p1173_p11), %v1234_v31  ;;  %v1235_v53 = vld [vmem:[%s1677_s5 + $0x18] sm:$0xff] (!%p1173_p11)  }
 0x13b   : > { %v1275_v58 = vadd.f32 %v1274_v57, %v1273_v54  ;;  %v1314_v59 = vpop.f32.mrb[13].mxu1  ;;  %v1276_v60 = vpop.f32.mrb[14].mxu0  ;;  %v892_v22 = vld [vmem:[#allocation2 + $0x18] sm:$0xff] (!%p1173_p11)  ;;  %v967_v54 = vsel (!%p1173_p11), %vm966_vm1, %v953_v44, %v943_v36 }
 0x13c   : > { %882 = vst [vmem:[#allocation2 + $0x28] sm:$0xff] %v874_v55  ;;  %v1315_v61 = vadd.f32 %v1314_v59, %v1313_v56  ;;  %v1316_v62 = vpop.f32.mrb[14].mxu1  ;;  %v1277_v63 = vpop.f32.mrb[15].mxu0  ;;  %v907_v33 = vmul.f32 (!%p1173_p11), %v1174_v11, %v892_v22  ;;  %v921_v38 = vadd.f32 (!%p1173_p11), %v1175_v15, %v906_v28  ;;  %v968_v55 = vsel (!%p1173_p11), %vm966_vm1, %v954_v45, %v944_v37 }
 0x13d   : > { %v1278_v1 = vadd.f32 %v1277_v63, %v1276_v60  ;;  %v1317_v2 = vpop.f32.mrb[15].mxu1 }
 0x13e   : > { %v863_v3 = vadd.f32 %v1315_v61, %v1275_v58  ;;  %v1318_v4 = vadd.f32 %v1317_v2, %v1316_v62  ;;  %888 = sbr.rel (%p1173_p11) target bundleno = 344 (0x158), region = 75  ;;  %v922_v41 = vadd.f32 (!%p1173_p11), %v1175_v15, %v907_v33  ;;  %v945_v46 = vadd.f32 (!%p1173_p11), %v1203_v34, %v921_v38 }
 0x13f   : > { %v1216_v58 = vpack.c.bf16 (!%p1173_p11), %v968_v55, %v967_v54 }
 0x140   : > { %v875_v6 = vadd.f32 %v863_v3, %v385_v0  ;;  %v866_v7 = vadd.f32 %v1318_v4, %v1278_v1  ;;  %v946_v49 = vadd.f32 (!%p1173_p11), %v1204_v35, %v922_v41  ;;  %v955_v56 = vmax.f32 (!%p1173_p11), %v945_v46, 0.0 }
 0x141   : > { %v893_v29 = vld [vmem:[#allocation2 + $0x20] sm:$0xff] (!%p1173_p11)  ;;  %v1211_v1 = vunpack.c.l.bf16 (!%p1173_p11), %v1235_v53  ;;  %1217 = vst [vmem:[%s1678_s6] sm:$0xff] (!%p1173_p11), %v1216_v58  }
 0x142   : > { %883 = vst [vmem:[#allocation2 + $0x30] sm:$0xff] %v875_v6  ;;  %v876_v8 = vadd.f32 %v866_v7, %v386_v5  ;;  %v908_v39 = vmul.f32 (!%p1173_p11), %v1174_v11, %v893_v29  ;;  %v956_v59 = vmax.f32 (!%p1173_p11), %v946_v49, 0.0  ;;  %v969_v62 = vsel (!%p1173_p11), %vm966_vm1, %v955_v56, %v945_v46 }
 0x143   : > { %v894_v30 = vld [vmem:[#allocation2 + $0x28] sm:$0xff] (!%p1173_p11)  ;;  %v1212_v5 = vunpack.c.h.bf16 (!%p1173_p11), %v1235_v53 }
 0x144   : > { %884 = vst [vmem:[#allocation2 + $0x38] sm:$0xff] %v876_v8  ;;  %v909_v42 = vmul.f32 (!%p1173_p11), %v1174_v11, %v894_v30  ;;  %v923_v47 = vadd.f32 (!%p1173_p11), %v1175_v15, %v908_v39  ;;  %v970_v2 = vsel (!%p1173_p11), %vm966_vm1, %v956_v59, %v946_v49 }
 0x145   : > { %v1221_v6 = vpack.c.bf16 %v970_v2, %v969_v62 }
 0x146   : > { %v924_v50 = vadd.f32 %v1175_v15, %v909_v42  ;;  %v947_v57 = vadd.f32 %v1207_v43, %v923_v47 }
 0x147   : > { %1236 = vst [vmem:[%s1678_s6 + $0x8] sm:$0xff] %v1221_v6  }
 0x148   : > { %v948_v60 = vadd.f32 %v1208_v51, %v924_v50  ;;  %v957_v63 = vmax.f32 %v947_v57, 0.0 }
 0x149   : > { %v895_v48 = vld [vmem:[#allocation2 + $0x30] sm:$0xff] }
 0x14a   : > { %v910_v61 = vmul.f32 %v1174_v11, %v895_v48  ;;  %v958_v3 = vmax.f32 %v948_v60, 0.0  ;;  %v971_v7 = vsel %vm966_vm1, %v957_v63, %v947_v57 }
 0x14b   : > { %v896_v52 = vld [vmem:[#allocation2 + $0x38] sm:$0xff] }
 0x14c   : > { %v911_v0 = vmul.f32 %v1174_v11, %v896_v52  ;;  %v925_v4 = vadd.f32 %v1175_v15, %v910_v61  ;;  %v972_v9 = vsel %vm966_vm1, %v958_v3, %v948_v60 }
 0x14d   : > { %v1226_v11 = vpack.c.bf16 %v972_v9, %v971_v7 }
 0x14e   : > { %v926_v8 = vadd.f32 %v1175_v15, %v911_v0  ;;  %v949_v10 = vadd.f32 %v1211_v1, %v925_v4 }
 0x14f   : > { %1237 = vst [vmem:[%s1678_s6 + $0x10] sm:$0xff] %v1226_v11  }
 0x150   : > { %v950_v12 = vadd.f32 %v1212_v5, %v926_v8  ;;  %v959_v13 = vmax.f32 %v949_v10, 0.0 }
 0x152   : > { %v960_v14 = vmax.f32 %v950_v12, 0.0  ;;  %v973_v16 = vsel %vm966_vm1, %v959_v13, %v949_v10 }
 0x154   : > { %v974_v17 = vsel %vm966_vm1, %v960_v14, %v950_v12 }
 0x155   : > { %v1231_v15 = vpack.c.bf16 %v974_v17, %v973_v16 }
 0x157   : > { %1238 = vst [vmem:[%s1678_s6 + $0x18] sm:$0xff] %v1231_v15  }
 0x158 PF: > { %s16_s25 = sadd.s32 1, %s1455_s25   ;;  %s1679_s21 = smov %s1443_s22 }
 0x159   : > { %p13_p12 = scmp.ge.s32.totalorder %s16_s25, 6   ;;  %s1680_s22 = smov %s1529_s29 }
 0x15a   : > { %s1681_s23 = smov %s1451_s24  ;;  %s1682_s24 = smov %s1684_s26 }
 0x15b   :  { %15 = sbr.rel (!%p13_p12) target bundleno = 3 (0x3), region = 116 }

</bundles_post_ra>
